<compile_context>
chip_gen: v5e
topology: v5e:2x2
jax: 0.10.0
libtpu: 0.0.40
codegen_flags: <defaults>
</compile_context>

<pallas_src>
import functools
import math

import jax
import jax.numpy as jnp
from jax.experimental import pallas as pl
from jax.experimental.pallas import tpu as pltpu


def mha_flash_kernel(q_ref, k_ref, v_ref, wq_ref, wk_ref, wv_ref, wo_ref,
                     o_ref,
                     qp_ref, m_ref, l_ref, acc_ref,
                     *, num_heads, head_dim):
    """Fused projections + flash attention for one (batch, q-tile, kv-tile)."""
    ki = pl.program_id(2)
    tq = qp_ref.shape[0]

    # ---- first KV step for this (batch, q-tile): project Q, reset state ----
    @pl.when(ki == 0)
    def _init():
        xq = q_ref[0].astype(wq_ref.dtype)                      # (TQ, C) bf16
        # 1/sqrt(head_dim) is folded into wq by the wrapper.
        qp_ref[...] = jnp.dot(
            xq, wq_ref[...], preferred_element_type=jnp.float32
        ).astype(qp_ref.dtype)
        m_ref[...] = jnp.full(m_ref.shape, -jnp.inf, dtype=m_ref.dtype)
        l_ref[...] = jnp.zeros(l_ref.shape, dtype=l_ref.dtype)
        acc_ref[...] = jnp.zeros(acc_ref.shape, dtype=acc_ref.dtype)

    # ---- project the current K/V tile (one (TK,C)x(C,C) matmul each) ----
    xk = k_ref[0].astype(wk_ref.dtype)                          # (TK, C) bf16
    xv = v_ref[0].astype(wv_ref.dtype)
    kp = jnp.dot(xk, wk_ref[...],
                 preferred_element_type=jnp.float32).astype(wk_ref.dtype)
    vp = jnp.dot(xv, wv_ref[...],
                 preferred_element_type=jnp.float32).astype(wv_ref.dtype)
    qp = qp_ref[...]                                            # (TQ, C) bf16

    # ---- per-head online-softmax update (static head loop, register slices);
    #      the accumulator itself is touched exactly once (lane-dense) ----
    acc_prev = acc_ref[...]                                     # (TQ, C) f32
    new_acc_cols = []
    for h in range(num_heads):
        lo, hi = h * head_dim, (h + 1) * head_dim
        qh = qp[:, lo:hi]                                       # (TQ, Dh)
        kh = kp[:, lo:hi]                                       # (TK, Dh)
        vh = vp[:, lo:hi]                                       # (TK, Dh)
        s = jax.lax.dot_general(                                # (TQ, TK) f32
            qh, kh, (((1,), (1,)), ((), ())),
            preferred_element_type=jnp.float32)
        m_prev = m_ref[h]                                       # (TQ, 1)
        m_new = jnp.maximum(m_prev, jnp.max(s, axis=-1, keepdims=True))
        alpha = jnp.exp(m_prev - m_new)
        p = jnp.exp(s - m_new)
        l_ref[h] = alpha * l_ref[h] + jnp.sum(p, axis=-1, keepdims=True)
        m_ref[h] = m_new
        pv = jnp.dot(p.astype(vh.dtype), vh,                    # (TQ, Dh) f32
                     preferred_element_type=jnp.float32)
        new_acc_cols.append(alpha * acc_prev[:, lo:hi] + pv)
    acc_ref[...] = jnp.concatenate(new_acc_cols, axis=-1)       # single store

    # ---- last KV step: normalize and apply the output projection ----
    @pl.when(ki == pl.num_programs(2) - 1)
    def _finalize():
        acc = acc_ref[...]                                      # (TQ, C) f32
        out_cols = []
        for h in range(num_heads):
            lo, hi = h * head_dim, (h + 1) * head_dim
            inv_l = pl.reciprocal(l_ref[h], approx=True)        # EUP slot
            out_cols.append(acc[:, lo:hi] * inv_l)
        ctx = jnp.concatenate(out_cols, axis=-1).astype(wo_ref.dtype)
        o_ref[0] = jnp.dot(
            ctx, wo_ref[...], preferred_element_type=jnp.float32
        ).astype(o_ref.dtype)


def multi_head_attention(query, key, value, wq, wk, wv, wo, *, num_heads,
                         q_tile=256, kv_tile=512,
                         compute_dtype=jnp.bfloat16):
    """query/key/value: (B, L, C). wq/wk/wv/wo: (C, C) PyTorch (out, in)."""
    B, L, C = query.shape
    assert C % num_heads == 0, "channels must divide evenly across heads"
    head_dim = C // num_heads
    scale = 1.0 / math.sqrt(head_dim)

    tq = min(q_tile, L)
    tk = min(kv_tile, L)
    assert L % tq == 0 and L % tk == 0, "seq len must be divisible by tiles"
    assert (tq == L or tq % 8 == 0) and (tk == L or tk % 8 == 0)

    # Weight prep (plain-JAX glue): transpose to (C_in, C_out) so the kernel
    # computes x @ W, fold the softmax scale into Wq, cast to bf16 for the MXU.
    wq_t = (wq.T * scale).astype(compute_dtype)
    wk_t = wk.T.astype(compute_dtype)
    wv_t = wv.T.astype(compute_dtype)
    wo_t = wo.T.astype(compute_dtype)

    kernel = functools.partial(mha_flash_kernel, num_heads=num_heads,
                               head_dim=head_dim)

    q_spec = pl.BlockSpec((1, tq, C), lambda b, qi, ki: (b, qi, 0))
    kv_spec = pl.BlockSpec((1, tk, C), lambda b, qi, ki: (b, ki, 0))
    w_spec = pl.BlockSpec((C, C), lambda b, qi, ki: (0, 0))  # weights resident
    out_spec = pl.BlockSpec((1, tq, C), lambda b, qi, ki: (b, qi, 0))

    return pl.pallas_call(
        kernel,
        out_shape=jax.ShapeDtypeStruct((B, L, C), query.dtype),
        grid_spec=pltpu.PrefetchScalarGridSpec(
            num_scalar_prefetch=0,
            grid=(B, L // tq, L // tk),
            in_specs=[q_spec, kv_spec, kv_spec,
                      w_spec, w_spec, w_spec, w_spec],
            out_specs=out_spec,
            scratch_shapes=[
                pltpu.VMEM((tq, C), compute_dtype),            # projected Q
                pltpu.VMEM((num_heads, tq, 1), jnp.float32),   # running max m
                pltpu.VMEM((num_heads, tq, 1), jnp.float32),   # running sum l
                pltpu.VMEM((tq, C), jnp.float32),              # context acc
            ],
        ),
        compiler_params=pltpu.CompilerParams(
            dimension_semantics=("parallel", "parallel", "arbitrary"),
            vmem_limit_bytes=64 * 1024 * 1024,
        ),
    )(query, key, value, wq_t, wk_t, wv_t, wo_t)


def reference_mha(query, key, value, wq, wk, wv, wo, *, num_heads):
    """Pure-JAX f32 reference matching the PyTorch forward (mask=None, eval)."""
    B, L, C = query.shape
    dh = C // num_heads
    scale = 1.0 / math.sqrt(dh)
    q = (query @ wq.T).reshape(B, L, num_heads, dh).transpose(0, 2, 1, 3)
    k = (key @ wk.T).reshape(B, L, num_heads, dh).transpose(0, 2, 1, 3)
    v = (value @ wv.T).reshape(B, L, num_heads, dh).transpose(0, 2, 1, 3)
    attn = (q * scale) @ jnp.swapaxes(k, 2, 3)
    attn = jax.nn.softmax(attn, axis=-1)
    out = (attn @ v).transpose(0, 2, 1, 3).reshape(B, L, C)
    return out @ wo.T


if __name__ == "__main__":
    # Lane-dense small config (C, L multiples of 128); tiles chosen so the
    # grid genuinely exercises the q-tile and multi-KV-tile flash path.
    B, L, C, H = 2, 128, 128, 4

    root = jax.random.PRNGKey(0)
    kq, kk, kv, kwq, kwk, kwv, kwo = jax.random.split(root, 7)

    q_in = jax.random.normal(kq, (B, L, C), dtype=jnp.float32)
    k_in = jax.random.normal(kk, (B, L, C), dtype=jnp.float32)
    v_in = jax.random.normal(kv, (B, L, C), dtype=jnp.float32)

    # nn.Linear(C, C, bias=False) weights, shape (out_features, in_features).
    bound = 1.0 / math.sqrt(C)
    wq = jax.random.uniform(kwq, (C, C), jnp.float32, -bound, bound)
    wk = jax.random.uniform(kwk, (C, C), jnp.float32, -bound, bound)
    wv = jax.random.uniform(kwv, (C, C), jnp.float32, -bound, bound)
    wo = jax.random.uniform(kwo, (C, C), jnp.float32, -bound, bound)

    out = multi_head_attention(q_in, k_in, v_in, wq, wk, wv, wo,
                               num_heads=H, q_tile=64, kv_tile=64)
    out = jax.block_until_ready(out)

    ref = reference_mha(q_in, k_in, v_in, wq, wk, wv, wo, num_heads=H)
    assert out.shape == (B, L, C)
    max_err = float(jnp.max(jnp.abs(out - ref)))
    # bf16 matmul inputs (f32 accumulate) => tolerance set for bf16 rounding.
    assert jnp.allclose(out, ref, atol=2e-2, rtol=2e-2), (
        f"mismatch vs reference (max |err| = {max_err})")

    print("KERNEL_OK")
</pallas_src>

<mosaic_0001>
module attributes {stable_mosaic.version = 11 : i64} {
  func.func @mha_flash_kernel(%arg0: i32, %arg1: i32, %arg2: i32, %arg3: memref<1x64x128xf32, #tpu.memory_space<vmem>>, %arg4: memref<1x64x128xf32, #tpu.memory_space<vmem>>, %arg5: memref<1x64x128xf32, #tpu.memory_space<vmem>>, %arg6: memref<128x128xbf16, #tpu.memory_space<vmem>>, %arg7: memref<128x128xbf16, #tpu.memory_space<vmem>>, %arg8: memref<128x128xbf16, #tpu.memory_space<vmem>>, %arg9: memref<128x128xbf16, #tpu.memory_space<vmem>>, %arg10: memref<1x64x128xf32, #tpu.memory_space<vmem>>, %arg11: memref<64x128xbf16, #tpu.memory_space<vmem>>, %arg12: memref<4x64x1xf32, #tpu.memory_space<vmem>>, %arg13: memref<4x64x1xf32, #tpu.memory_space<vmem>>, %arg14: memref<64x128xf32, #tpu.memory_space<vmem>>) attributes {dimension_semantics = [#tpu.dimension_semantics<parallel>, #tpu.dimension_semantics<parallel>, #tpu.dimension_semantics<arbitrary>], iteration_bounds = array<i64: 2, 2, 2>, scalar_prefetch = 0 : i64, scratch_operands = 4 : i64, tpu.core_type = #tpu.core_type<tc>, window_params = [{transform_indices = @transform_0, window_bounds = array<i64: 1, 64, 128>}, {transform_indices = @transform_1, window_bounds = array<i64: 1, 64, 128>}, {transform_indices = @transform_2, window_bounds = array<i64: 1, 64, 128>}, {pipeline_mode = #tpu.pipeline_mode<synchronous>, transform_indices = @transform_3, window_bounds = array<i64: 128, 128>}, {pipeline_mode = #tpu.pipeline_mode<synchronous>, transform_indices = @transform_4, window_bounds = array<i64: 128, 128>}, {pipeline_mode = #tpu.pipeline_mode<synchronous>, transform_indices = @transform_5, window_bounds = array<i64: 128, 128>}, {pipeline_mode = #tpu.pipeline_mode<synchronous>, transform_indices = @transform_6, window_bounds = array<i64: 128, 128>}, {transform_indices = @transform_7, window_bounds = array<i64: 1, 64, 128>}]} {
    %c0_i32 = arith.constant 0 : i32
    %0 = arith.cmpi eq, %arg2, %c0_i32 : i32
    %1 = arith.extui %0 : i1 to i32
    %c0_i32_0 = arith.constant 0 : i32
    %2 = arith.cmpi ne, %1, %c0_i32_0 : i32
    scf.if %2 {
      %c0_79 = arith.constant 0 : index
      %c0_80 = arith.constant 0 : index
      %c0_81 = arith.constant 0 : index
      %150 = vector.load %arg3[%c0_79, %c0_80, %c0_81] : memref<1x64x128xf32, #tpu.memory_space<vmem>>, vector<1x64x128xf32>
      %151 = vector.shape_cast %150 : vector<1x64x128xf32> to vector<64x128xf32>
      %152 = arith.truncf %151 : vector<64x128xf32> to vector<64x128xbf16>
      %c0_82 = arith.constant 0 : index
      %c0_83 = arith.constant 0 : index
      %153 = vector.load %arg6[%c0_82, %c0_83] : memref<128x128xbf16, #tpu.memory_space<vmem>>, vector<128x128xbf16>
      %cst_84 = arith.constant dense<0.000000e+00> : vector<64x128xf32>
      %154 = tpu.matmul %152, %153, %cst_84 {dimension_numbers = #tpu.dot_dimension_numbers<[1], [0], [0], [1], [0, 0, 1, 1], [], []>} : vector<64x128xbf16>, vector<128x128xbf16>, vector<64x128xf32> -> vector<64x128xf32>
      %155 = arith.truncf %154 : vector<64x128xf32> to vector<64x128xbf16>
      %c0_85 = arith.constant 0 : index
      %c0_86 = arith.constant 0 : index
      %156 = vector.load %arg11[%c0_85, %c0_86] : memref<64x128xbf16, #tpu.memory_space<vmem>>, vector<64x128xbf16>
      tpu.vector_store %arg11[%c0_85, %c0_86], %155 {strides = array<i32>} : memref<64x128xbf16, #tpu.memory_space<vmem>>, vector<64x128xbf16>,
      %cst_87 = arith.constant 0xFF800000 : f32
      %157 = vector.broadcast %cst_87 : f32 to vector<4x64x1xf32>
      %c0_88 = arith.constant 0 : index
      %c0_89 = arith.constant 0 : index
      %c0_90 = arith.constant 0 : index
      %158 = vector.load %arg12[%c0_88, %c0_89, %c0_90] : memref<4x64x1xf32, #tpu.memory_space<vmem>>, vector<4x64x1xf32>
      tpu.vector_store %arg12[%c0_88, %c0_89, %c0_90], %157 {strides = array<i32>} : memref<4x64x1xf32, #tpu.memory_space<vmem>>, vector<4x64x1xf32>,
      %cst_91 = arith.constant 0.000000e+00 : f32
      %159 = vector.broadcast %cst_91 : f32 to vector<4x64x1xf32>
      %c0_92 = arith.constant 0 : index
      %c0_93 = arith.constant 0 : index
      %c0_94 = arith.constant 0 : index
      %160 = vector.load %arg13[%c0_92, %c0_93, %c0_94] : memref<4x64x1xf32, #tpu.memory_space<vmem>>, vector<4x64x1xf32>
      tpu.vector_store %arg13[%c0_92, %c0_93, %c0_94], %159 {strides = array<i32>} : memref<4x64x1xf32, #tpu.memory_space<vmem>>, vector<4x64x1xf32>,
      %cst_95 = arith.constant 0.000000e+00 : f32
      %161 = vector.broadcast %cst_95 : f32 to vector<64x128xf32>
      %c0_96 = arith.constant 0 : index
      %c0_97 = arith.constant 0 : index
      %162 = vector.load %arg14[%c0_96, %c0_97] : memref<64x128xf32, #tpu.memory_space<vmem>>, vector<64x128xf32>
      tpu.vector_store %arg14[%c0_96, %c0_97], %161 {strides = array<i32>} : memref<64x128xf32, #tpu.memory_space<vmem>>, vector<64x128xf32>,
    } else {
    }
    %c0 = arith.constant 0 : index
    %c0_1 = arith.constant 0 : index
    %c0_2 = arith.constant 0 : index
    %3 = vector.load %arg4[%c0, %c0_1, %c0_2] : memref<1x64x128xf32, #tpu.memory_space<vmem>>, vector<1x64x128xf32>
    %4 = vector.shape_cast %3 : vector<1x64x128xf32> to vector<64x128xf32>
    %5 = arith.truncf %4 : vector<64x128xf32> to vector<64x128xbf16>
    %c0_3 = arith.constant 0 : index
    %c0_4 = arith.constant 0 : index
    %c0_5 = arith.constant 0 : index
    %6 = vector.load %arg5[%c0_3, %c0_4, %c0_5] : memref<1x64x128xf32, #tpu.memory_space<vmem>>, vector<1x64x128xf32>
    %7 = vector.shape_cast %6 : vector<1x64x128xf32> to vector<64x128xf32>
    %8 = arith.truncf %7 : vector<64x128xf32> to vector<64x128xbf16>
    %c0_6 = arith.constant 0 : index
    %c0_7 = arith.constant 0 : index
    %9 = vector.load %arg7[%c0_6, %c0_7] : memref<128x128xbf16, #tpu.memory_space<vmem>>, vector<128x128xbf16>
    %cst = arith.constant dense<0.000000e+00> : vector<64x128xf32>
    %10 = tpu.matmul %5, %9, %cst {dimension_numbers = #tpu.dot_dimension_numbers<[1], [0], [0], [1], [0, 0, 1, 1], [], []>} : vector<64x128xbf16>, vector<128x128xbf16>, vector<64x128xf32> -> vector<64x128xf32>
    %11 = arith.truncf %10 : vector<64x128xf32> to vector<64x128xbf16>
    %c0_8 = arith.constant 0 : index
    %c0_9 = arith.constant 0 : index
    %12 = vector.load %arg8[%c0_8, %c0_9] : memref<128x128xbf16, #tpu.memory_space<vmem>>, vector<128x128xbf16>
    %cst_10 = arith.constant dense<0.000000e+00> : vector<64x128xf32>
    %13 = tpu.matmul %8, %12, %cst_10 {dimension_numbers = #tpu.dot_dimension_numbers<[1], [0], [0], [1], [0, 0, 1, 1], [], []>} : vector<64x128xbf16>, vector<128x128xbf16>, vector<64x128xf32> -> vector<64x128xf32>
    %14 = arith.truncf %13 : vector<64x128xf32> to vector<64x128xbf16>
    %c0_11 = arith.constant 0 : index
    %c0_12 = arith.constant 0 : index
    %15 = vector.load %arg11[%c0_11, %c0_12] : memref<64x128xbf16, #tpu.memory_space<vmem>>, vector<64x128xbf16>
    %c0_13 = arith.constant 0 : index
    %c0_14 = arith.constant 0 : index
    %16 = vector.load %arg14[%c0_13, %c0_14] : memref<64x128xf32, #tpu.memory_space<vmem>>, vector<64x128xf32>
    %17 = vector.extract_strided_slice %15 {offsets = [0, 0], sizes = [64, 32], strides = [1, 1]} : vector<64x128xbf16> to vector<64x32xbf16>
    %18 = vector.extract_strided_slice %11 {offsets = [0, 0], sizes = [64, 32], strides = [1, 1]} : vector<64x128xbf16> to vector<64x32xbf16>
    %19 = vector.extract_strided_slice %14 {offsets = [0, 0], sizes = [64, 32], strides = [1, 1]} : vector<64x128xbf16> to vector<64x32xbf16>
    %cst_15 = arith.constant dense<0.000000e+00> : vector<64x64xf32>
    %20 = tpu.matmul %17, %18, %cst_15 {dimension_numbers = #tpu.dot_dimension_numbers<[1], [1], [0], [0], [0, 0, 1, 0], [], []>} : vector<64x32xbf16>, vector<64x32xbf16>, vector<64x64xf32> -> vector<64x64xf32>
    %c0_16 = arith.constant 0 : index
    %c0_17 = arith.constant 0 : index
    %c0_18 = arith.constant 0 : index
    %21 = vector.load %arg12[%c0_16, %c0_17, %c0_18] : memref<4x64x1xf32, #tpu.memory_space<vmem>>, vector<1x64x1xf32>
    %22 = vector.shape_cast %21 : vector<1x64x1xf32> to vector<64x1xf32>
    %cst_19 = arith.constant dense<0xFF800000> : vector<64xf32>
    %23 = vector.multi_reduction <maximumf>, %20, %cst_19 [1] : vector<64x64xf32> to vector<64xf32>
    %24 = vector.shape_cast %23 : vector<64xf32> to vector<64x1xf32>
    %25 = arith.maximumf %22, %24 : vector<64x1xf32>
    %26 = arith.subf %22, %25 : vector<64x1xf32>
    %27 = math.exp %26 : vector<64x1xf32>
    %28 = vector.broadcast %25 : vector<64x1xf32> to vector<64x64xf32>
    %29 = arith.subf %20, %28 : vector<64x64xf32>
    %30 = math.exp %29 : vector<64x64xf32>
    %c0_20 = arith.constant 0 : index
    %c0_21 = arith.constant 0 : index
    %c0_22 = arith.constant 0 : index
    %31 = vector.load %arg13[%c0_20, %c0_21, %c0_22] : memref<4x64x1xf32, #tpu.memory_space<vmem>>, vector<1x64x1xf32>
    %32 = vector.shape_cast %31 : vector<1x64x1xf32> to vector<64x1xf32>
    %33 = arith.mulf %27, %32 : vector<64x1xf32>
    %cst_23 = arith.constant dense<0.000000e+00> : vector<64xf32>
    %34 = vector.multi_reduction <add>, %30, %cst_23 [1] : vector<64x64xf32> to vector<64xf32>
    %35 = vector.shape_cast %34 : vector<64xf32> to vector<64x1xf32>
    %36 = arith.addf %33, %35 : vector<64x1xf32>
    %c0_24 = arith.constant 0 : index
    %c0_25 = arith.constant 0 : index
    %c0_26 = arith.constant 0 : index
    %37 = vector.load %arg13[%c0_24, %c0_25, %c0_26] : memref<4x64x1xf32, #tpu.memory_space<vmem>>, vector<1x64x1xf32>
    %38 = vector.shape_cast %37 : vector<1x64x1xf32> to vector<64x1xf32>
    %39 = vector.shape_cast %36 : vector<64x1xf32> to vector<1x64x1xf32>
    tpu.vector_store %arg13[%c0_24, %c0_25, %c0_26], %39 {strides = array<i32>} : memref<4x64x1xf32, #tpu.memory_space<vmem>>, vector<1x64x1xf32>,
    %c0_27 = arith.constant 0 : index
    %c0_28 = arith.constant 0 : index
    %c0_29 = arith.constant 0 : index
    %40 = vector.load %arg12[%c0_27, %c0_28, %c0_29] : memref<4x64x1xf32, #tpu.memory_space<vmem>>, vector<1x64x1xf32>
    %41 = vector.shape_cast %40 : vector<1x64x1xf32> to vector<64x1xf32>
    %42 = vector.shape_cast %25 : vector<64x1xf32> to vector<1x64x1xf32>
    tpu.vector_store %arg12[%c0_27, %c0_28, %c0_29], %42 {strides = array<i32>} : memref<4x64x1xf32, #tpu.memory_space<vmem>>, vector<1x64x1xf32>,
    %43 = arith.truncf %30 : vector<64x64xf32> to vector<64x64xbf16>
    %cst_30 = arith.constant dense<0.000000e+00> : vector<64x32xf32>
    %44 = tpu.matmul %43, %19, %cst_30 {dimension_numbers = #tpu.dot_dimension_numbers<[1], [0], [0], [1], [0, 0, 1, 1], [], []>} : vector<64x64xbf16>, vector<64x32xbf16>, vector<64x32xf32> -> vector<64x32xf32>
    %45 = vector.extract_strided_slice %16 {offsets = [0, 0], sizes = [64, 32], strides = [1, 1]} : vector<64x128xf32> to vector<64x32xf32>
    %46 = vector.broadcast %27 : vector<64x1xf32> to vector<64x32xf32>
    %47 = arith.mulf %46, %45 : vector<64x32xf32>
    %48 = arith.addf %47, %44 : vector<64x32xf32>
    %49 = vector.extract_strided_slice %15 {offsets = [0, 32], sizes = [64, 32], strides = [1, 1]} : vector<64x128xbf16> to vector<64x32xbf16>
    %50 = vector.extract_strided_slice %11 {offsets = [0, 32], sizes = [64, 32], strides = [1, 1]} : vector<64x128xbf16> to vector<64x32xbf16>
    %51 = vector.extract_strided_slice %14 {offsets = [0, 32], sizes = [64, 32], strides = [1, 1]} : vector<64x128xbf16> to vector<64x32xbf16>
    %cst_31 = arith.constant dense<0.000000e+00> : vector<64x64xf32>
    %52 = tpu.matmul %49, %50, %cst_31 {dimension_numbers = #tpu.dot_dimension_numbers<[1], [1], [0], [0], [0, 0, 1, 0], [], []>} : vector<64x32xbf16>, vector<64x32xbf16>, vector<64x64xf32> -> vector<64x64xf32>
    %c1 = arith.constant 1 : index
    %c0_32 = arith.constant 0 : index
    %c0_33 = arith.constant 0 : index
    %53 = vector.load %arg12[%c1, %c0_32, %c0_33] : memref<4x64x1xf32, #tpu.memory_space<vmem>>, vector<1x64x1xf32>
    %54 = vector.shape_cast %53 : vector<1x64x1xf32> to vector<64x1xf32>
    %cst_34 = arith.constant dense<0xFF800000> : vector<64xf32>
    %55 = vector.multi_reduction <maximumf>, %52, %cst_34 [1] : vector<64x64xf32> to vector<64xf32>
    %56 = vector.shape_cast %55 : vector<64xf32> to vector<64x1xf32>
    %57 = arith.maximumf %54, %56 : vector<64x1xf32>
    %58 = arith.subf %54, %57 : vector<64x1xf32>
    %59 = math.exp %58 : vector<64x1xf32>
    %60 = vector.broadcast %57 : vector<64x1xf32> to vector<64x64xf32>
    %61 = arith.subf %52, %60 : vector<64x64xf32>
    %62 = math.exp %61 : vector<64x64xf32>
    %c1_35 = arith.constant 1 : index
    %c0_36 = arith.constant 0 : index
    %c0_37 = arith.constant 0 : index
    %63 = vector.load %arg13[%c1_35, %c0_36, %c0_37] : memref<4x64x1xf32, #tpu.memory_space<vmem>>, vector<1x64x1xf32>
    %64 = vector.shape_cast %63 : vector<1x64x1xf32> to vector<64x1xf32>
    %65 = arith.mulf %59, %64 : vector<64x1xf32>
    %cst_38 = arith.constant dense<0.000000e+00> : vector<64xf32>
    %66 = vector.multi_reduction <add>, %62, %cst_38 [1] : vector<64x64xf32> to vector<64xf32>
    %67 = vector.shape_cast %66 : vector<64xf32> to vector<64x1xf32>
    %68 = arith.addf %65, %67 : vector<64x1xf32>
    %c1_39 = arith.constant 1 : index
    %c0_40 = arith.constant 0 : index
    %c0_41 = arith.constant 0 : index
    %69 = vector.load %arg13[%c1_39, %c0_40, %c0_41] : memref<4x64x1xf32, #tpu.memory_space<vmem>>, vector<1x64x1xf32>
    %70 = vector.shape_cast %69 : vector<1x64x1xf32> to vector<64x1xf32>
    %71 = vector.shape_cast %68 : vector<64x1xf32> to vector<1x64x1xf32>
    tpu.vector_store %arg13[%c1_39, %c0_40, %c0_41], %71 {strides = array<i32>} : memref<4x64x1xf32, #tpu.memory_space<vmem>>, vector<1x64x1xf32>,
    %c1_42 = arith.constant 1 : index
    %c0_43 = arith.constant 0 : index
    %c0_44 = arith.constant 0 : index
    %72 = vector.load %arg12[%c1_42, %c0_43, %c0_44] : memref<4x64x1xf32, #tpu.memory_space<vmem>>, vector<1x64x1xf32>
    %73 = vector.shape_cast %72 : vector<1x64x1xf32> to vector<64x1xf32>
    %74 = vector.shape_cast %57 : vector<64x1xf32> to vector<1x64x1xf32>
    tpu.vector_store %arg12[%c1_42, %c0_43, %c0_44], %74 {strides = array<i32>} : memref<4x64x1xf32, #tpu.memory_space<vmem>>, vector<1x64x1xf32>,
    %75 = arith.truncf %62 : vector<64x64xf32> to vector<64x64xbf16>
    %cst_45 = arith.constant dense<0.000000e+00> : vector<64x32xf32>
    %76 = tpu.matmul %75, %51, %cst_45 {dimension_numbers = #tpu.dot_dimension_numbers<[1], [0], [0], [1], [0, 0, 1, 1], [], []>} : vector<64x64xbf16>, vector<64x32xbf16>, vector<64x32xf32> -> vector<64x32xf32>
    %77 = vector.extract_strided_slice %16 {offsets = [0, 32], sizes = [64, 32], strides = [1, 1]} : vector<64x128xf32> to vector<64x32xf32>
    %78 = vector.broadcast %59 : vector<64x1xf32> to vector<64x32xf32>
    %79 = arith.mulf %78, %77 : vector<64x32xf32>
    %80 = arith.addf %79, %76 : vector<64x32xf32>
    %81 = vector.extract_strided_slice %15 {offsets = [0, 64], sizes = [64, 32], strides = [1, 1]} : vector<64x128xbf16> to vector<64x32xbf16>
    %82 = vector.extract_strided_slice %11 {offsets = [0, 64], sizes = [64, 32], strides = [1, 1]} : vector<64x128xbf16> to vector<64x32xbf16>
    %83 = vector.extract_strided_slice %14 {offsets = [0, 64], sizes = [64, 32], strides = [1, 1]} : vector<64x128xbf16> to vector<64x32xbf16>
    %cst_46 = arith.constant dense<0.000000e+00> : vector<64x64xf32>
    %84 = tpu.matmul %81, %82, %cst_46 {dimension_numbers = #tpu.dot_dimension_numbers<[1], [1], [0], [0], [0, 0, 1, 0], [], []>} : vector<64x32xbf16>, vector<64x32xbf16>, vector<64x64xf32> -> vector<64x64xf32>
    %c2 = arith.constant 2 : index
    %c0_47 = arith.constant 0 : index
    %c0_48 = arith.constant 0 : index
    %85 = vector.load %arg12[%c2, %c0_47, %c0_48] : memref<4x64x1xf32, #tpu.memory_space<vmem>>, vector<1x64x1xf32>
    %86 = vector.shape_cast %85 : vector<1x64x1xf32> to vector<64x1xf32>
    %cst_49 = arith.constant dense<0xFF800000> : vector<64xf32>
    %87 = vector.multi_reduction <maximumf>, %84, %cst_49 [1] : vector<64x64xf32> to vector<64xf32>
    %88 = vector.shape_cast %87 : vector<64xf32> to vector<64x1xf32>
    %89 = arith.maximumf %86, %88 : vector<64x1xf32>
    %90 = arith.subf %86, %89 : vector<64x1xf32>
    %91 = math.exp %90 : vector<64x1xf32>
    %92 = vector.broadcast %89 : vector<64x1xf32> to vector<64x64xf32>
    %93 = arith.subf %84, %92 : vector<64x64xf32>
    %94 = math.exp %93 : vector<64x64xf32>
    %c2_50 = arith.constant 2 : index
    %c0_51 = arith.constant 0 : index
    %c0_52 = arith.constant 0 : index
    %95 = vector.load %arg13[%c2_50, %c0_51, %c0_52] : memref<4x64x1xf32, #tpu.memory_space<vmem>>, vector<1x64x1xf32>
    %96 = vector.shape_cast %95 : vector<1x64x1xf32> to vector<64x1xf32>
    %97 = arith.mulf %91, %96 : vector<64x1xf32>
    %cst_53 = arith.constant dense<0.000000e+00> : vector<64xf32>
    %98 = vector.multi_reduction <add>, %94, %cst_53 [1] : vector<64x64xf32> to vector<64xf32>
    %99 = vector.shape_cast %98 : vector<64xf32> to vector<64x1xf32>
    %100 = arith.addf %97, %99 : vector<64x1xf32>
    %c2_54 = arith.constant 2 : index
    %c0_55 = arith.constant 0 : index
    %c0_56 = arith.constant 0 : index
    %101 = vector.load %arg13[%c2_54, %c0_55, %c0_56] : memref<4x64x1xf32, #tpu.memory_space<vmem>>, vector<1x64x1xf32>
    %102 = vector.shape_cast %101 : vector<1x64x1xf32> to vector<64x1xf32>
    %103 = vector.shape_cast %100 : vector<64x1xf32> to vector<1x64x1xf32>
    tpu.vector_store %arg13[%c2_54, %c0_55, %c0_56], %103 {strides = array<i32>} : memref<4x64x1xf32, #tpu.memory_space<vmem>>, vector<1x64x1xf32>,
    %c2_57 = arith.constant 2 : index
    %c0_58 = arith.constant 0 : index
    %c0_59 = arith.constant 0 : index
    %104 = vector.load %arg12[%c2_57, %c0_58, %c0_59] : memref<4x64x1xf32, #tpu.memory_space<vmem>>, vector<1x64x1xf32>
    %105 = vector.shape_cast %104 : vector<1x64x1xf32> to vector<64x1xf32>
    %106 = vector.shape_cast %89 : vector<64x1xf32> to vector<1x64x1xf32>
    tpu.vector_store %arg12[%c2_57, %c0_58, %c0_59], %106 {strides = array<i32>} : memref<4x64x1xf32, #tpu.memory_space<vmem>>, vector<1x64x1xf32>,
    %107 = arith.truncf %94 : vector<64x64xf32> to vector<64x64xbf16>
    %cst_60 = arith.constant dense<0.000000e+00> : vector<64x32xf32>
    %108 = tpu.matmul %107, %83, %cst_60 {dimension_numbers = #tpu.dot_dimension_numbers<[1], [0], [0], [1], [0, 0, 1, 1], [], []>} : vector<64x64xbf16>, vector<64x32xbf16>, vector<64x32xf32> -> vector<64x32xf32>
    %109 = vector.extract_strided_slice %16 {offsets = [0, 64], sizes = [64, 32], strides = [1, 1]} : vector<64x128xf32> to vector<64x32xf32>
    %110 = vector.broadcast %91 : vector<64x1xf32> to vector<64x32xf32>
    %111 = arith.mulf %110, %109 : vector<64x32xf32>
    %112 = arith.addf %111, %108 : vector<64x32xf32>
    %113 = vector.extract_strided_slice %15 {offsets = [0, 96], sizes = [64, 32], strides = [1, 1]} : vector<64x128xbf16> to vector<64x32xbf16>
    %114 = vector.extract_strided_slice %11 {offsets = [0, 96], sizes = [64, 32], strides = [1, 1]} : vector<64x128xbf16> to vector<64x32xbf16>
    %115 = vector.extract_strided_slice %14 {offsets = [0, 96], sizes = [64, 32], strides = [1, 1]} : vector<64x128xbf16> to vector<64x32xbf16>
    %cst_61 = arith.constant dense<0.000000e+00> : vector<64x64xf32>
    %116 = tpu.matmul %113, %114, %cst_61 {dimension_numbers = #tpu.dot_dimension_numbers<[1], [1], [0], [0], [0, 0, 1, 0], [], []>} : vector<64x32xbf16>, vector<64x32xbf16>, vector<64x64xf32> -> vector<64x64xf32>
    %c3 = arith.constant 3 : index
    %c0_62 = arith.constant 0 : index
    %c0_63 = arith.constant 0 : index
    %117 = vector.load %arg12[%c3, %c0_62, %c0_63] : memref<4x64x1xf32, #tpu.memory_space<vmem>>, vector<1x64x1xf32>
    %118 = vector.shape_cast %117 : vector<1x64x1xf32> to vector<64x1xf32>
    %cst_64 = arith.constant dense<0xFF800000> : vector<64xf32>
    %119 = vector.multi_reduction <maximumf>, %116, %cst_64 [1] : vector<64x64xf32> to vector<64xf32>
    %120 = vector.shape_cast %119 : vector<64xf32> to vector<64x1xf32>
    %121 = arith.maximumf %118, %120 : vector<64x1xf32>
    %122 = arith.subf %118, %121 : vector<64x1xf32>
    %123 = math.exp %122 : vector<64x1xf32>
    %124 = vector.broadcast %121 : vector<64x1xf32> to vector<64x64xf32>
    %125 = arith.subf %116, %124 : vector<64x64xf32>
    %126 = math.exp %125 : vector<64x64xf32>
    %c3_65 = arith.constant 3 : index
    %c0_66 = arith.constant 0 : index
    %c0_67 = arith.constant 0 : index
    %127 = vector.load %arg13[%c3_65, %c0_66, %c0_67] : memref<4x64x1xf32, #tpu.memory_space<vmem>>, vector<1x64x1xf32>
    %128 = vector.shape_cast %127 : vector<1x64x1xf32> to vector<64x1xf32>
    %129 = arith.mulf %123, %128 : vector<64x1xf32>
    %cst_68 = arith.constant dense<0.000000e+00> : vector<64xf32>
    %130 = vector.multi_reduction <add>, %126, %cst_68 [1] : vector<64x64xf32> to vector<64xf32>
    %131 = vector.shape_cast %130 : vector<64xf32> to vector<64x1xf32>
    %132 = arith.addf %129, %131 : vector<64x1xf32>
    %c3_69 = arith.constant 3 : index
    %c0_70 = arith.constant 0 : index
    %c0_71 = arith.constant 0 : index
    %133 = vector.load %arg13[%c3_69, %c0_70, %c0_71] : memref<4x64x1xf32, #tpu.memory_space<vmem>>, vector<1x64x1xf32>
    %134 = vector.shape_cast %133 : vector<1x64x1xf32> to vector<64x1xf32>
    %135 = vector.shape_cast %132 : vector<64x1xf32> to vector<1x64x1xf32>
    tpu.vector_store %arg13[%c3_69, %c0_70, %c0_71], %135 {strides = array<i32>} : memref<4x64x1xf32, #tpu.memory_space<vmem>>, vector<1x64x1xf32>,
    %c3_72 = arith.constant 3 : index
    %c0_73 = arith.constant 0 : index
    %c0_74 = arith.constant 0 : index
    %136 = vector.load %arg12[%c3_72, %c0_73, %c0_74] : memref<4x64x1xf32, #tpu.memory_space<vmem>>, vector<1x64x1xf32>
    %137 = vector.shape_cast %136 : vector<1x64x1xf32> to vector<64x1xf32>
    %138 = vector.shape_cast %121 : vector<64x1xf32> to vector<1x64x1xf32>
    tpu.vector_store %arg12[%c3_72, %c0_73, %c0_74], %138 {strides = array<i32>} : memref<4x64x1xf32, #tpu.memory_space<vmem>>, vector<1x64x1xf32>,
    %139 = arith.truncf %126 : vector<64x64xf32> to vector<64x64xbf16>
    %cst_75 = arith.constant dense<0.000000e+00> : vector<64x32xf32>
    %140 = tpu.matmul %139, %115, %cst_75 {dimension_numbers = #tpu.dot_dimension_numbers<[1], [0], [0], [1], [0, 0, 1, 1], [], []>} : vector<64x64xbf16>, vector<64x32xbf16>, vector<64x32xf32> -> vector<64x32xf32>
    %141 = vector.extract_strided_slice %16 {offsets = [0, 96], sizes = [64, 32], strides = [1, 1]} : vector<64x128xf32> to vector<64x32xf32>
    %142 = vector.broadcast %123 : vector<64x1xf32> to vector<64x32xf32>
    %143 = arith.mulf %142, %141 : vector<64x32xf32>
    %144 = arith.addf %143, %140 : vector<64x32xf32>
    %145 = tpu.concatenate %48, %80, %112, %144 in 1 : vector<64x32xf32>, vector<64x32xf32>, vector<64x32xf32>, vector<64x32xf32> -> vector<64x128xf32>
    %c0_76 = arith.constant 0 : index
    %c0_77 = arith.constant 0 : index
    %146 = vector.load %arg14[%c0_76, %c0_77] : memref<64x128xf32, #tpu.memory_space<vmem>>, vector<64x128xf32>
    tpu.vector_store %arg14[%c0_76, %c0_77], %145 {strides = array<i32>} : memref<64x128xf32, #tpu.memory_space<vmem>>, vector<64x128xf32>,
    %c1_i32 = arith.constant 1 : i32
    %147 = arith.cmpi eq, %arg2, %c1_i32 : i32
    %148 = arith.extui %147 : i1 to i32
    %c0_i32_78 = arith.constant 0 : i32
    %149 = arith.cmpi ne, %148, %c0_i32_78 : i32
    scf.if %149 {
      %c0_79 = arith.constant 0 : index
      %c0_80 = arith.constant 0 : index
      %150 = vector.load %arg14[%c0_79, %c0_80] : memref<64x128xf32, #tpu.memory_space<vmem>>, vector<64x128xf32>
      %c0_81 = arith.constant 0 : index
      %c0_82 = arith.constant 0 : index
      %c0_83 = arith.constant 0 : index
      %151 = vector.load %arg13[%c0_81, %c0_82, %c0_83] : memref<4x64x1xf32, #tpu.memory_space<vmem>>, vector<1x64x1xf32>
      %152 = vector.shape_cast %151 : vector<1x64x1xf32> to vector<64x1xf32>
      %153 = tpu.reciprocal %152 {approx = true} : vector<64x1xf32> -> vector<64x1xf32>
      %154 = vector.extract_strided_slice %150 {offsets = [0, 0], sizes = [64, 32], strides = [1, 1]} : vector<64x128xf32> to vector<64x32xf32>
      %155 = vector.broadcast %153 : vector<64x1xf32> to vector<64x32xf32>
      %156 = arith.mulf %154, %155 : vector<64x32xf32>
      %c1_84 = arith.constant 1 : index
      %c0_85 = arith.constant 0 : index
      %c0_86 = arith.constant 0 : index
      %157 = vector.load %arg13[%c1_84, %c0_85, %c0_86] : memref<4x64x1xf32, #tpu.memory_space<vmem>>, vector<1x64x1xf32>
      %158 = vector.shape_cast %157 : vector<1x64x1xf32> to vector<64x1xf32>
      %159 = tpu.reciprocal %158 {approx = true} : vector<64x1xf32> -> vector<64x1xf32>
      %160 = vector.extract_strided_slice %150 {offsets = [0, 32], sizes = [64, 32], strides = [1, 1]} : vector<64x128xf32> to vector<64x32xf32>
      %161 = vector.broadcast %159 : vector<64x1xf32> to vector<64x32xf32>
      %162 = arith.mulf %160, %161 : vector<64x32xf32>
      %c2_87 = arith.constant 2 : index
      %c0_88 = arith.constant 0 : index
      %c0_89 = arith.constant 0 : index
      %163 = vector.load %arg13[%c2_87, %c0_88, %c0_89] : memref<4x64x1xf32, #tpu.memory_space<vmem>>, vector<1x64x1xf32>
      %164 = vector.shape_cast %163 : vector<1x64x1xf32> to vector<64x1xf32>
      %165 = tpu.reciprocal %164 {approx = true} : vector<64x1xf32> -> vector<64x1xf32>
      %166 = vector.extract_strided_slice %150 {offsets = [0, 64], sizes = [64, 32], strides = [1, 1]} : vector<64x128xf32> to vector<64x32xf32>
      %167 = vector.broadcast %165 : vector<64x1xf32> to vector<64x32xf32>
      %168 = arith.mulf %166, %167 : vector<64x32xf32>
      %c3_90 = arith.constant 3 : index
      %c0_91 = arith.constant 0 : index
      %c0_92 = arith.constant 0 : index
      %169 = vector.load %arg13[%c3_90, %c0_91, %c0_92] : memref<4x64x1xf32, #tpu.memory_space<vmem>>, vector<1x64x1xf32>
      %170 = vector.shape_cast %169 : vector<1x64x1xf32> to vector<64x1xf32>
      %171 = tpu.reciprocal %170 {approx = true} : vector<64x1xf32> -> vector<64x1xf32>
      %172 = vector.extract_strided_slice %150 {offsets = [0, 96], sizes = [64, 32], strides = [1, 1]} : vector<64x128xf32> to vector<64x32xf32>
      %173 = vector.broadcast %171 : vector<64x1xf32> to vector<64x32xf32>
      %174 = arith.mulf %172, %173 : vector<64x32xf32>
      %175 = tpu.concatenate %156, %162, %168, %174 in 1 : vector<64x32xf32>, vector<64x32xf32>, vector<64x32xf32>, vector<64x32xf32> -> vector<64x128xf32>
      %176 = arith.truncf %175 : vector<64x128xf32> to vector<64x128xbf16>
      %c0_93 = arith.constant 0 : index
      %c0_94 = arith.constant 0 : index
      %177 = vector.load %arg9[%c0_93, %c0_94] : memref<128x128xbf16, #tpu.memory_space<vmem>>, vector<128x128xbf16>
      %cst_95 = arith.constant dense<0.000000e+00> : vector<64x128xf32>
      %178 = tpu.matmul %176, %177, %cst_95 {dimension_numbers = #tpu.dot_dimension_numbers<[1], [0], [0], [1], [0, 0, 1, 1], [], []>} : vector<64x128xbf16>, vector<128x128xbf16>, vector<64x128xf32> -> vector<64x128xf32>
      %c0_96 = arith.constant 0 : index
      %c0_97 = arith.constant 0 : index
      %c0_98 = arith.constant 0 : index
      %179 = vector.load %arg10[%c0_96, %c0_97, %c0_98] : memref<1x64x128xf32, #tpu.memory_space<vmem>>, vector<1x64x128xf32>
      %180 = vector.shape_cast %179 : vector<1x64x128xf32> to vector<64x128xf32>
      %181 = vector.shape_cast %178 : vector<64x128xf32> to vector<1x64x128xf32>
      tpu.vector_store %arg10[%c0_96, %c0_97, %c0_98], %181 {strides = array<i32>} : memref<1x64x128xf32, #tpu.memory_space<vmem>>, vector<1x64x128xf32>,
    } else {
    }
    return
  }
  func.func @transform_0(%arg0: i32, %arg1: i32, %arg2: i32) -> (i32, i32, i32) {
    %c0_i32 = arith.constant 0 : i32
    %c0_i32_0 = arith.constant 0 : i32
    return %arg0, %arg1, %c0_i32 : i32, i32, i32
  }
  func.func @transform_1(%arg0: i32, %arg1: i32, %arg2: i32) -> (i32, i32, i32) {
    %c0_i32 = arith.constant 0 : i32
    %c0_i32_0 = arith.constant 0 : i32
    return %arg0, %arg2, %c0_i32 : i32, i32, i32
  }
  func.func @transform_2(%arg0: i32, %arg1: i32, %arg2: i32) -> (i32, i32, i32) {
    %c0_i32 = arith.constant 0 : i32
    %c0_i32_0 = arith.constant 0 : i32
    return %arg0, %arg2, %c0_i32 : i32, i32, i32
  }
  func.func @transform_3(%arg0: i32, %arg1: i32, %arg2: i32) -> (i32, i32) {
    %c0_i32 = arith.constant 0 : i32
    %c0_i32_0 = arith.constant 0 : i32
    %c0_i32_1 = arith.constant 0 : i32
    return %c0_i32, %c0_i32_0 : i32, i32
  }
  func.func @transform_4(%arg0: i32, %arg1: i32, %arg2: i32) -> (i32, i32) {
    %c0_i32 = arith.constant 0 : i32
    %c0_i32_0 = arith.constant 0 : i32
    %c0_i32_1 = arith.constant 0 : i32
    return %c0_i32, %c0_i32_0 : i32, i32
  }
  func.func @transform_5(%arg0: i32, %arg1: i32, %arg2: i32) -> (i32, i32) {
    %c0_i32 = arith.constant 0 : i32
    %c0_i32_0 = arith.constant 0 : i32
    %c0_i32_1 = arith.constant 0 : i32
    return %c0_i32, %c0_i32_0 : i32, i32
  }
  func.func @transform_6(%arg0: i32, %arg1: i32, %arg2: i32) -> (i32, i32) {
    %c0_i32 = arith.constant 0 : i32
    %c0_i32_0 = arith.constant 0 : i32
    %c0_i32_1 = arith.constant 0 : i32
    return %c0_i32, %c0_i32_0 : i32, i32
  }
  func.func @transform_7(%arg0: i32, %arg1: i32, %arg2: i32) -> (i32, i32, i32) {
    %c0_i32 = arith.constant 0 : i32
    %c0_i32_0 = arith.constant 0 : i32
    return %arg0, %arg1, %c0_i32 : i32, i32, i32
  }
}

</mosaic_0001>

<bundles_post_ra>
// kernel: tpu_custom_call.1
= control target key start
LH: loop header
LB: loop body
LE: loop exit
PB: predicated region body
PF: predicated region fallthrough
CT: control target
= control target key end

     0   :  { %s5891_s0 = inlined_call_operand.hbm [shape: f32[2,128,128], index: 0, kind: input, shape index: {}]   ;;  %s5892_s1 = inlined_call_operand.hbm [shape: f32[2,128,128], index: 1, kind: input, shape index: {}]   ;;  %s5893_s2 = inlined_call_operand.hbm [shape: f32[2,128,128], index: 2, kind: input, shape index: {}]   ;;  %s5894_s3 = inlined_call_operand.hbm [shape: bf16[128,128], index: 3, kind: input, shape index: {}]   ;;  %s5895_s4 = inlined_call_operand.hbm [shape: bf16[128,128], index: 4, kind: input, shape index: {}]   ;;  %s5896_s5 = inlined_call_operand.hbm [shape: bf16[128,128], index: 5, kind: input, shape index: {}]   ;;  %s5897_s6 = inlined_call_operand.hbm [shape: bf16[128,128], index: 6, kind: input, shape index: {}]   ;;  %s5898_s7 = inlined_call_operand.hbm [shape: f32[2,128,128], index: 7, kind: output, shape index: {}]  }
   0x1   :  { %5925 = sst [smem:[#allocation46_spill]] %s5891_s0 }
   0x2   :  { %5926 = sst [smem:[#allocation47_spill]] %s5892_s1 }
   0x3   :  { %5927 = sst [smem:[#allocation48_spill]] %s5893_s2 }
   0x4   :  { %5928 = sst [smem:[#allocation49_spill]] %s5894_s3 }
   0x5   :  { %5929 = sst [smem:[#allocation50_spill]] %s5895_s4 }
   0x6   :  { %5930 = sst [smem:[#allocation51_spill]] %s5896_s5 }
   0x7   :  { %5931 = sst [smem:[#allocation52_spill]] %s5897_s6 }
   0x8   :  { %5932 = sst [smem:[#allocation53_spill]] %s5898_s7 }
   0x9   :  { %12 = vsyncpa [#allocation7], 0 }
   0xa   :  { %14 = vsyncpa [#allocation7 + $0x1], 0 }
   0xb   :  { %15 = vsyncpa [#allocation10], 0 }
   0xc   :  { %17 = vsyncpa [#allocation10 + $0x1], 0 }
   0xd   :  { %18 = vsyncpa [#allocation13], 0 }
   0xe   :  { %19 = vsyncpa [#allocation16], 0 }
   0xf   :  { %20 = vsyncpa [#allocation8], 0 }
  0x10   :  { %22 = vsyncpa [#allocation8 + $0x1], 0  ;;  %s4330_s24 = smov 0   ;;  %s4332_s25 = smov 0  }
  0x11   :  { %s4334_s26 = smov 0   ;;  %s4336_s27 = smov 0  }
  0x12   :  { %s4338_s28 = smov 0   ;;  %s4340_s29 = smov 0  }
  0x13   :  { %s4342_s30 = smov 0   ;;  %s4344_s8 = smov 0  }
  0x14   :  { %s4346_s9 = smov 0   ;;  %s4348_s10 = smov 0  }
  0x15   :  { %s4350_s11 = smov 0   ;;  %s4352_s12 = smov 0  }
  0x16   :  { %s4354_s13 = smov 0  }
  0x17 LB: > { %5933 = sst [smem:[#allocation24_spill]] %s4227_s25  ;;  %s4396_s14 = sadd.s32 4294967295, %s4271_s13   ;;  %s4271_s13 = sphi %s4354_s13, %s28_s13   ;;  %s4267_s12 = sphi %s4352_s12, %s6028_s12   ;;  %s4263_s11 = sphi %s4350_s11, %s6027_s11   ;;  %s4259_s10 = sphi %s4348_s10, %s6026_s10   ;;  %s4255_s9 = sphi %s4346_s9, %s6025_s9   ;;  %s4251_s8 = sphi %s4344_s8, %s6024_s8   ;;  %s4247_s30 = sphi %s4342_s30, %s6023_s30   ;;  %s4243_s29 = sphi %s4340_s29, %s6022_s29   ;;  %s4239_s28 = sphi %s4338_s28, %s6021_s28   ;;  %s4235_s27 = sphi %s4336_s27, %s6020_s27   ;;  %s4231_s26 = sphi %s4334_s26, %s6019_s26   ;;  %s4227_s25 = sphi %s4332_s25, %s6014_s25   ;;  %s4223_s24 = sphi %s4330_s24, %s6013_s24  }
  0x18   : > { %5934 = sst [smem:[#allocation25_spill]] %s4231_s26  ;;  %p3194_p0 = scmp.ge.s32.totalorder %s4271_s13, 1 }
  0x19   : > { %5935 = sst [smem:[#allocation26_spill]] %s4235_s27  ;;  %p70_p1 = scmp.eq.s32.totalorder %s4396_s14, 0 }
  0x1a   : > { %5936 = sst [smem:[#allocation27_spill]] %s4247_s30  ;;  %p248_p2 = scmp.lt.s32.totalorder %s4271_s13, 9 }
  0x1b   : > { %5937 = sst [smem:[#allocation28_spill]] %s4251_s8  ;;  %s4273_s19 = smov [#allocation12]  }
  0x1c   : > { %5938 = sst [smem:[#allocation29_spill]] %s4255_s9  ;;  %p4404_p3 = pnand %p3194_p0, %p248_p2 }
  0x1d   : > { %5939 = sst [smem:[#allocation30_spill]] %s4263_s11  ;;  %s261_s20 = sshll.u32 %s4273_s19, 4  ;;  %s262_s20 = int_to_ptr.vmem [resolvable:$true] %s261_s20 }
  0x1e   : > { %5940 = sst [smem:[#allocation31_spill]] %s4396_s14  ;;  %p3548_p4 = pneg %p4404_p3 }
  0x1f   : > { %s5941_s3 = sld [smem:[#allocation49_spill]]  ;;  %s4274_s16 = smov [#allocation15]  }
  0x20   : > { %s5942_s18 = scalar_select %p4404_p3, 1, 0 }
  0x21   : > { %p4412_p5 = pnand %p3548_p4, %p70_p1  ;;  %s5945_s5 = sld [smem:[#allocation51_spill]] }
  0x22   : > { %5943 = sst [smem:[#allocation32_spill]] %s5942_s18  ;;  %s289_s19 = sshll.u32 %s4274_s16, 4  ;;  %s290_s19 = int_to_ptr.vmem [resolvable:$true] %s289_s19 }
  0x23   : > { %s5902_s7 = smov 4   ;;  %p235_p6 = scmp.eq.s32.totalorder %s4396_s14, 7 }
  0x24   : > { %s40_s22 = sadd.s32 1, %s4259_s10  ;;  %p64_p8 = scmp.eq.s32.totalorder %s4271_s13, 0 }
  0x25   : > { %s259_s17 = sshll.u32 %s5941_s3, 4  ;;  %s5900_s3 = smov 64   ;;  %s260_s17 = int_to_ptr.hbm [resolvable:$true] %s259_s17 }
  0x26   : > { %3551 = dma.hbm_to_vmem [thread:$0]  (!%p4412_p5), %s260_s17, 1024, %s262_s20, [#allocation13], %s5900_s3, %s5900_s3, %s5902_s7  }
  0x27   : > { %s287_s15 = sshll.u32 %s5945_s5, 4  ;;  %p4431_p7 = scmp.ge.s32.totalorder %s40_s22, 2  ;;  %s288_s15 = int_to_ptr.hbm [resolvable:$true] %s287_s15 }
  0x28   : > { %3557 = dma.hbm_to_vmem [thread:$0]  (!%p4412_p5), %s288_s15, 1024, %s290_s19, [#allocation16], %s5900_s3, %s5900_s3, %s5902_s7  }
  0x29   : > { %s6030_s22 = smov (%p4431_p7, %s40_s22), 0  ;;  %p91_p9 = scmp.ne.s32.totalorder %s4231_s26, %s4227_s25 }
  0x2a   : > { %5947 = sst [smem:[#allocation33_spill]] %s6030_s22  ;;  %p97_p10 = scmp.ne.s32.totalorder %s4227_s25, %s4223_s24 }
  0x2b   : > { %p3579_p11 = scmp.lt.s32.totalorder %s4271_s13, 8  ;;  %p4449_p12 = por %p91_p9, %p64_p8 }
  0x2c   : > { %p4455_p13 = por %p97_p10, %p70_p1  ;;  %s5914_s19 = sshll.u32 %s4267_s12, 4 }
  0x2d   : > { %s341_s16 = sand.u32 1, %s4271_s13   ;;  %s343_s3 = sand.u32 1, %s4231_s26  }
  0x2e   : > { %s5949_s15 = scalar_select %p4455_p13, 1, 0 }
  0x2f   : > { %s3204_s7 = sshll.u32 %s343_s3, 6  ;;  %s3205_s24 = sshll.u32 %s4259_s10, 3 }
  0x30   : > { %5950 = sst [smem:[#allocation34_spill]] %s5949_s15  ;;  %s350_s17 = sadd.s32 %s3205_s24, %s5914_s19 }
  0x31   : > { %s3207_s5 = sshll.u32 %s350_s17, 3  ;;  %s345_s9 = scalar_lea.vmem [#allocation9], %s3204_s7 }
  0x32   : > { %s355_s8 = sshll.u32 %s345_s9, 4  ;;  %s5951_s1 = sld [smem:[#allocation47_spill]]  ;;  %s356_s8 = int_to_ptr.vmem [resolvable:$true] %s355_s8 }
  0x33   : > { %p4472_p0 = pnand %p3579_p11, %p4449_p12  ;;  %s5953_s2 = sld [smem:[#allocation48_spill]] }
  0x34   : > { %s4479_s9 = scalar_lea.sflag [#allocation10], %s341_s16  ;;  %s5910_s25 = smov 128  }
  0x35   : > { %s5912_s30 = smov 8   ;;  %s369_s26 = scalar_lea.vmem [#allocation11], %s3204_s7 }
  0x36   : > { %s5954_s4 = sld [smem:[#allocation50_spill]]  ;;  %s4280_s16 = smov [#allocation17]  }
  0x37   : > { %s5955_s6 = sld [smem:[#allocation52_spill]]  ;;  %s303_s24 = sshll.u32 %s4280_s16, 4  ;;  %s304_s24 = int_to_ptr.vmem [resolvable:$true] %s303_s24 }
  0x38   : > { %s352_s18 = scalar_lea.hbm %s5951_s1, %s3207_s5  ;;  %p63_p2 = scmp.ne.s32.totalorder %s4243_s29, %s4239_s28 }
  0x39   : > { %s353_s0 = sshll.u32 %s352_s18, 4  ;;  %s376_s17 = scalar_lea.hbm %s5953_s2, %s3207_s5  ;;  %s354_s0 = int_to_ptr.hbm [resolvable:$true] %s353_s0 }
  0x3a   : > { %3567 = dma.hbm_to_vmem [thread:$0]  (!%p4472_p0), %s354_s0, 1024, %s356_s8, %s4479_s9, %s5910_s25, %s5910_s25, %s5912_s30  }
  0x3b   : > { %s377_s20 = sshll.u32 %s376_s17, 4  ;;  %s4491_s5 = sshll.u32 %s369_s26, 4  ;;  %s4489_s20 = int_to_ptr.hbm [resolvable:$true] %s377_s20  ;;  %s380_s5 = int_to_ptr.vmem [resolvable:$true] %s4491_s5 }
  0x3c   : > { %s273_s3 = sshll.u32 %s5954_s4, 4  ;;  %s4279_s0 = smov [#allocation14]   ;;  %s274_s3 = int_to_ptr.hbm [resolvable:$true] %s273_s3 }
  0x3d   : > { %s275_s8 = sshll.u32 %s4279_s0, 4  ;;  %s301_s26 = sshll.u32 %s5955_s6, 4  ;;  %s276_s8 = int_to_ptr.vmem [resolvable:$true] %s275_s8  ;;  %s302_s26 = int_to_ptr.hbm [resolvable:$true] %s301_s26 }
  0x3e   : > { %s5956_s25 = smov 4   ;;  %s5957_s30 = smov 64  }
  0x3f   : > { %3554 = dma.hbm_to_vmem [thread:$0]  (!%p4412_p5), %s274_s3, 1024, %s276_s8, [#allocation13], %s5957_s30, %s5957_s30, %s5956_s25  }
  0x40   : > { %3560 = dma.hbm_to_vmem [thread:$0]  (!%p4412_p5), %s302_s26, 1024, %s304_s24, [#allocation16], %s5957_s30, %s5957_s30, %s5956_s25  }
  0x41   : > { %s3193_s0 = sadd.s32 4294967294, %s4271_s13   ;;  %s43_s17 = sadd.s32 1, %s4263_s11 }
  0x42   : > { %s6032_s17 = smov (!%p4431_p7, %s43_s17), %s4263_s11  ;;  %s56_s3 = sadd.s32 1, %s4243_s29 }
  0x43   : > { %p45_p4 = scmp.ge.s32.totalorder %s6032_s17, 2  ;;  %p69_p9 = scmp.ne.s32.totalorder %s4239_s28, %s4235_s27 }
  0x44   : > { %p4521_p10 = por %p64_p8, %p63_p2  ;;  %p4527_p5 = por %p235_p6, %p63_p2 }
  0x45   : > { %s6034_s17 = smov (%p45_p4, %s6032_s17), 0  ;;  %s5962_s23 = sadd.s32 1, %s4267_s12 }
  0x46   : > { %s5959_s25 = scalar_select %p4527_p5, 1, 0 }
  0x47   : > { %5961 = sst [smem:[#allocation36_spill]] %s6034_s17  ;;  %s6036_s23 = smov (!%p45_p4, %s5962_s23), %s4267_s12 }
  0x48   : > { %5960 = sst [smem:[#allocation35_spill]] %s5959_s25  ;;  %s52_s30 = ssub.s32 %s4263_s11, %s6034_s17 }
  0x49   : > { %s5963_s8 = sld [smem:[#allocation25_spill]]  ;;  %p4540_p7 = por %p70_p1, %p69_p9 }
  0x4a   : > { %p49_p8 = scmp.ge.s32.totalorder %s6036_s23, 2  ;;  %p241_p6 = scmp.eq.s32.totalorder %s3193_s0, 7 }
  0x4b   : > { %s317_s26 = sand.u32 1, %s4243_s29   ;;  %s3201_s16 = sshll.u32 %s4263_s11, 3 }
  0x4c   : > { %s6038_s23 = smov (%p49_p8, %s6036_s23), 0  ;;  %p4548_p12 = por %p241_p6, %p69_p9 }
  0x4d   : > { %5965 = sst [smem:[#allocation37_spill]] %s6038_s23  ;;  %s51_s19 = ssub.s32 %s4267_s12, %s6038_s23 }
  0x4e   : > { %s5966_s24 = scalar_select %p4548_p12, 1, 0 }
  0x4f   : > { %s3200_s18 = sshll.u32 %s317_s26, 6  ;;  %s53_s1 = sor.u32 %s52_s30, %s51_s19 }
  0x50   : > { %5967 = sst [smem:[#allocation38_spill]] %s5966_s24  ;;  %s5968_s2 = ssub.s32 %s4259_s10, %s6030_s22 }
  0x51   : > { %s81_s4 = sor.u32 %s5968_s2, %s51_s19  ;;  %p54_p2 = scmp.eq.s32.totalorder %s53_s1, 0 }
  0x52   : > { %p82_p4 = scmp.eq.s32.totalorder %s81_s4, 0  ;;  %s5969_s0 = sshll.u32 %s4267_s12, 4 }
  0x53   : > { %s326_s6 = sadd.s32 %s5969_s0, %s3201_s16  ;;  %s5970_s11 = sadd.s32 1, %s5963_s8 }
  0x54   : > { %s4560_s17 = scalar_select %p54_p2, %s4243_s29, %s56_s3  }
  0x55   : > { %s6040_s8 = smov (!%p82_p4, %s5963_s8), %s5970_s11  ;;  %s3203_s24 = sshll.u32 %s326_s6, 3 }
  0x56   : > { %s321_s27 = scalar_lea.vmem [#allocation6], %s3200_s18  ;;  %s5971_s30 = sld [smem:[#allocation46_spill]] }
  0x57   : > { %s331_s23 = sshll.u32 %s321_s27, 4  ;;  %p3562_p9 = pnand %p3579_p11, %p4521_p10  ;;  %s332_s23 = int_to_ptr.vmem [resolvable:$true] %s331_s23 }
  0x58   : > { %s318_s2 = scalar_lea.sflag [#allocation7], %s317_s26  ;;  %s5972_s4 = smov 8  }
  0x59   : > { %s5973_s19 = smov 128  }
  0x5a   : > { %3570 = dma.hbm_to_vmem [thread:$0]  (!%p4472_p0), %s4489_s20, 1024, %s380_s5, %s4479_s9, %s5973_s19, %s5973_s19, %s5972_s4  }
  0x5b   : > { %391 = sbr.rel (%p4404_p3) target bundleno = 2262 (0x8d6), region = 48 }
  0x5c   : > { %s328_s22 = scalar_lea.hbm %s5971_s30, %s3203_s24 }
  0x5d   : > { %s329_s1 = sshll.u32 %s328_s22, 4  ;;  %s330_s1 = int_to_ptr.hbm [resolvable:$true] %s329_s1 }
  0x5e   : > { %3564 = dma.hbm_to_vmem [thread:$0]  (!%p3562_p9), %s330_s1, 1024, %s332_s23, %s318_s2, %s5973_s19, %s5973_s19, %s5972_s4  }
  0x60   : > { %s4588_s27 = sand.u32 1, %s4239_s28  }
  0x61   : > { %s3213_s11 = sshll.u32 %s4588_s27, 6  ;;  %s394_s14 = scalar_lea.sflag [#allocation7], %s4588_s27 }
  0x62   : > { %s4592_s22 = scalar_lea.vmem [#allocation6], %s3213_s11 }
  0x63   : > { %4202 = dma.done.wait (%p4540_p7), %s394_s14, 1024  }
  0x64   : > { %4204 = vsyncadd (%p4540_p7), %s394_s14, 4294966272  ;;  %s5975_s15 = sld [smem:[#allocation31_spill]] }
  0x65   : > { %s5976_s9 = sld [smem:[#allocation24_spill]] }
  0x6a   : > { %s403_s20 = sand.u32 1, %s5975_s15  }
  0x6b   : > { %s405_s5 = sand.u32 1, %s5976_s9   ;;  %s404_s21 = scalar_lea.sflag [#allocation10], %s403_s20 }
  0x6c   : > { %s3214_s3 = sshll.u32 %s405_s5, 6 }
  0x6d   : > { %s4600_s25 = scalar_lea.vmem [#allocation9], %s3214_s3 }
  0x6e   : > { %4206 = dma.done.wait (%p4455_p13), %s404_s21, 2048  }
  0x6f   : > { %4208 = vsyncadd (%p4455_p13), %s404_s21, 4294965248  ;;  %s4606_s23 = scalar_lea.vmem [#allocation11], %s3214_s3 }
  0x70   : > { %4210 = dma.done.wait (%p70_p1), [#allocation13], 2048  }
  0x71   : > { %4212 = vsyncadd (%p70_p1), [#allocation13], 4294965248 }
  0x72   : > { %4214 = dma.done.wait (%p70_p1), [#allocation16], 2048  }
  0x73   : > { %4216 = vsyncadd (%p70_p1), [#allocation16], 4294965248  ;;  %s4616_s7 = scalar_lea.vmem [#allocation18], %s3213_s11  ;;  %s5978_s26 = sld [smem:[#allocation27_spill]] }
  0x79   : > { %p3221_p3 = scmp.ne.s32.totalorder %s5978_s26, 0 }
  0x7b   : > { %487 = sbr.rel (%p3221_p3) target bundleno = 305 (0x131), region = 80 }
  0x80   : > { %v3412_v0 = vld [vmem:[#allocation12 + $0x38] sm:$0xff]  ;;  %v3411_v1 = vld [vmem:[#allocation12 + $0x30] sm:$0xff]  ;;  %v3410_v2 = vld [vmem:[#allocation12 + $0x28] sm:$0xff]  ;;  %vm609_vm0 = vcmask 7168   ;;  %v4281_v20 = vmov -inf   ;;  %v4282_v33 = vmov 0.0  }
  0x81   : > { %564 = vmatpush.bf16.msra.mxu0 %v3412_v0  ;;  %3464 = vmatpush.bf16.msra.mxu1 %v3412_v0  ;;  %v3409_v3 = vld [vmem:[#allocation12 + $0x20] sm:$0xff]  ;;  %v3408_v4 = vld [vmem:[#allocation12 + $0x18] sm:$0xff]  ;;  %v3407_v5 = vld [vmem:[#allocation12 + $0x10] sm:$0xff]  ;;  %610 = vst.msk [vmem:[#allocation3] sm:$0xff] %vm609_vm0, %v4281_v20 }
  0x82   : > { %3465 = vmatpush.bf16.msra.mxu2 %v3412_v0  ;;  %3466 = vmatpush.bf16.msra.mxu3 %v3412_v0  ;;  %v3406_v6 = vld [vmem:[#allocation12 + $0x8] sm:$0xff]  ;;  %v3405_v7 = vld [vmem:[#allocation12] sm:$0xff]  ;;  %v490_v10 = vld [vmem:[%s4592_s22 + $0x10] sm:$0xff]  ;;  %611 = vst.msk [vmem:[#allocation3 + $0x8] sm:$0xff] %vm609_vm0, %v4281_v20 }
  0x83   : > { %v488_v8 = vld [vmem:[%s4592_s22] sm:$0xff]  ;;  %v489_v9 = vld [vmem:[%s4592_s22 + $0x8] sm:$0xff]  ;;  %v491_v11 = vld [vmem:[%s4592_s22 + $0x18] sm:$0xff]  ;;  %612 = vst.msk [vmem:[#allocation3 + $0x10] sm:$0xff] %vm609_vm0, %v4281_v20 }
  0x84   : > { %v492_v12 = vld [vmem:[%s4592_s22 + $0x20] sm:$0xff]  ;;  %v493_v13 = vld [vmem:[%s4592_s22 + $0x28] sm:$0xff]  ;;  %v494_v14 = vld [vmem:[%s4592_s22 + $0x30] sm:$0xff]  ;;  %v496_v16 = vpack.c.bf16 %v489_v9, %v488_v8  ;;  %v497_v17 = vpack.c.bf16 %v491_v11, %v490_v10  ;;  %613 = vst.msk [vmem:[#allocation3 + $0x18] sm:$0xff] %vm609_vm0, %v4281_v20 }
  0x85   : > { %565 = vmatpush.bf16.msra.mxu0 %v3411_v1  ;;  %3467 = vmatpush.bf16.msra.mxu1 %v3411_v1  ;;  %v495_v15 = vld [vmem:[%s4592_s22 + $0x38] sm:$0xff]  ;;  %v498_v18 = vpack.c.bf16 %v493_v13, %v492_v12  ;;  %614 = vst.msk [vmem:[#allocation3 + $0x20] sm:$0xff] %vm609_vm0, %v4281_v20 }
  0x86   : > { %3468 = vmatpush.bf16.msra.mxu2 %v3411_v1  ;;  %3469 = vmatpush.bf16.msra.mxu3 %v3411_v1  ;;  %v499_v19 = vpack.c.bf16 %v495_v15, %v494_v14  ;;  %615 = vst.msk [vmem:[#allocation3 + $0x28] sm:$0xff] %vm609_vm0, %v4281_v20 }
  0x87   : > { %616 = vst.msk [vmem:[#allocation3 + $0x30] sm:$0xff] %vm609_vm0, %v4281_v20 }
  0x88   : > { %617 = vst.msk [vmem:[#allocation3 + $0x38] sm:$0xff] %vm609_vm0, %v4281_v20 }
  0x89   : > { %566 = vmatpush.bf16.msra.mxu0 %v3410_v2  ;;  %3470 = vmatpush.bf16.msra.mxu1 %v3410_v2  ;;  %618 = vst.msk [vmem:[#allocation3 + $0x40] sm:$0xff] %vm609_vm0, %v4281_v20 }
  0x8a   : > { %3471 = vmatpush.bf16.msra.mxu2 %v3410_v2  ;;  %3472 = vmatpush.bf16.msra.mxu3 %v3410_v2  ;;  %619 = vst.msk [vmem:[#allocation3 + $0x48] sm:$0xff] %vm609_vm0, %v4281_v20 }
  0x8b   : > { %620 = vst.msk [vmem:[#allocation3 + $0x50] sm:$0xff] %vm609_vm0, %v4281_v20 }
  0x8c   : > { %621 = vst.msk [vmem:[#allocation3 + $0x58] sm:$0xff] %vm609_vm0, %v4281_v20 }
  0x8d   : > { %567 = vmatpush.bf16.msra.mxu0 %v3409_v3  ;;  %3473 = vmatpush.bf16.msra.mxu1 %v3409_v3  ;;  %622 = vst.msk [vmem:[#allocation3 + $0x60] sm:$0xff] %vm609_vm0, %v4281_v20 }
  0x8e   : > { %3474 = vmatpush.bf16.msra.mxu2 %v3409_v3  ;;  %3475 = vmatpush.bf16.msra.mxu3 %v3409_v3  ;;  %623 = vst.msk [vmem:[#allocation3 + $0x68] sm:$0xff] %vm609_vm0, %v4281_v20 }
  0x8f   : > { %624 = vst.msk [vmem:[#allocation3 + $0x70] sm:$0xff] %vm609_vm0, %v4281_v20 }
  0x90   : > { %625 = vst.msk [vmem:[#allocation3 + $0x78] sm:$0xff] %vm609_vm0, %v4281_v20 }
  0x91   : > { %568 = vmatpush.bf16.msra.mxu0 %v3408_v4  ;;  %3476 = vmatpush.bf16.msra.mxu1 %v3408_v4  ;;  %626 = vst.msk [vmem:[#allocation3 + $0x80] sm:$0xff] %vm609_vm0, %v4281_v20 }
  0x92   : > { %3477 = vmatpush.bf16.msra.mxu2 %v3408_v4  ;;  %3478 = vmatpush.bf16.msra.mxu3 %v3408_v4  ;;  %627 = vst.msk [vmem:[#allocation3 + $0x88] sm:$0xff] %vm609_vm0, %v4281_v20 }
  0x93   : > { %628 = vst.msk [vmem:[#allocation3 + $0x90] sm:$0xff] %vm609_vm0, %v4281_v20 }
  0x94   : > { %629 = vst.msk [vmem:[#allocation3 + $0x98] sm:$0xff] %vm609_vm0, %v4281_v20 }
  0x95   : > { %569 = vmatpush.bf16.msra.mxu0 %v3407_v5  ;;  %3479 = vmatpush.bf16.msra.mxu1 %v3407_v5  ;;  %630 = vst.msk [vmem:[#allocation3 + $0xa0] sm:$0xff] %vm609_vm0, %v4281_v20 }
  0x96   : > { %3480 = vmatpush.bf16.msra.mxu2 %v3407_v5  ;;  %3481 = vmatpush.bf16.msra.mxu3 %v3407_v5  ;;  %631 = vst.msk [vmem:[#allocation3 + $0xa8] sm:$0xff] %vm609_vm0, %v4281_v20 }
  0x97   : > { %632 = vst.msk [vmem:[#allocation3 + $0xb0] sm:$0xff] %vm609_vm0, %v4281_v20 }
  0x98   : > { %633 = vst.msk [vmem:[#allocation3 + $0xb8] sm:$0xff] %vm609_vm0, %v4281_v20 }
  0x99   : > { %570 = vmatpush.bf16.msra.mxu0 %v3406_v6  ;;  %3482 = vmatpush.bf16.msra.mxu1 %v3406_v6  ;;  %634 = vst.msk [vmem:[#allocation3 + $0xc0] sm:$0xff] %vm609_vm0, %v4281_v20 }
  0x9a   : > { %3483 = vmatpush.bf16.msra.mxu2 %v3406_v6  ;;  %3484 = vmatpush.bf16.msra.mxu3 %v3406_v6  ;;  %635 = vst.msk [vmem:[#allocation3 + $0xc8] sm:$0xff] %vm609_vm0, %v4281_v20 }
  0x9b   : > { %636 = vst.msk [vmem:[#allocation3 + $0xd0] sm:$0xff] %vm609_vm0, %v4281_v20 }
  0x9c   : > { %637 = vst.msk [vmem:[#allocation3 + $0xd8] sm:$0xff] %vm609_vm0, %v4281_v20 }
  0x9d   : > { %571 = vmatpush.bf16.msra.mxu0 %v3405_v7  ;;  %3485 = vmatpush.bf16.msra.mxu1 %v3405_v7  ;;  %638 = vst.msk [vmem:[#allocation3 + $0xe0] sm:$0xff] %vm609_vm0, %v4281_v20 }
  0x9e   : > { %3486 = vmatpush.bf16.msra.mxu2 %v3405_v7  ;;  %3487 = vmatpush.bf16.msra.mxu3 %v3405_v7  ;;  %639 = vst.msk [vmem:[#allocation3 + $0xe8] sm:$0xff] %vm609_vm0, %v4281_v20 }
  0x9f   : > { %640 = vst.msk [vmem:[#allocation3 + $0xf0] sm:$0xff] %vm609_vm0, %v4281_v20 }
  0xa0   : > { %572 = vmatmul.bf16.vlgmr.msra.gmra.mxu0 %v496_v16  ;;  %577 = vmatmul.bf16.vlgmr.msra.gmra.mxu1 %v497_v17  ;;  %641 = vst.msk [vmem:[#allocation3 + $0xf8] sm:$0xff] %vm609_vm0, %v4281_v20 }
  0xa1   : > { %582 = vmatmul.bf16.vlgmr.msra.gmra.mxu2 %v498_v18  ;;  %587 = vmatmul.bf16.vlgmr.msra.gmra.mxu3 %v499_v19  ;;  %642 = vst.msk [vmem:[#allocation4] sm:$0xff] %vm609_vm0, %v4282_v33 }
  0xa2   : > { %643 = vst.msk [vmem:[#allocation4 + $0x8] sm:$0xff] %vm609_vm0, %v4282_v33 }
  0xa3   : > { %644 = vst.msk [vmem:[#allocation4 + $0x10] sm:$0xff] %vm609_vm0, %v4282_v33 }
  0xa4   : > { %645 = vst.msk [vmem:[#allocation4 + $0x18] sm:$0xff] %vm609_vm0, %v4282_v33 }
  0xa5   : > { %646 = vst.msk [vmem:[#allocation4 + $0x20] sm:$0xff] %vm609_vm0, %v4282_v33 }
  0xa6   : > { %647 = vst.msk [vmem:[#allocation4 + $0x28] sm:$0xff] %vm609_vm0, %v4282_v33 }
  0xa7   : > { %648 = vst.msk [vmem:[#allocation4 + $0x30] sm:$0xff] %vm609_vm0, %v4282_v33 }
  0xa8   : > { %649 = vst.msk [vmem:[#allocation4 + $0x38] sm:$0xff] %vm609_vm0, %v4282_v33 }
  0xa9   : > { %650 = vst.msk [vmem:[#allocation4 + $0x40] sm:$0xff] %vm609_vm0, %v4282_v33 }
  0xaa   : > { %651 = vst.msk [vmem:[#allocation4 + $0x48] sm:$0xff] %vm609_vm0, %v4282_v33 }
  0xab   : > { %652 = vst.msk [vmem:[#allocation4 + $0x50] sm:$0xff] %vm609_vm0, %v4282_v33 }
  0xac   : > { %653 = vst.msk [vmem:[#allocation4 + $0x58] sm:$0xff] %vm609_vm0, %v4282_v33 }
  0xad   : > { %654 = vst.msk [vmem:[#allocation4 + $0x60] sm:$0xff] %vm609_vm0, %v4282_v33 }
  0xae   : > { %655 = vst.msk [vmem:[#allocation4 + $0x68] sm:$0xff] %vm609_vm0, %v4282_v33 }
  0xaf   : > { %656 = vst.msk [vmem:[#allocation4 + $0x70] sm:$0xff] %vm609_vm0, %v4282_v33 }
  0xb0   : > { %657 = vst.msk [vmem:[#allocation4 + $0x78] sm:$0xff] %vm609_vm0, %v4282_v33 }
  0xb1   : > { %658 = vst.msk [vmem:[#allocation4 + $0x80] sm:$0xff] %vm609_vm0, %v4282_v33 }
  0xb2   : > { %659 = vst.msk [vmem:[#allocation4 + $0x88] sm:$0xff] %vm609_vm0, %v4282_v33 }
  0xb3   : > { %660 = vst.msk [vmem:[#allocation4 + $0x90] sm:$0xff] %vm609_vm0, %v4282_v33 }
  0xb4   : > { %661 = vst.msk [vmem:[#allocation4 + $0x98] sm:$0xff] %vm609_vm0, %v4282_v33 }
  0xb5   : > { %662 = vst.msk [vmem:[#allocation4 + $0xa0] sm:$0xff] %vm609_vm0, %v4282_v33 }
  0xb6   : > { %663 = vst.msk [vmem:[#allocation4 + $0xa8] sm:$0xff] %vm609_vm0, %v4282_v33 }
  0xb7   : > { %664 = vst.msk [vmem:[#allocation4 + $0xb0] sm:$0xff] %vm609_vm0, %v4282_v33 }
  0xb8   : > { %665 = vst.msk [vmem:[#allocation4 + $0xb8] sm:$0xff] %vm609_vm0, %v4282_v33 }
  0xb9   : > { %666 = vst.msk [vmem:[#allocation4 + $0xc0] sm:$0xff] %vm609_vm0, %v4282_v33 }
  0xba   : > { %667 = vst.msk [vmem:[#allocation4 + $0xc8] sm:$0xff] %vm609_vm0, %v4282_v33 }
  0xbb   : > { %668 = vst.msk [vmem:[#allocation4 + $0xd0] sm:$0xff] %vm609_vm0, %v4282_v33 }
  0xbc   : > { %669 = vst.msk [vmem:[#allocation4 + $0xd8] sm:$0xff] %vm609_vm0, %v4282_v33 }
  0xbd   : > { %670 = vst.msk [vmem:[#allocation4 + $0xe0] sm:$0xff] %vm609_vm0, %v4282_v33 }
  0xbe   : > { %671 = vst.msk [vmem:[#allocation4 + $0xe8] sm:$0xff] %vm609_vm0, %v4282_v33 }
  0xbf   : > { %672 = vst.msk [vmem:[#allocation4 + $0xf0] sm:$0xff] %vm609_vm0, %v4282_v33 }
  0xc0   : > { %673 = vst.msk [vmem:[#allocation4 + $0xf8] sm:$0xff] %vm609_vm0, %v4282_v33 }
  0xc1   : > { %674 = vst [vmem:[#allocation5] sm:$0xff] %v4282_v33 }
  0xc2   : > { %675 = vst [vmem:[#allocation5 + $0x38] sm:$0xff] %v4282_v33 }
  0xc3   : > { %676 = vst [vmem:[#allocation5 + $0x8] sm:$0xff] %v4282_v33 }
  0xc4   : > { %677 = vst [vmem:[#allocation5 + $0x18] sm:$0xff] %v4282_v33 }
  0xc5   : > { %678 = vst [vmem:[#allocation5 + $0x20] sm:$0xff] %v4282_v33 }
  0xc6   : > { %679 = vst [vmem:[#allocation5 + $0x10] sm:$0xff] %v4282_v33 }
  0xc7   : > { %680 = vst [vmem:[#allocation5 + $0x30] sm:$0xff] %v4282_v33 }
  0xc8   : > { %681 = vst [vmem:[#allocation5 + $0x28] sm:$0xff] %v4282_v33 }
 0x11d   : > { %v573_v21 = vpop.f32.mrf.mxu0  ;;  %v578_v22 = vpop.f32.mrf.mxu1 }
 0x124   : > { %v583_v23 = vpop.f32.mrf.mxu2  ;;  %v588_v24 = vpop.f32.mrf.mxu3 }
 0x125   : > { %v575_v25 = vpop.f32.mrf.mxu0  ;;  %v580_v26 = vpop.f32.mrf.mxu1 }
 0x126   : > { %v3444_v27 = vpack.c.bf16 %v575_v25, %v573_v21  ;;  %v3449_v28 = vpack.c.bf16 %v580_v26, %v578_v22 }
 0x128   : > { %3445 = vst [vmem:[#allocation2 + $0x10] sm:$0xff] %v3444_v27  }
 0x129   : > { %3461 = vst [vmem:[#allocation2] sm:$0xff] %v3449_v28  }
 0x12c   : > { %v585_v29 = vpop.f32.mrf.mxu2  ;;  %v590_v30 = vpop.f32.mrf.mxu3 }
 0x12d   : > { %v3454_v31 = vpack.c.bf16 %v585_v29, %v583_v23  ;;  %v3459_v32 = vpack.c.bf16 %v590_v30, %v588_v24 }
 0x12f   : > { %3462 = vst [vmem:[#allocation2 + $0x18] sm:$0xff] %v3454_v31  }
 0x130   : > { %3463 = vst [vmem:[#allocation2 + $0x8] sm:$0xff] %v3459_v32  }
 0x131 PF: > { %v3420_v34 = vld [vmem:[#allocation14 + $0x38] sm:$0xff]  ;;  %v3419_v35 = vld [vmem:[#allocation14 + $0x30] sm:$0xff]  ;;  %v3418_v36 = vld [vmem:[#allocation14 + $0x28] sm:$0xff]  ;;  %s4283_s16 = smov 96   ;;  %s4284_s24 = smov 32   ;;  %vm964_vm1 = vcmask 261120  }
 0x132   : > { %770 = vmatpush.bf16.msra.mxu0 %v3420_v34  ;;  %3488 = vmatpush.bf16.msra.mxu1 %v3420_v34  ;;  %v3417_v37 = vld [vmem:[#allocation14 + $0x20] sm:$0xff]  ;;  %v3416_v38 = vld [vmem:[#allocation14 + $0x18] sm:$0xff]  ;;  %v3415_v39 = vld [vmem:[#allocation14 + $0x10] sm:$0xff]  ;;  %s4285_s0 = smov 64   ;;  %vm1026_vm2 = vcmask 523264   ;;  %vm1195_vm3 = vcmask 7168  }
 0x133   : > { %v3414_v40 = vld [vmem:[#allocation14 + $0x8] sm:$0xff]  ;;  %v3413_v41 = vld [vmem:[#allocation14] sm:$0xff]  ;;  %v3428_v46 = vld [vmem:[#allocation15 + $0x38] sm:$0xff]  ;;  %vm2577_vm4 = vcmask 785408   ;;  %s6005_s30 = sld [smem:[#allocation27_spill]] }
 0x134   : > { %v682_v42 = vld [vmem:[%s4600_s25] sm:$0xff]  ;;  %v683_v43 = vld [vmem:[%s4600_s25 + $0x8] sm:$0xff]  ;;  %v3427_v49 = vld [vmem:[#allocation15 + $0x30] sm:$0xff] }
 0x135   : > { %v686_v44 = vld [vmem:[%s4600_s25 + $0x20] sm:$0xff]  ;;  %v687_v45 = vld [vmem:[%s4600_s25 + $0x28] sm:$0xff]  ;;  %v690_v47 = vpack.c.bf16 %v683_v43, %v682_v42  ;;  %v688_v52 = vld [vmem:[%s4600_s25 + $0x30] sm:$0xff] }
 0x136   : > { %771 = vmatpush.bf16.msra.mxu0 %v3419_v35  ;;  %3489 = vmatpush.bf16.msra.mxu1 %v3419_v35  ;;  %v692_v48 = vpack.c.bf16 %v687_v45, %v686_v44  ;;  %v3426_v50 = vld [vmem:[#allocation15 + $0x28] sm:$0xff]  ;;  %v3425_v51 = vld [vmem:[#allocation15 + $0x20] sm:$0xff]  ;;  %v689_v53 = vld [vmem:[%s4600_s25 + $0x38] sm:$0xff] }
 0x137   : > { %v684_v54 = vld [vmem:[%s4600_s25 + $0x10] sm:$0xff]  ;;  %v685_v55 = vld [vmem:[%s4600_s25 + $0x18] sm:$0xff]  ;;  %v693_v57 = vpack.c.bf16 %v689_v53, %v688_v52  ;;  %v3422_v62 = vld [vmem:[#allocation15 + $0x8] sm:$0xff] }
 0x138   : > { %v3424_v56 = vld [vmem:[#allocation15 + $0x18] sm:$0xff]  ;;  %v691_v58 = vpack.c.bf16 %v685_v55, %v684_v54  ;;  %v3423_v59 = vld [vmem:[#allocation15 + $0x10] sm:$0xff]  ;;  %v3421_v63 = vld [vmem:[#allocation15] sm:$0xff] }
 0x139   : > { %v4699_v60 = vld [vmem:[#allocation2 + $0x18] sm:$0xff]  ;;  %v4701_v61 = vld [vmem:[#allocation2 + $0x10] sm:$0xff]  ;;  %v694_v0 = vld [vmem:[%s4606_s23] sm:$0xff]  ;;  %p3366_p1 = scmp.ne.s32.totalorder %s6005_s30, 1 }
 0x13a   : > { %772 = vmatpush.bf16.msra.mxu0 %v3418_v36  ;;  %3490 = vmatpush.bf16.msra.mxu1 %v3418_v36  ;;  %v695_v1 = vld [vmem:[%s4606_s23 + $0x8] sm:$0xff]  ;;  %v4713_v4 = vld [vmem:[#allocation2] sm:$0xff]  ;;  %v696_v5 = vld [vmem:[%s4606_s23 + $0x10] sm:$0xff] }
 0x13b   : > { %1341 = vrot.lane.b32.xlu0 %v4699_v60, %s4283_s16  ;;  %1337 = vrot.lane.b32.xlu2 %v4701_v61, %s4283_s16  ;;  %v702_v2 = vpack.c.bf16 %v695_v1, %v694_v0  ;;  %v4711_v3 = vld [vmem:[#allocation2 + $0x8] sm:$0xff]  ;;  %v697_v6 = vld [vmem:[%s4606_s23 + $0x18] sm:$0xff]  ;;  %v698_v8 = vld [vmem:[%s4606_s23 + $0x20] sm:$0xff] }
 0x13c   : > { %1339 = vrot.lane.b32.xlu1 %v4713_v4, %s4283_s16  ;;  %v703_v7 = vpack.c.bf16 %v697_v6, %v696_v5  ;;  %v699_v9 = vld [vmem:[%s4606_s23 + $0x28] sm:$0xff]  ;;  %v700_v11 = vld [vmem:[%s4606_s23 + $0x30] sm:$0xff]  ;;  %v701_v12 = vld [vmem:[%s4606_s23 + $0x38] sm:$0xff] }
 0x13d   : > { %v704_v10 = vpack.c.bf16 %v699_v9, %v698_v8  ;;  %v705_v13 = vpack.c.bf16 %v701_v12, %v700_v11 }
 0x13e   : > { %773 = vmatpush.bf16.msra.mxu0 %v3417_v37  ;;  %3491 = vmatpush.bf16.msra.mxu1 %v3417_v37 }
 0x142   : > { %774 = vmatpush.bf16.msra.mxu0 %v3416_v38  ;;  %3492 = vmatpush.bf16.msra.mxu1 %v3416_v38 }
 0x143   : > { %2153 = vrot.lane.b32.xlu0 %v4701_v61, %s4284_s24  ;;  %1343 = vrot.lane.b32.xlu2 %v4711_v3, %s4283_s16 }
 0x144   : > { %2157 = vrot.lane.b32.xlu1 %v4699_v60, %s4284_s24 }
 0x146   : > { %775 = vmatpush.bf16.msra.mxu0 %v3415_v39  ;;  %3493 = vmatpush.bf16.msra.mxu1 %v3415_v39 }
 0x14a   : > { %776 = vmatpush.bf16.msra.mxu0 %v3414_v40  ;;  %3494 = vmatpush.bf16.msra.mxu1 %v3414_v40 }
 0x14b   : > { %2155 = vrot.lane.b32.xlu0 %v4713_v4, %s4284_s24  ;;  %1745 = vrot.lane.b32.xlu2 %v4701_v61, %s4285_s0 }
 0x14e   : > { %777 = vmatpush.bf16.msra.mxu0 %v3413_v41  ;;  %3495 = vmatpush.bf16.msra.mxu1 %v3413_v41 }
 0x151   : > { %778 = vmatmul.bf16.vlgmr.msra.gmra.mxu0 %v690_v47  ;;  %788 = vmatmul.bf16.vlgmr.msra.gmra.mxu1 %v692_v48 }
 0x152   : > { %871 = vmatpush.bf16.msrb.mxu1 %v3428_v46 }
 0x153   : > { %1749 = vrot.lane.b32.xlu0 %v4699_v60, %s4285_s0  ;;  %1747 = vrot.lane.b32.xlu2 %v4713_v4, %s4285_s0 }
 0x156   : > { %872 = vmatpush.bf16.msrb.mxu1 %v3427_v49 }
 0x15a   : > { %873 = vmatpush.bf16.msrb.mxu1 %v3426_v50 }
 0x15b   : > { %2159 = vrot.lane.b32.xlu0 %v4711_v3, %s4284_s24  ;;  %1751 = vrot.lane.b32.xlu2 %v4711_v3, %s4285_s0 }
 0x15e   : > { %874 = vmatpush.bf16.msrb.mxu1 %v3425_v51 }
 0x161   : > { %793 = vmatmul.bf16.gmra.mxu1 %v693_v57  ;;  %783 = vmatmul.bf16.gmra.mxu0 %v691_v58 }
 0x162   : > { %875 = vmatpush.bf16.msrb.mxu1 %v3424_v56 }
 0x166   : > { %876 = vmatpush.bf16.msrb.mxu1 %v3423_v59 }
 0x16a   : > { %877 = vmatpush.bf16.msrb.mxu1 %v3422_v62 }
 0x16e   : > { %878 = vmatpush.bf16.msrb.mxu1 %v3421_v63 }
 0x171   : > { %879 = vmatmul.bf16.vlgmr.msrb.gmra.mxu1 %v702_v2 }
 0x181   : > { %884 = vmatmul.bf16.gmra.mxu1 %v703_v7 }
 0x191   : > { %889 = vmatmul.bf16.gmra.mxu1 %v704_v10 }
 0x1a1   : > { %894 = vmatmul.bf16.gmra.mxu1 %v705_v13  ;;  %v4783_v13 = vpop.permute.xlu2 %1337 }
 0x1ce   : > { %v779_v14 = vpop.f32.mrf.mxu0  ;;  %v789_v15 = vpop.f32.mrf.mxu1 }
 0x1cf   : > { %v799_v16 = vpack.c.bf16 %v779_v14, %v779_v14  ;;  %v803_v17 = vpack.c.bf16 %v789_v15, %v789_v15  ;;  %v4791_v14 = vpop.permute.xlu1 %1339  ;;  %v4795_v15 = vpop.permute.xlu2 %1343 }
 0x1d1   : > { %v952_v22 = vunpack.c.l.b16 %v799_v16  ;;  %v956_v23 = vunpack.c.l.b16 %v803_v17 }
 0x1d6   : > { %v781_v18 = vpop.f32.mrf.mxu0  ;;  %v791_v19 = vpop.f32.mrf.mxu1 }
 0x1d7   : > { %v800_v20 = vpack.c.bf16 %v781_v18, %v781_v18  ;;  %v804_v21 = vpack.c.bf16 %v791_v19, %v791_v19  ;;  %v4799_v17 = vpop.permute.xlu1 %2157  ;;  %v1746_v18 = vpop.permute.xlu2 %1745 }
 0x1d9   : > { %v953_v24 = vunpack.c.l.b16 %v800_v20  ;;  %v957_v25 = vunpack.c.l.b16 %v804_v21 }
 0x1db   : > { %v960_v26 = vpack.c.b16 %v953_v24, %v952_v22  ;;  %v962_v27 = vpack.c.b16 %v957_v25, %v956_v23 }
 0x1dd   : > { %1349 = vrot.lane.b32.xlu2 %v962_v27, %s4283_s16  ;;  %2161 = vrot.lane.b32.xlu0 %v960_v26, %s4284_s24  ;;  %v984_v44 = vsel %vm964_vm1, %v962_v27, 0  ;;  %v978_v54 = vsel %vm964_vm1, %v960_v26, 0 }
 0x1de   : > { %1345 = vrot.lane.b32.xlu1 %v960_v26, %s4283_s16  ;;  %v794_v28 = vpop.f32.mrf.mxu1  ;;  %v784_v29 = vpop.f32.mrf.mxu0 }
 0x1df   : > { %v801_v30 = vpack.c.bf16 %v784_v29, %v784_v29  ;;  %v805_v31 = vpack.c.bf16 %v794_v28, %v794_v28  ;;  %v1748_v21 = vpop.permute.xlu2 %1747 }
 0x1e1   : > { %v954_v35 = vunpack.c.l.b16 %v801_v30  ;;  %v958_v37 = vunpack.c.l.b16 %v805_v31 }
 0x1e5   : > { %2165 = vrot.lane.b32.xlu2 %v962_v27, %s4284_s24 }
 0x1e6   : > { %1757 = vrot.lane.b32.xlu1 %v962_v27, %s4285_s0  ;;  %v796_v32 = vpop.f32.mrf.mxu1  ;;  %v786_v33 = vpop.f32.mrf.mxu0 }
 0x1e7   : > { %v806_v34 = vpack.c.bf16 %v796_v32, %v796_v32  ;;  %v802_v36 = vpack.c.bf16 %v786_v33, %v786_v33  ;;  %v1752_v24 = vpop.permute.xlu2 %1751 }
 0x1e9   : > { %v959_v38 = vunpack.c.l.b16 %v806_v34  ;;  %v955_v39 = vunpack.c.l.b16 %v802_v36 }
 0x1eb   : > { %v963_v40 = vpack.c.b16 %v959_v38, %v958_v37  ;;  %v961_v41 = vpack.c.b16 %v955_v39, %v954_v35 }
 0x1ed   : > { %1753 = vrot.lane.b32.xlu2 %v960_v26, %s4285_s0  ;;  %v987_v42 = vsel %vm964_vm1, %v963_v40, 0  ;;  %1347 = vrot.lane.b32.xlu0 %v961_v41, %s4283_s16  ;;  %v981_v48 = vsel %vm964_vm1, %v961_v41, 0 }
 0x1ee   : > { %1351 = vrot.lane.b32.xlu1 %v963_v40, %s4283_s16  ;;  %993 = vmatpush.bf16.xpose.msra.mxu2 %v987_v42  ;;  %v880_v43 = vpop.f32.mrf.mxu1 }
 0x1ef   : > { %v900_v46 = vpack.c.bf16 %v880_v43, %v880_v43 }
 0x1f1   : > { %v1224_v49 = vunpack.c.l.b16 %v900_v46 }
 0x1f5   : > { %2167 = vrot.lane.b32.xlu2 %v963_v40, %s4284_s24  ;;  %1755 = vrot.lane.b32.xlu0 %v961_v41, %s4285_s0 }
 0x1f6   : > { %1759 = vrot.lane.b32.xlu1 %v963_v40, %s4285_s0  ;;  %994 = vmatpush.bf16.xpose.msra.mxu2 %v984_v44  ;;  %v882_v45 = vpop.f32.mrf.mxu1 }
 0x1f7   : > { %v901_v47 = vpack.c.bf16 %v882_v45, %v882_v45 }
 0x1f9   : > { %v1225_v50 = vunpack.c.l.b16 %v901_v47 }
 0x1fb   : > { %v4754_v52 = vpack.c.b16 %v1225_v50, %v1224_v49 }
 0x1fe   : > { %995 = vmatpush.bf16.xpose.msra.mxu2 %v981_v48  ;;  %2163 = vrot.lane.b32.xlu1 %v961_v41, %s4284_s24  ;;  %v885_v51 = vpop.f32.mrf.mxu1 }
 0x1ff   : > { %v902_v53 = vpack.c.bf16 %v885_v51, %v885_v51 }
 0x201   : > { %v1226_v56 = vunpack.c.l.b16 %v902_v53 }
 0x206   : > { %996 = vmatpush.bf16.xpose.msra.mxu2 %v978_v54  ;;  %v887_v55 = vpop.f32.mrf.mxu1  ;;  %1604 = vrot.lane.b32.xlu1 %v4754_v52, %s4283_s16 }
 0x207   : > { %v903_v57 = vpack.c.bf16 %v887_v55, %v887_v55 }
 0x209   : > { %v1227_v58 = vunpack.c.l.b16 %v903_v57 }
 0x20b   : > { %v4759_v59 = vpack.c.b16 %v1227_v58, %v1226_v56 }
 0x20d   : > { %3334 = vmatmul.msk.bf16.vlgmr.msra.gmra.mxu2 %vm964_vm1, %v4701_v61  ;;  %1606 = vrot.lane.b32.xlu2 %v4759_v59, %s4283_s16 }
 0x20e   : > { %v890_v62 = vpop.f32.mrf.mxu1 }
 0x20f   : > { %v904_v63 = vpack.c.bf16 %v890_v62, %v890_v62 }
 0x211   : > { %v1228_v1 = vunpack.c.l.b16 %v904_v63 }
 0x216   : > { %v892_v0 = vpop.f32.mrf.mxu1 }
 0x217   : > { %v905_v2 = vpack.c.bf16 %v892_v0, %v892_v0 }
 0x219   : > { %v1229_v5 = vunpack.c.l.b16 %v905_v2  ;;  %v4286_v2 = vmov 0  }
 0x21a   : > { %3706 = vset.pattern.permute.xlu2 %v4286_v2  ;;  %3707 = vset.pattern.permute.xlu1 %v4286_v2 }
 0x21b   : > { %v4765_v6 = vpack.c.b16 %v1229_v5, %v1228_v1  ;;  %3708 = vset.pattern.permute.xlu0 %v4286_v2  ;;  %v4855_v5 = vld [vmem:[#allocation3] sm:$0xff] }
 0x21d   : > { %3335 = vmatmul.msk.bf16.gmra.mxu2 %vm964_vm1, %v4713_v4  ;;  %1608 = vrot.lane.b32.xlu0 %v4765_v6, %s4283_s16  ;;  %v4780_v4 = vpop.permute.xlu0 %1341 }
 0x21e   : > { %v895_v7 = vpop.f32.mrf.mxu1 }
 0x21f   : > { %v906_v8 = vpack.c.bf16 %v895_v7, %v895_v7 }
 0x221   : > { %v1230_v9 = vunpack.c.l.b16 %v906_v8 }
 0x226   : > { %v897_v61 = vpop.f32.mrf.mxu1 }
 0x227   : > { %v907_v10 = vpack.c.bf16 %v897_v61, %v897_v61 }
 0x229   : > { %v1231_v11 = vunpack.c.l.b16 %v907_v10 }
 0x22b   : > { %v4771_v12 = vpack.c.b16 %v1231_v11, %v1230_v9  ;;  %v4869_v11 = vld [vmem:[#allocation3 + $0x8] sm:$0xff] }
 0x22d   : > { %3336 = vmatmul.msk.bf16.gmra.mxu2 %vm964_vm1, %v4699_v60  ;;  %3496 = vmatpush.bf16.msra.mxu3 %v4771_v12  ;;  %v4789_v60 = vpop.permute.xlu0 %2153 }
 0x22e   : > { %1610 = vrot.lane.b32.xlu0 %v4771_v12, %s4283_s16  ;;  %1256 = vmatpush.bf16.msrb.mxu2 %v4771_v12 }
 0x231   : > { %3497 = vmatpush.bf16.msra.mxu3 %v4765_v6 }
 0x232   : > { %1257 = vmatpush.bf16.msrb.mxu2 %v4765_v6 }
 0x235   : > { %3498 = vmatpush.bf16.msra.mxu3 %v4759_v59  ;;  %v4797_v16 = vpop.permute.xlu0 %2155 }
 0x236   : > { %1258 = vmatpush.bf16.msrb.mxu2 %v4759_v59 }
 0x239   : > { %3499 = vmatpush.bf16.msra.mxu3 %v4754_v52 }
 0x23a   : > { %1259 = vmatpush.bf16.msrb.mxu2 %v4754_v52 }
 0x23d   : > { %3337 = vmatmul.msk.bf16.gmra.mxu2 %vm964_vm1, %v4711_v3  ;;  %v1750_v19 = vpop.permute.xlu0 %1749  ;;  %v1350_v3 = vpop.permute.xlu2 %1349 }
 0x23e   : > { %v1372_v30 = vsel %vm964_vm1, %v1350_v3, 0 }
 0x245   : > { %v4801_v23 = vpop.permute.xlu0 %2159  ;;  %v4810_v34 = vpop.permute.xlu2 %2165 }
 0x24d   : > { %v1754_v38 = vpop.permute.xlu2 %1753 }
 0x24e   : > { %v1774_v39 = vsel %vm964_vm1, %v1754_v38, 0 }
 0x24f   : > { %v4804_v27 = vpop.permute.xlu0 %2161 }
 0x250   : > { %v1346_v20 = vpop.permute.xlu1 %1345 }
 0x251   : > { %v1366_v36 = vsel %vm964_vm1, %v1346_v20, 0 }
 0x255   : > { %v4825_v45 = vpop.permute.xlu2 %2167 }
 0x258   : > { %v1758_v22 = vpop.permute.xlu1 %1757 }
 0x259   : > { %v1780_v33 = vsel %vm964_vm1, %v1758_v22, 0 }
 0x25f   : > { %v1348_v31 = vpop.permute.xlu0 %1347 }
 0x260   : > { %v1352_v25 = vpop.permute.xlu1 %1351  ;;  %v1369_v32 = vsel %vm964_vm1, %v1348_v31, 0 }
 0x261   : > { %v1375_v26 = vsel %vm964_vm1, %v1352_v25, 0 }
 0x262   : > { %1381 = vmatpush.bf16.xpose.msrb.mxu3 %v1375_v26 }
 0x267   : > { %v1756_v35 = vpop.permute.xlu0 %1755  ;;  %v1607_v50 = vpop.permute.xlu2 %1606 }
 0x268   : > { %v1760_v28 = vpop.permute.xlu1 %1759  ;;  %v1777_v37 = vsel %vm964_vm1, %v1756_v35, 0 }
 0x269   : > { %v1783_v29 = vsel %vm964_vm1, %v1760_v28, 0  ;;  %v4885_v28 = vld [vmem:[#allocation3 + $0x18] sm:$0xff] }
 0x26a   : > { %1382 = vmatpush.bf16.xpose.msrb.mxu3 %v1372_v30  ;;  %1789 = vmatpush.bf16.xpose.msra.mxu1 %v1783_v29 }
 0x270   : > { %v4831_v49 = vpop.permute.xlu1 %2163 }
 0x272   : > { %1383 = vmatpush.bf16.xpose.msrb.mxu3 %v1369_v32  ;;  %1790 = vmatpush.bf16.xpose.msra.mxu1 %v1780_v33 }
 0x278   : > { %v1605_v54 = vpop.permute.xlu1 %1604 }
 0x27a   : > { %1384 = vmatpush.bf16.xpose.msrb.mxu3 %v1366_v36  ;;  %1791 = vmatpush.bf16.xpose.msra.mxu1 %v1777_v37  ;;  %v1022_v36 = vld [vmem:[#allocation3 + $0x20] sm:$0xff] }
 0x282   : > { %1792 = vmatpush.bf16.xpose.msra.mxu1 %v1774_v39 }
 0x289   : > { %3350 = vmatmul.msk.bf16.vlgmr.msra.gmra.mxu1 %vm964_vm1, %v1746_v18 }
 0x28f   : > { %v1609_v42 = vpop.permute.xlu0 %1608 }
 0x290   : > { %v4816_v40 = vpop.f32.mrf.mxu2 }
 0x291   : > { %v1027_v41 = vsel %vm1026_vm2, %v4816_v40, -inf }
 0x292   : > { %1028 = vmax.xlane.f32.xlu0 %v1027_v41 }
 0x298   : > { %v4820_v43 = vpop.f32.mrf.mxu2 }
 0x299   : > { %3351 = vmatmul.msk.bf16.gmra.mxu1 %vm964_vm1, %v1748_v21  ;;  %v1030_v44 = vsel %vm1026_vm2, %v4820_v43, -inf }
 0x29a   : > { %1031 = vmax.xlane.f32.xlu0 %v1030_v44 }
 0x2a0   : > { %v4827_v46 = vpop.f32.mrf.mxu2  ;;  %v1611_v47 = vpop.permute.xlu0 %1610 }
 0x2a1   : > { %v1033_v48 = vsel %vm1026_vm2, %v4827_v46, -inf  ;;  %1632 = vmatpush.bf16.msrb.mxu0 %v1611_v47 }
 0x2a2   : > { %1034 = vmax.xlane.f32.xlu1 %v1033_v48 }
 0x2a5   : > { %1633 = vmatpush.bf16.msrb.mxu0 %v1609_v42  ;;  %v4905_v42 = vld [vmem:[#allocation3 + $0x30] sm:$0xff] }
 0x2a8   : > { %v4833_v51 = vpop.f32.mrf.mxu2 }
 0x2a9   : > { %3352 = vmatmul.msk.bf16.gmra.mxu1 %vm964_vm1, %v1750_v19  ;;  %v1036_v53 = vsel %vm1026_vm2, %v4833_v51, -inf  ;;  %1634 = vmatpush.bf16.msrb.mxu0 %v1607_v50 }
 0x2aa   : > { %1037 = vmax.xlane.f32.xlu1 %v1036_v53 }
 0x2ad   : > { %1635 = vmatpush.bf16.msrb.mxu0 %v1605_v54  ;;  %v1023_v54 = vld [vmem:[#allocation3 + $0x28] sm:$0xff] }
 0x2b0   : > { %v4838_v55 = vpop.f32.mrf.mxu2 }
 0x2b1   : > { %v1039_v56 = vsel %vm1026_vm2, %v4838_v55, -inf }
 0x2b2   : > { %1040 = vmax.xlane.f32.xlu2 %v1039_v56 }
 0x2b8   : > { %v4842_v57 = vpop.f32.mrf.mxu2 }
 0x2b9   : > { %3353 = vmatmul.msk.bf16.gmra.mxu1 %vm964_vm1, %v1752_v24  ;;  %v1042_v58 = vsel %vm1026_vm2, %v4842_v57, -inf  ;;  %v1020_v24 = vld [vmem:[#allocation3 + $0x10] sm:$0xff] }
 0x2ba   : > { %1043 = vmax.xlane.f32.xlu2 %v1042_v58 }
 0x2c0   : > { %v4847_v62 = vpop.f32.mrf.mxu2 }
 0x2c1   : > { %v1045_v63 = vsel %vm1026_vm2, %v4847_v62, -inf }
 0x2c2   : > { %1046 = vmax.xlane.f32.xlu0 %v1045_v63 }
 0x2c8   : > { %v4851_v0 = vpop.f32.mrf.mxu2 }
 0x2c9   : > { %v1048_v1 = vsel %vm1026_vm2, %v4851_v0, -inf }
 0x2ca   : > { %1049 = vmax.xlane.f32.xlu1 %v1048_v1 }
 0x305   : > { %v1029_v7 = vpop.xlane.xlu0 %1028 }
 0x306   : > { %v4857_v8 = vpop.f32.mrf.mxu1  ;;  %v4860_v61 = vmax.f32 %v4855_v5, %v1029_v7 }
 0x307   : > { %v1823_v9 = vsel %vm1026_vm2, %v4857_v8, -inf }
 0x308   : > { %v1059_v10 = vsub.f32 %v4855_v5, %v4860_v61  ;;  %1204 = vst.msk [vmem:[#allocation3] sm:$0xff] %vm1195_vm3, %v4860_v61  ;;  %1824 = vmax.xlane.f32.xlu0 %v1823_v9  ;;  %1085 = vperm.xlu2 %3706, %v4860_v61   ;;  %v1025_v9 = vld [vmem:[#allocation3 + $0x38] sm:$0xff] }
 0x30d   : > { %v1032_v18 = vpop.xlane.xlu0 %1031 }
 0x30e   : > { %v4871_v19 = vpop.f32.mrf.mxu1  ;;  %v4874_v20 = vmax.f32 %v4869_v11, %v1032_v18 }
 0x30f   : > { %v1826_v21 = vsel %vm1026_vm2, %v4871_v19, -inf }
 0x310   : > { %1827 = vmax.xlane.f32.xlu1 %v1826_v21  ;;  %v1060_v22 = vsub.f32 %v4869_v11, %v4874_v20  ;;  %1205 = vst.msk [vmem:[#allocation3 + $0x8] sm:$0xff] %vm1195_vm3, %v4874_v20 }
 0x315   : > { %v1035_v25 = vpop.xlane.xlu1 %1034 }
 0x316   : > { %v4882_v26 = vpop.f32.mrf.mxu1  ;;  %v1053_v3 = vmax.f32 %v1020_v24, %v1035_v25 }
 0x317   : > { %v1829_v41 = vsel %vm1026_vm2, %v4882_v26, -inf }
 0x318   : > { %1206 = vst.msk [vmem:[#allocation3 + $0x10] sm:$0xff] %vm1195_vm3, %v1053_v3  ;;  %v1061_v1 = vsub.f32 %v1020_v24, %v1053_v3 }
 0x31a   : > { %v1071_v2 = vmul.f32 1.442695, %v1061_v1 }
 0x31c   : > { %3709 = vpow2.f32 %v1071_v2  ;;  %v1069_v2 = vmul.f32 1.442695, %v1060_v22 }
 0x31d   : > { %v1038_v29 = vpop.xlane.xlu1 %1037 }
 0x31e   : > { %v4887_v30 = vpop.f32.mrf.mxu1  ;;  %v4890_v31 = vmax.f32 %v4885_v28, %v1038_v29 }
 0x31f   : > { %v1832_v32 = vsel %vm1026_vm2, %v4887_v30, -inf }
 0x320   : > { %1833 = vmax.xlane.f32.xlu0 %v1832_v32  ;;  %v1062_v33 = vsub.f32 %v4885_v28, %v4890_v31  ;;  %1207 = vst.msk [vmem:[#allocation3 + $0x18] sm:$0xff] %vm1195_vm3, %v4890_v31 }
 0x322   : > { %v4924_v32 = vpop.eup %3709 }
 0x325   : > { %v1041_v37 = vpop.xlane.xlu2 %1040 }
 0x326   : > { %v4898_v35 = vpop.f32.mrf.mxu1  ;;  %v1055_v38 = vmax.f32 %v1022_v36, %v1041_v37 }
 0x327   : > { %v1835_v29 = vsel %vm1026_vm2, %v4898_v35, -inf }
 0x328   : > { %1208 = vst.msk [vmem:[#allocation3 + $0x20] sm:$0xff] %vm1195_vm3, %v1055_v38  ;;  %v1063_v7 = vsub.f32 %v1022_v36, %v1055_v38 }
 0x329   : > { %1095 = vperm.xlu1 %3707, %v1053_v3  }
 0x32a   : > { %v1075_v25 = vmul.f32 1.442695, %v1063_v7  ;;  %v4958_v7 = vld [vmem:[#allocation3 + $0x98] sm:$0xff] }
 0x32c   : > { %3711 = vpow2.f32 %v1075_v25 }
 0x32d   : > { %v1044_v56 = vpop.xlane.xlu2 %1043 }
 0x32e   : > { %v4900_v39 = vpop.f32.mrf.mxu1  ;;  %v1056_v58 = vmax.f32 %v1023_v54, %v1044_v56 }
 0x330   : > { %v1064_v63 = vsub.f32 %v1023_v54, %v1056_v58  ;;  %1209 = vst.msk [vmem:[#allocation3 + $0x28] sm:$0xff] %vm1195_vm3, %v1056_v58  ;;  %v4945_v54 = vld [vmem:[#allocation3 + $0x88] sm:$0xff] }
 0x331   : > { %1830 = vmax.xlane.f32.xlu2 %v1829_v41 }
 0x332   : > { %v4927_v24 = vpop.eup %3711  ;;  %v1077_v25 = vmul.f32 1.442695, %v1064_v63  ;;  %v4978_v63 = vld [vmem:[#allocation3 + $0x90] sm:$0xff] }
 0x335   : > { %v1047_v44 = vpop.xlane.xlu0 %1046 }
 0x336   : > { %v4907_v47 = vpop.f32.mrf.mxu1  ;;  %v4910_v48 = vmax.f32 %v4905_v42, %v1047_v44 }
 0x337   : > { %v1841_v50 = vsel %vm1026_vm2, %v4907_v47, -inf }
 0x338   : > { %1842 = vmax.xlane.f32.xlu0 %v1841_v50  ;;  %v1065_v53 = vsub.f32 %v4905_v42, %v4910_v48  ;;  %1210 = vst.msk [vmem:[#allocation3 + $0x30] sm:$0xff] %vm1195_vm3, %v4910_v48  ;;  %v1838_v50 = vsel %vm1026_vm2, %v4900_v39, -inf }
 0x33a   : > { %v1079_v28 = vmul.f32 1.442695, %v1065_v53 }
 0x33d   : > { %v1050_v18 = vpop.xlane.xlu1 %1049 }
 0x33e   : > { %v1058_v21 = vmax.f32 %v1025_v9, %v1050_v18 }
 0x340   : > { %1211 = vst.msk [vmem:[#allocation3 + $0x38] sm:$0xff] %vm1195_vm3, %v1058_v21  ;;  %v1066_v3 = vsub.f32 %v1025_v9, %v1058_v21 }
 0x342   : > { %v1081_v36 = vmul.f32 1.442695, %v1066_v3  ;;  %v4969_v3 = vpop.f32.mrf.mxu1 }
 0x344   : > { %3713 = vpow2.f32 %v1081_v36 }
 0x345   : > { %3715 = vpow2.f32 %v1069_v2 }
 0x346   : > { %3717 = vpow2.f32 %v1077_v25 }
 0x349   : > { %1100 = vperm.xlu2 %3706, %v4890_v31   ;;  %v5018_v31 = vld [vmem:[#allocation3 + $0xa0] sm:$0xff] }
 0x34a   : > { %v4933_v37 = vpop.eup %3713 }
 0x34c   : > { %1090 = vperm.xlu0 %3708, %v4874_v20   ;;  %v1844_v20 = vsel %vm1026_vm2, %v4969_v3, -inf }
 0x351   : > { %1105 = vperm.xlu2 %3706, %v1055_v38   ;;  %v4936_v38 = vld [vmem:[#allocation3 + $0x80] sm:$0xff] }
 0x353   : > { %1836 = vmax.xlane.f32.xlu1 %v1835_v29  ;;  %v4967_v29 = vpop.eup %3715 }
 0x354   : > { %1293 = vperm.xlu0 %3708, %v4924_v32   ;;  %v4975_v36 = vpop.eup %3717 }
 0x359   : > { %1115 = vperm.xlu2 %3706, %v4910_v48  }
 0x35c   : > { %1303 = vperm.xlu0 %3708, %v4927_v24  }
 0x362   : > { %v1086_v11 = vpop.permute.xlu2 %1085 }
 0x363   : > { %v1123_v22 = vsub.f32 %v4816_v40, %v1086_v11  ;;  %v4987_v40 = vld [vmem:[#allocation3 + $0xb0] sm:$0xff]  ;;  %v1067_v11 = vmul.f32 1.442695, %v1059_v10 }
 0x364   : > { %2016 = vrot.lane.b32.xlu0 %v4765_v6, %s4285_s0 }
 0x36c   : > { %1110 = vperm.xlu1 %3707, %v1056_v58   ;;  %1318 = vperm.xlu0 %3708, %v4933_v37  }
 0x374   : > { %1120 = vperm.xlu1 %3707, %v1058_v21  }
 0x37b   : > { %v1825_v41 = vpop.xlane.xlu0 %1824 }
 0x37c   : > { %v4939_v44 = vmax.f32 %v4936_v38, %v1825_v41  ;;  %v1131_v41 = vmul.f32 1.442695, %v1123_v22 }
 0x37e   : > { %2000 = vst.msk [vmem:[#allocation3 + $0x80] sm:$0xff] %vm1195_vm3, %v4939_v44  ;;  %3719 = vpow2.f32 %v1131_v41  ;;  %v1073_v41 = vmul.f32 1.442695, %v1062_v33 }
 0x37f   : > { %3721 = vpow2.f32 %v1067_v11 }
 0x380   : > { %3723 = vpow2.f32 %v1073_v41 }
 0x382   : > { %1839 = vmax.xlane.f32.xlu2 %v1838_v50 }
 0x383   : > { %v1828_v56 = vpop.xlane.xlu1 %1827 }
 0x384   : > { %v4948_v58 = vmax.f32 %v4945_v54, %v1828_v56  ;;  %v3720_v25 = vpop.eup %3719 }
 0x385   : > { %v1163_v22 = vsel %vm1026_vm2, %v3720_v25, 0.0 }
 0x386   : > { %2001 = vst.msk [vmem:[#allocation3 + $0x88] sm:$0xff] %vm1195_vm3, %v4948_v58  ;;  %1886 = vperm.xlu0 %3708, %v4948_v58  }
 0x393   : > { %v1834_v9 = vpop.xlane.xlu0 %1833 }
 0x394   : > { %v4961_v18 = vmax.f32 %v4958_v7, %v1834_v9 }
 0x396   : > { %2003 = vst.msk [vmem:[#allocation3 + $0x98] sm:$0xff] %vm1195_vm3, %v4961_v18 }
 0x39a   : > { %1288 = vperm.xlu2 %3706, %v4967_v29  }
 0x39b   : > { %v1096_v61 = vpop.permute.xlu1 %1095 }
 0x39c   : > { %v1125_v48 = vsub.f32 %v4827_v46, %v1096_v61 }
 0x39e   : > { %1845 = vmax.xlane.f32.xlu1 %v1844_v20 }
 0x3a2   : > { %1308 = vperm.xlu2 %3706, %v4975_v36  }
 0x3a4   : > { %v1831_v50 = vpop.xlane.xlu2 %1830 }
 0x3a5   : > { %v4981_v56 = vmax.f32 %v4978_v63, %v1831_v50  ;;  %v5005_v50 = vpop.eup %3721 }
 0x3a6   : > { %v5010_v5 = vpop.eup %3723 }
 0x3a7   : > { %2002 = vst.msk [vmem:[#allocation3 + $0x90] sm:$0xff] %vm1195_vm3, %v4981_v56 }
 0x3aa   : > { %2012 = vrot.lane.b32.xlu2 %v4754_v52, %s4285_s0 }
 0x3ab   : > { %v1843_v9 = vpop.xlane.xlu0 %1842 }
 0x3ac   : > { %v4995_v20 = vmax.f32 %v4987_v40, %v1843_v9  ;;  %v1101_v33 = vpop.permute.xlu2 %1100 }
 0x3ae   : > { %2006 = vst.msk [vmem:[#allocation3 + $0xb0] sm:$0xff] %vm1195_vm3, %v4995_v20 }
 0x3b0   : > { %1164 = vadd.xlane.f32.xlu0 %v1163_v22 }
 0x3b2   : > { %2426 = vrot.lane.b32.xlu2 %v4771_v12, %s4284_s24 }
 0x3b7   : > { %1283 = vperm.xlu1 %3707, %v5005_v50  }
 0x3ba   : > { %2014 = vrot.lane.b32.xlu2 %v4759_v59, %s4285_s0 }
 0x3be   : > { %v1091_v10 = vpop.permute.xlu0 %1090 }
 0x3bf   : > { %v1124_v9 = vsub.f32 %v4820_v43, %v1091_v10  ;;  %1298 = vperm.xlu1 %3707, %v5010_v5   ;;  %v1126_v10 = vsub.f32 %v4833_v51, %v1101_v33 }
 0x3c1   : > { %v1133_v11 = vmul.f32 1.442695, %v1124_v9 }
 0x3c2   : > { %1881 = vperm.xlu2 %3706, %v4939_v44  }
 0x3c3   : > { %3725 = vpow2.f32 %v1133_v11  ;;  %v1135_v11 = vmul.f32 1.442695, %v1125_v48 }
 0x3c4   : > { %3727 = vpow2.f32 %v1079_v28  ;;  %v1106_v28 = vpop.permute.xlu2 %1105 }
 0x3c6   : > { %v1837_v22 = vpop.xlane.xlu1 %1836 }
 0x3c7   : > { %v5021_v41 = vmax.f32 %v5018_v31, %v1837_v22  ;;  %2018 = vrot.lane.b32.xlu1 %v4771_v12, %s4285_s0  ;;  %v1137_v12 = vmul.f32 1.442695, %v1126_v10 }
 0x3c9   : > { %v3726_v43 = vpop.eup %3725  ;;  %2004 = vst.msk [vmem:[#allocation3 + $0xa0] sm:$0xff] %vm1195_vm3, %v5021_v41  ;;  %1901 = vperm.xlu0 %3708, %v5021_v41   ;;  %3729 = vpow2.f32 %v1137_v12 }
 0x3ca   : > { %1896 = vperm.xlu2 %3706, %v4961_v18   ;;  %v1212_v42 = vpack.c.bf16 %v3726_v43, %v3720_v25  ;;  %v5034_v53 = vpop.eup %3727  ;;  %3731 = vpow2.f32 %v1135_v11  ;;  %v1127_v25 = vsub.f32 %v4838_v55, %v1106_v28 }
 0x3cc   : > { %3338 = vmatmul.msk.bf16.vlgmr.msrb.gmra.mxu2 %vm1026_vm2, %v1212_v42  ;;  %v1139_v61 = vmul.f32 1.442695, %v1127_v25  ;;  %v1116_v11 = vpop.permute.xlu2 %1115  ;;  %v2191_v25 = vsel %vm964_vm1, %v4825_v45, 0 }
 0x3cd   : > { %v1129_v28 = vsub.f32 %v4847_v62, %v1116_v11  ;;  %v2188_v62 = vsel %vm964_vm1, %v4810_v34, 0  ;;  %v2185_v34 = vsel %vm964_vm1, %v4831_v49, 0 }
 0x3ce   : > { %3733 = vpow2.f32 %v1139_v61 }
 0x3cf   : > { %1313 = vperm.xlu1 %3707, %v5034_v53   ;;  %v5037_v51 = vpop.eup %3729 }
 0x3d0   : > { %v3732_v33 = vpop.eup %3731 }
 0x3d1   : > { %v1213_v46 = vpack.c.bf16 %v5037_v51, %v3732_v33 }
 0x3d4   : > { %v3734_v12 = vpop.eup %3733 }
 0x3d5   : > { %v1175_v61 = vsel %vm1026_vm2, %v3734_v12, 0.0 }
 0x3d7   : > { %1891 = vperm.xlu1 %3707, %v4981_v56  }
 0x3dc   : > { %3339 = vmatmul.msk.bf16.gmra.mxu2 %vm1026_vm2, %v1213_v46  ;;  %v1143_v46 = vmul.f32 1.442695, %v1129_v28  ;;  %v1169_v28 = vsel %vm1026_vm2, %v3732_v33, 0.0 }
 0x3de   : > { %v1111_v22 = vpop.permute.xlu1 %1110 }
 0x3df   : > { %v1128_v10 = vsub.f32 %v4842_v57, %v1111_v22  ;;  %v1166_v22 = vsel %vm1026_vm2, %v3726_v43, 0.0 }
 0x3e1   : > { %v1141_v42 = vmul.f32 1.442695, %v1128_v10  ;;  %v5058_v10 = vpop.permute.xlu0 %1293 }
 0x3e3   : > { %3735 = vpow2.f32 %v1141_v42 }
 0x3e6   : > { %v1121_v48 = vpop.permute.xlu1 %1120 }
 0x3e7   : > { %v1130_v2 = vsub.f32 %v4851_v0, %v1121_v48  ;;  %v5054_v0 = vld [vmem:[#allocation3 + $0xa8] sm:$0xff] }
 0x3e9   : > { %v5044_v21 = vpop.eup %3735  ;;  %v1145_v57 = vmul.f32 1.442695, %v1130_v2 }
 0x3ea   : > { %v1214_v55 = vpack.c.bf16 %v5044_v21, %v3734_v12 }
 0x3eb   : > { %3737 = vpow2.f32 %v1145_v57 }
 0x3ec   : > { %3340 = vmatmul.msk.bf16.vlgmr.msra.gmra.mxu3 %vm1026_vm2, %v1214_v55  ;;  %3739 = vpow2.f32 %v1143_v46  ;;  %v5072_v55 = vpop.permute.xlu0 %1303 }
 0x3ed   : > { %2197 = vmatpush.bf16.xpose.msra.mxu3 %v2191_v25  ;;  %v2182_v25 = vsel %vm964_vm1, %v4804_v27, 0 }
 0x3f1   : > { %v3738_v42 = vpop.eup %3737 }
 0x3f2   : > { %v3740_v43 = vpop.eup %3739 }
 0x3f3   : > { %1176 = vadd.xlane.f32.xlu0 %v1175_v61  ;;  %1167 = vadd.xlane.f32.xlu2 %v1166_v22  ;;  %v1215_v12 = vpack.c.bf16 %v3738_v42, %v3740_v43  ;;  %v5082_v61 = vld [vmem:[#allocation3 + $0xb8] sm:$0xff] }
 0x3f4   : > { %v2017_v46 = vpop.permute.xlu0 %2016 }
 0x3f5   : > { %2198 = vmatpush.bf16.xpose.msra.mxu3 %v2188_v62  ;;  %v1840_v45 = vpop.xlane.xlu2 %1839 }
 0x3f6   : > { %v5061_v2 = vmax.f32 %v5054_v0, %v1840_v45 }
 0x3f8   : > { %2005 = vst.msk [vmem:[#allocation3 + $0xa8] sm:$0xff] %vm1195_vm3, %v5061_v2 }
 0x3fc   : > { %3341 = vmatmul.msk.bf16.gmra.mxu3 %vm1026_vm2, %v1215_v12  ;;  %v5084_v22 = vpop.permute.xlu0 %1318  ;;  %v1147_v12 = vld [vmem:[#allocation4] sm:$0xff] }
 0x3fd   : > { %2199 = vmatpush.bf16.xpose.msra.mxu3 %v2185_v34  ;;  %v5070_v11 = vpop.permute.xlu2 %1288  ;;  %v1155_v34 = vmul.f32 %v5005_v50, %v1147_v12 }
 0x401   : > { %1170 = vadd.xlane.f32.xlu1 %v1169_v28 }
 0x405   : > { %2200 = vmatpush.bf16.xpose.msra.mxu3 %v2182_v25  ;;  %v5077_v57 = vpop.permute.xlu2 %1308 }
 0x40b   : > { %1906 = vperm.xlu2 %3706, %v5061_v2  }
 0x40c   : > { %3342 = vmatmul.msk.bf16.vlgmr.msrb.gmra.mxu3 %vm964_vm1, %v4783_v13  ;;  %v1887_v13 = vpop.permute.xlu0 %1886 }
 0x40d   : > { %v2013_v49 = vpop.permute.xlu2 %2012  ;;  %v1920_v50 = vsub.f32 %v4871_v19, %v1887_v13 }
 0x411   : > { %v1846_v62 = vpop.xlane.xlu1 %1845 }
 0x412   : > { %v5087_v33 = vmax.f32 %v5082_v61, %v1846_v62 }
 0x414   : > { %2007 = vst.msk [vmem:[#allocation3 + $0xb8] sm:$0xff] %vm1195_vm3, %v5087_v33  ;;  %1916 = vperm.xlu0 %3708, %v5087_v33  }
 0x415   : > { %v2427_v45 = vpop.permute.xlu2 %2426 }
 0x416   : > { %2448 = vmatpush.bf16.msra.mxu0 %v2427_v45 }
 0x41a   : > { %1911 = vperm.xlu1 %3707, %v4995_v20  }
 0x41c   : > { %3343 = vmatmul.msk.bf16.gmra.mxu3 %vm964_vm1, %v4791_v14  ;;  %v1172_v14 = vsel %vm1026_vm2, %v5037_v51, 0.0 }
 0x41d   : > { %v2015_v62 = vpop.permute.xlu2 %2014 }
 0x423   : > { %v1165_v28 = vpop.xlane.xlu0 %1164 }
 0x424   : > { %v1187_v25 = vadd.f32 %v1165_v28, %v1155_v34  ;;  %v1181_v28 = vsel %vm1026_vm2, %v3740_v43, 0.0 }
 0x425   : > { %v1882_v48 = vpop.permute.xlu2 %1881 }
 0x426   : > { %1196 = vst.msk [vmem:[#allocation4] sm:$0xff] %vm1195_vm3, %v1187_v25  ;;  %v1919_v9 = vsub.f32 %v4857_v8, %v1882_v48  ;;  %v1929_v25 = vmul.f32 1.442695, %v1920_v50  ;;  %v1184_v8 = vsel %vm1026_vm2, %v3738_v42, 0.0 }
 0x428   : > { %v1927_v1 = vmul.f32 1.442695, %v1919_v9 }
 0x429   : > { %v1284_v27 = vpop.permute.xlu1 %1283 }
 0x42a   : > { %3741 = vpow2.f32 %v1927_v1  ;;  %v1178_v1 = vsel %vm1026_vm2, %v5044_v21, 0.0 }
 0x42b   : > { %3743 = vpow2.f32 %v1929_v25 }
 0x42c   : > { %3344 = vmatmul.msk.bf16.gmra.mxu3 %vm964_vm1, %v4780_v4 }
 0x430   : > { %v3742_v51 = vpop.eup %3741 }
 0x431   : > { %v5101_v45 = vpop.permute.xlu1 %1298  ;;  %v3744_v48 = vpop.eup %3743 }
 0x432   : > { %5979 = vst [vmem:[#allocation39_spill] sm:$0xff] %v5101_v45  ;;  %v2008_v42 = vpack.c.bf16 %v3744_v48, %v3742_v51  ;;  %v1963_v21 = vsel %vm1026_vm2, %v3744_v48, 0.0 }
 0x434   : > { %1173 = vadd.xlane.f32.xlu2 %v1172_v14  ;;  %v916_v14 = vld [vmem:[#allocation5] sm:$0xff] }
 0x439   : > { %v2019_v12 = vpop.permute.xlu1 %2018 }
 0x43a   : > { %2040 = vmatpush.bf16.msra.mxu2 %v2019_v12 }
 0x43b   : > { %v1902_v34 = vpop.permute.xlu0 %1901 }
 0x43c   : > { %v1923_v4 = vsub.f32 %v4898_v35, %v1902_v34  ;;  %3345 = vmatmul.msk.bf16.gmra.mxu3 %vm964_vm1, %v4795_v15  ;;  %1182 = vadd.xlane.f32.xlu2 %v1181_v28  ;;  %v1960_v35 = vsel %vm1026_vm2, %v3742_v51, 0.0  ;;  %v1897_v15 = vpop.permute.xlu2 %1896 }
 0x43d   : > { %v1922_v43 = vsub.f32 %v4887_v30, %v1897_v15  ;;  %v1321_v30 = vmul.f32 %v1284_v27, %v916_v14  ;;  %v918_v27 = vld [vmem:[#allocation5 + $0x8] sm:$0xff] }
 0x43e   : > { %1185 = vadd.xlane.f32.xlu0 %v1184_v8  ;;  %2041 = vmatpush.bf16.msra.mxu2 %v2017_v46  ;;  %v1935_v9 = vmul.f32 1.442695, %v1923_v4  ;;  %v1323_v15 = vmul.f32 %v5058_v10, %v918_v27 }
 0x43f   : > { %v1933_v50 = vmul.f32 1.442695, %v1922_v43  ;;  %v1148_v43 = vld [vmem:[#allocation4 + $0x8] sm:$0xff] }
 0x440   : > { %3745 = vpow2.f32 %v1935_v9 }
 0x441   : > { %v5112_v19 = vpop.permute.xlu1 %1313 }
 0x442   : > { %2042 = vmatpush.bf16.msra.mxu2 %v2015_v62 }
 0x444   : > { %1179 = vadd.xlane.f32.xlu1 %v1178_v1  ;;  %1961 = vadd.xlane.f32.xlu2 %v1960_v35 }
 0x446   : > { %2043 = vmatpush.bf16.msra.mxu2 %v2013_v49  ;;  %v5118_v46 = vpop.eup %3745 }
 0x447   : > { %v1972_v49 = vsel %vm1026_vm2, %v5118_v46, 0.0 }
 0x449   : > { %3354 = vmatmul.msk.bf16.vlgmr.msra.gmra.mxu2 %vm1026_vm2, %v2008_v42  ;;  %v1892_v13 = vpop.permute.xlu1 %1891 }
 0x44a   : > { %v1921_v62 = vsub.f32 %v4882_v26, %v1892_v13  ;;  %v917_v26 = vld [vmem:[#allocation5 + $0x38] sm:$0xff] }
 0x44b   : > { %v1322_v9 = vmul.f32 %v5070_v11, %v917_v26  ;;  %v1151_v11 = vld [vmem:[#allocation4 + $0x20] sm:$0xff] }
 0x44c   : > { %v1931_v12 = vmul.f32 1.442695, %v1921_v62  ;;  %1964 = vadd.xlane.f32.xlu1 %v1963_v21  ;;  %3358 = vmatmul.msk.bf16.vlgmr.msra.gmra.mxu3 %vm964_vm1, %v4789_v60  ;;  %v1159_v13 = vmul.f32 %v4927_v24, %v1151_v11  ;;  %v1156_v62 = vmul.f32 %v4967_v29, %v1148_v43  ;;  %v1149_v29 = vld [vmem:[#allocation4 + $0x10] sm:$0xff] }
 0x44d   : > { %1973 = vadd.xlane.f32.xlu2 %v1972_v49 }
 0x44e   : > { %3747 = vpow2.f32 %v1931_v12 }
 0x44f   : > { %v1261_v34 = vpop.f32.mrf.mxu2  ;;  %3749 = vpow2.f32 %v1933_v50 }
 0x450   : > { %v5127_v28 = vadd.f32 %v1321_v30, %v1261_v34 }
 0x454   : > { %v3748_v25 = vpop.eup %3747 }
 0x455   : > { %v1966_v4 = vsel %vm1026_vm2, %v3748_v25, 0.0  ;;  %v3750_v8 = vpop.eup %3749 }
 0x456   : > { %1967 = vadd.xlane.f32.xlu0 %v1966_v4  ;;  %v2009_v60 = vpack.c.bf16 %v3750_v8, %v3748_v25  ;;  %v1969_v35 = vsel %vm1026_vm2, %v3750_v8, 0.0  ;;  %v5150_v25 = vld [vmem:[#allocation5 + $0x10] sm:$0xff]  ;;  %v1157_v4 = vmul.f32 %v4924_v32, %v1149_v29 }
 0x457   : > { %v1263_v51 = vpop.f32.mrf.mxu2 }
 0x458   : > { %v5131_v1 = vadd.f32 %v1322_v9, %v1263_v51 }
 0x459   : > { %3355 = vmatmul.msk.bf16.gmra.mxu2 %vm1026_vm2, %v2009_v60 }
 0x45c   : > { %3359 = vmatmul.msk.bf16.gmra.mxu3 %vm964_vm1, %v4797_v16  ;;  %v920_v16 = vld [vmem:[#allocation5 + $0x20] sm:$0xff] }
 0x45d   : > { %v1325_v10 = vmul.f32 %v5072_v55, %v920_v16 }
 0x45e   : > { %1970 = vadd.xlane.f32.xlu0 %v1969_v35  ;;  %v922_v35 = vld [vmem:[#allocation5 + $0x30] sm:$0xff] }
 0x45f   : > { %v1266_v48 = vpop.f32.mrf.mxu2  ;;  %v1327_v32 = vmul.f32 %v5112_v19, %v922_v35  ;;  %v1154_v35 = vld [vmem:[#allocation4 + $0x38] sm:$0xff] }
 0x460   : > { %v5138_v42 = vadd.f32 %v1323_v15, %v1266_v48  ;;  %v923_v48 = vld [vmem:[#allocation5 + $0x28] sm:$0xff] }
 0x461   : > { %v1328_v11 = vmul.f32 %v5084_v22, %v923_v48  ;;  %v1162_v48 = vmul.f32 %v4933_v37, %v1154_v35 }
 0x466   : > { %v1177_v14 = vpop.xlane.xlu0 %1176  ;;  %v1168_v21 = vpop.xlane.xlu2 %1167 }
 0x467   : > { %v1191_v50 = vadd.f32 %v1177_v14, %v1159_v13  ;;  %v1188_v12 = vadd.f32 %v1168_v21, %v1156_v62 }
 0x469   : > { %1200 = vst.msk [vmem:[#allocation4 + $0x20] sm:$0xff] %vm1195_vm3, %v1191_v50 }
 0x46a   : > { %1197 = vst.msk [vmem:[#allocation4 + $0x8] sm:$0xff] %vm1195_vm3, %v1188_v12 }
 0x46c   : > { %3360 = vmatmul.msk.bf16.gmra.mxu3 %vm964_vm1, %v4799_v17  ;;  %v1326_v17 = vmul.f32 %v5077_v57, %v5150_v25 }
 0x46e   : > { %v1907_v49 = vpop.permute.xlu2 %1906 }
 0x46f   : > { %v1924_v30 = vsub.f32 %v4900_v39, %v1907_v49  ;;  %v1271_v24 = vpop.f32.mrf.mxu3 }
 0x470   : > { %v5148_v34 = vadd.f32 %v1325_v10, %v1271_v24 }
 0x471   : > { %v1937_v26 = vmul.f32 1.442695, %v1924_v30 }
 0x473   : > { %3751 = vpow2.f32 %v1937_v26  ;;  %v1150_v26 = vld [vmem:[#allocation4 + $0x18] sm:$0xff] }
 0x474   : > { %v1171_v8 = vpop.xlane.xlu1 %1170 }
 0x475   : > { %v1189_v9 = vadd.f32 %v1171_v8, %v1157_v4  ;;  %v1855_v4 = vsub.f32 %v4936_v38, %v4939_v44  ;;  %v1158_v8 = vmul.f32 %v5010_v5, %v1150_v26 }
 0x477   : > { %1198 = vst.msk [vmem:[#allocation4 + $0x10] sm:$0xff] %vm1195_vm3, %v1189_v9  ;;  %v1273_v55 = vpop.f32.mrf.mxu3 }
 0x478   : > { %v5156_v51 = vadd.f32 %v1326_v17, %v1273_v55 }
 0x479   : > { %v3752_v39 = vpop.eup %3751 }
 0x47a   : > { %v1975_v60 = vsel %vm1026_vm2, %v3752_v39, 0.0  ;;  %v2010_v27 = vpack.c.bf16 %v3752_v39, %v5118_v46 }
 0x47b   : > { %1976 = vadd.xlane.f32.xlu1 %v1975_v60  ;;  %v1863_v60 = vmul.f32 1.442695, %v1855_v4 }
 0x47c   : > { %3361 = vmatmul.msk.bf16.gmra.mxu3 %vm964_vm1, %v4801_v23  ;;  %3356 = vmatmul.msk.bf16.gmra.mxu2 %vm1026_vm2, %v2010_v27  ;;  %v1153_v27 = vld [vmem:[#allocation4 + $0x30] sm:$0xff] }
 0x47f   : > { %v1276_v57 = vpop.f32.mrf.mxu3 }
 0x480   : > { %v5164_v15 = vadd.f32 %v1327_v32, %v1276_v57  ;;  %v1161_v32 = vmul.f32 %v5034_v53, %v1153_v27 }
 0x482   : > { %5980 = vst [vmem:[#allocation40_spill] sm:$0xff] %v5164_v15 }
 0x486   : > { %v1917_v43 = vpop.permute.xlu0 %1916 }
 0x487   : > { %v1926_v13 = vsub.f32 %v4969_v3, %v1917_v43  ;;  %v1278_v62 = vpop.f32.mrf.mxu3 }
 0x488   : > { %v5168_v46 = vadd.f32 %v1328_v11, %v1278_v62  ;;  %v5982_v11 = vsub.f32 %v4945_v54, %v4948_v58  ;;  %v5983_v62 = vsub.f32 %v5018_v31, %v5021_v41 }
 0x489   : > { %v1941_v14 = vmul.f32 1.442695, %v1926_v13 }
 0x48a   : > { %5981 = vst [vmem:[#allocation41_spill] sm:$0xff] %v5168_v46  ;;  %v1865_v43 = vmul.f32 1.442695, %v5982_v11 }
 0x48b   : > { %3753 = vpow2.f32 %v1941_v14  ;;  %v1871_v14 = vmul.f32 1.442695, %v5983_v62 }
 0x48c   : > { %v1912_v21 = vpop.permute.xlu1 %1911 }
 0x48d   : > { %v1925_v23 = vsub.f32 %v4907_v47, %v1912_v21  ;;  %v1152_v21 = vld [vmem:[#allocation4 + $0x28] sm:$0xff] }
 0x48e   : > { %v1160_v37 = vmul.f32 %v4975_v36, %v1152_v21 }
 0x48f   : > { %v1939_v50 = vmul.f32 1.442695, %v1925_v23  ;;  %v5171_v12 = vpop.f32.mrf.mxu3 }
 0x490   : > { %v1415_v47 = vsel %vm1026_vm2, %v5171_v12, -inf }
 0x491   : > { %v3754_v19 = vpop.eup %3753  ;;  %3755 = vpow2.f32 %v1939_v50  ;;  %v1944_v50 = vld [vmem:[#allocation4 + $0x80] sm:$0xff] }
 0x492   : > { %v1981_v16 = vsel %vm1026_vm2, %v3754_v19, 0.0  ;;  %3757 = vpow2.f32 %v1863_v60  ;;  %v5985_v60 = vsub.f32 %v4958_v7, %v4961_v18  ;;  %v1947_v18 = vld [vmem:[#allocation4 + $0x98] sm:$0xff] }
 0x493   : > { %1982 = vadd.xlane.f32.xlu0 %v1981_v16  ;;  %3759 = vpow2.f32 %v1865_v43 }
 0x494   : > { %3761 = vpow2.f32 %v1871_v14  ;;  %v1869_v27 = vmul.f32 1.442695, %v5985_v60  ;;  %v1951_v60 = vld [vmem:[#allocation4 + $0xb8] sm:$0xff] }
 0x497   : > { %v3756_v22 = vpop.eup %3755  ;;  %v5174_v10 = vpop.f32.mrf.mxu3 }
 0x498   : > { %v1418_v3 = vsel %vm1026_vm2, %v5174_v10, -inf  ;;  %v1978_v49 = vsel %vm1026_vm2, %v3756_v22, 0.0  ;;  %v2011_v30 = vpack.c.bf16 %v3754_v19, %v3756_v22  ;;  %v5207_v23 = vpop.eup %3757 }
 0x499   : > { %1419 = vmax.xlane.f32.xlu2 %v1418_v3  ;;  %1979 = vadd.xlane.f32.xlu1 %v1978_v49  ;;  %v1952_v19 = vmul.f32 %v5207_v23, %v1944_v50  ;;  %v5217_v3 = vpop.eup %3759  ;;  %v5984_v49 = vsub.f32 %v4978_v63, %v4981_v56 }
 0x49a   : > { %3357 = vmatmul.msk.bf16.gmra.mxu2 %vm1026_vm2, %v2011_v30  ;;  %v1945_v30 = vld [vmem:[#allocation4 + $0x88] sm:$0xff] }
 0x49b   : > { %1416 = vmax.xlane.f32.xlu0 %v1415_v47  ;;  %v1867_v36 = vmul.f32 1.442695, %v5984_v49  ;;  %v5223_v47 = vpop.eup %3761  ;;  %v1953_v26 = vmul.f32 %v5217_v3, %v1945_v30  ;;  %v1949_v49 = vld [vmem:[#allocation4 + $0xa8] sm:$0xff] }
 0x49d   : > { %3763 = vpow2.f32 %v1867_v36 }
 0x49e   : > { %3765 = vpow2.f32 %v1869_v27 }
 0x49f   : > { %v5182_v24 = vpop.f32.mrf.mxu3 }
 0x4a0   : > { %v1421_v29 = vsel %vm1026_vm2, %v5182_v24, -inf }
 0x4a1   : > { %1422 = vmax.xlane.f32.xlu1 %v1421_v29  ;;  %v1948_v29 = vld [vmem:[#allocation4 + $0xa0] sm:$0xff] }
 0x4a3   : > { %v5236_v35 = vpop.eup %3763 }
 0x4a4   : > { %v5244_v7 = vpop.eup %3765 }
 0x4a5   : > { %v1955_v62 = vmul.f32 %v5244_v7, %v1947_v18 }
 0x4a7   : > { %v5189_v9 = vpop.f32.mrf.mxu3  ;;  %v1174_v17 = vpop.xlane.xlu2 %1173 }
 0x4a8   : > { %v1190_v55 = vadd.f32 %v1174_v17, %v1158_v8  ;;  %v1424_v39 = vsel %vm1026_vm2, %v5189_v9, -inf  ;;  %v1956_v17 = vmul.f32 %v5223_v47, %v1948_v29 }
 0x4a9   : > { %1425 = vmax.xlane.f32.xlu0 %v1424_v39 }
 0x4aa   : > { %1199 = vst.msk [vmem:[#allocation4 + $0x18] sm:$0xff] %vm1195_vm3, %v1190_v55 }
 0x4af   : > { %v5195_v57 = vpop.f32.mrf.mxu3  ;;  %v1183_v38 = vpop.xlane.xlu2 %1182 }
 0x4b0   : > { %v1193_v44 = vadd.f32 %v1183_v38, %v1161_v32  ;;  %v1427_v5 = vsel %vm1026_vm2, %v5195_v57, -inf  ;;  %v1946_v32 = vld [vmem:[#allocation4 + $0x90] sm:$0xff] }
 0x4b1   : > { %1428 = vmax.xlane.f32.xlu2 %v1427_v5  ;;  %v1186_v13 = vpop.xlane.xlu0 %1185  ;;  %v1954_v5 = vmul.f32 %v5236_v35, %v1946_v32 }
 0x4b2   : > { %1202 = vst.msk [vmem:[#allocation4 + $0x30] sm:$0xff] %vm1195_vm3, %v1193_v44  ;;  %v1194_v53 = vadd.f32 %v1186_v13, %v1162_v48 }
 0x4b4   : > { %1203 = vst.msk [vmem:[#allocation4 + $0x38] sm:$0xff] %vm1195_vm3, %v1194_v53 }
 0x4b7   : > { %v5211_v54 = vpop.f32.mrf.mxu3  ;;  %v1180_v58 = vpop.xlane.xlu1 %1179 }
 0x4b8   : > { %v1192_v31 = vadd.f32 %v1180_v58, %v1160_v37  ;;  %v1962_v41 = vpop.xlane.xlu2 %1961  ;;  %v1430_v16 = vsel %vm1026_vm2, %v5211_v54, -inf  ;;  %v5986_v58 = vsub.f32 %v5054_v0, %v5061_v2 }
 0x4b9   : > { %v1984_v22 = vadd.f32 %v1962_v41, %v1952_v19  ;;  %1431 = vmax.xlane.f32.xlu1 %v1430_v16 }
 0x4ba   : > { %1201 = vst.msk [vmem:[#allocation4 + $0x28] sm:$0xff] %vm1195_vm3, %v1192_v31  ;;  %v1873_v19 = vmul.f32 1.442695, %v5986_v58  ;;  %v1409_v58 = vld [vmem:[#allocation3 + $0x50] sm:$0xff] }
 0x4bb   : > { %1992 = vst.msk [vmem:[#allocation4 + $0x80] sm:$0xff] %vm1195_vm3, %v1984_v22 }
 0x4bc   : > { %3767 = vpow2.f32 %v1873_v19 }
 0x4bf   : > { %v5226_v4 = vpop.f32.mrf.mxu3  ;;  %v1965_v8 = vpop.xlane.xlu1 %1964 }
 0x4c0   : > { %v1985_v55 = vadd.f32 %v1965_v8, %v1953_v26  ;;  %v1974_v39 = vpop.xlane.xlu2 %1973  ;;  %v1433_v63 = vsel %vm1026_vm2, %v5226_v4, -inf  ;;  %v5987_v8 = vsub.f32 %v5082_v61, %v5087_v33  ;;  %v1950_v61 = vld [vmem:[#allocation4 + $0xb0] sm:$0xff]  ;;  %v1408_v33 = vld [vmem:[#allocation3 + $0x48] sm:$0xff] }
 0x4c1   : > { %v1988_v56 = vadd.f32 %v1974_v39, %v1956_v17  ;;  %1434 = vmax.xlane.f32.xlu0 %v1433_v63  ;;  %v1861_v39 = vsub.f32 %v4987_v40, %v4995_v20  ;;  %v1407_v20 = vld [vmem:[#allocation3 + $0x40] sm:$0xff] }
 0x4c2   : > { %1993 = vst.msk [vmem:[#allocation4 + $0x88] sm:$0xff] %vm1195_vm3, %v1985_v55  ;;  %v5267_v22 = vpop.eup %3767  ;;  %v1877_v17 = vmul.f32 1.442695, %v5987_v8 }
 0x4c3   : > { %1996 = vst.msk [vmem:[#allocation4 + $0xa0] sm:$0xff] %vm1195_vm3, %v1988_v56  ;;  %v1957_v36 = vmul.f32 %v5267_v22, %v1949_v49  ;;  %v1875_v63 = vmul.f32 1.442695, %v1861_v39 }
 0x4c4   : > { %3769 = vpow2.f32 %v1877_v17 }
 0x4c5   : > { %3771 = vpow2.f32 %v1875_v63  ;;  %v1411_v63 = vld [vmem:[#allocation3 + $0x60] sm:$0xff] }
 0x4c7   : > { %v5238_v38 = vpop.f32.mrf.mxu3 }
 0x4c8   : > { %v1436_v44 = vsel %vm1026_vm2, %v5238_v38, -inf }
 0x4c9   : > { %1437 = vmax.xlane.f32.xlu2 %v1436_v44  ;;  %v1968_v48 = vpop.xlane.xlu0 %1967 }
 0x4ca   : > { %v1986_v11 = vadd.f32 %v1968_v48, %v1954_v5  ;;  %v5284_v56 = vpop.eup %3769 }
 0x4cb   : > { %v1959_v27 = vmul.f32 %v5284_v56, %v1951_v60  ;;  %v5287_v5 = vpop.eup %3771 }
 0x4cc   : > { %1994 = vst.msk [vmem:[#allocation4 + $0x90] sm:$0xff] %vm1195_vm3, %v1986_v11  ;;  %v1958_v48 = vmul.f32 %v5287_v5, %v1950_v61 }
 0x4cf   : > { %v5246_v43 = vpop.f32.mrf.mxu3 }
 0x4d0   : > { %v2231_v13 = vsel %vm1026_vm2, %v5246_v43, -inf }
 0x4d1   : > { %2232 = vmax.xlane.f32.xlu2 %v2231_v13  ;;  %v1971_v14 = vpop.xlane.xlu0 %1970 }
 0x4d2   : > { %v1987_v53 = vadd.f32 %v1971_v14, %v1955_v62 }
 0x4d4   : > { %1995 = vst.msk [vmem:[#allocation4 + $0x98] sm:$0xff] %vm1195_vm3, %v1987_v53 }
 0x4d7   : > { %v5252_v21 = vpop.f32.mrf.mxu3 }
 0x4d8   : > { %v2234_v50 = vsel %vm1026_vm2, %v5252_v21, -inf }
 0x4d9   : > { %2235 = vmax.xlane.f32.xlu1 %v2234_v50 }
 0x4df   : > { %v5256_v37 = vpop.f32.mrf.mxu3 }
 0x4e0   : > { %v2237_v31 = vsel %vm1026_vm2, %v5256_v37, -inf }
 0x4e1   : > { %2238 = vmax.xlane.f32.xlu0 %v2237_v31 }
 0x4e7   : > { %v5263_v41 = vpop.f32.mrf.mxu3 }
 0x4e8   : > { %v2240_v16 = vsel %vm1026_vm2, %v5263_v41, -inf }
 0x4e9   : > { %2241 = vmax.xlane.f32.xlu2 %v2240_v16 }
 0x4ee   : > { %v1977_v30 = vpop.xlane.xlu1 %1976 }
 0x4ef   : > { %v5270_v29 = vpop.f32.mrf.mxu3  ;;  %v1989_v0 = vadd.f32 %v1977_v30, %v1957_v36  ;;  %v1410_v30 = vld [vmem:[#allocation3 + $0x58] sm:$0xff] }
 0x4f0   : > { %v2243_v2 = vsel %vm1026_vm2, %v5270_v29, -inf }
 0x4f1   : > { %1997 = vst.msk [vmem:[#allocation4 + $0xa8] sm:$0xff] %vm1195_vm3, %v1989_v0  ;;  %2244 = vmax.xlane.f32.xlu1 %v2243_v2 }
 0x4f7   : > { %v5275_v26 = vpop.f32.mrf.mxu3 }
 0x4f8   : > { %v2246_v55 = vsel %vm1026_vm2, %v5275_v26, -inf }
 0x4f9   : > { %2247 = vmax.xlane.f32.xlu0 %v2246_v55 }
 0x506   : > { %v1983_v32 = vpop.xlane.xlu0 %1982 }
 0x507   : > { %v1991_v44 = vadd.f32 %v1983_v32, %v1959_v27 }
 0x509   : > { %1999 = vst.msk [vmem:[#allocation4 + $0xb8] sm:$0xff] %vm1195_vm3, %v1991_v44 }
 0x50c   : > { %v1420_v11 = vpop.xlane.xlu2 %1419  ;;  %v1980_v40 = vpop.xlane.xlu1 %1979 }
 0x50d   : > { %v1440_v18 = vmax.f32 %v1408_v33, %v1420_v11  ;;  %v1990_v13 = vadd.f32 %v1980_v40, %v1958_v48  ;;  %v1412_v48 = vld [vmem:[#allocation3 + $0x68] sm:$0xff] }
 0x50e   : > { %v1417_v62 = vpop.xlane.xlu0 %1416 }
 0x50f   : > { %1593 = vst.msk [vmem:[#allocation3 + $0x48] sm:$0xff] %vm1195_vm3, %v1440_v18  ;;  %v1439_v14 = vmax.f32 %v1407_v20, %v1417_v62  ;;  %1478 = vperm.xlu0 %3708, %v1440_v18   ;;  %v1448_v53 = vsub.f32 %v1408_v33, %v1440_v18 }
 0x510   : > { %1998 = vst.msk [vmem:[#allocation4 + $0xb0] sm:$0xff] %vm1195_vm3, %v1990_v13 }
 0x511   : > { %v1447_v50 = vsub.f32 %v1407_v20, %v1439_v14  ;;  %1592 = vst.msk [vmem:[#allocation3 + $0x40] sm:$0xff] %vm1195_vm3, %v1439_v14  ;;  %1473 = vperm.xlu1 %3707, %v1439_v14   ;;  %v1457_v31 = vmul.f32 1.442695, %v1448_v53  ;;  %v1413_v14 = vld [vmem:[#allocation3 + $0x70] sm:$0xff] }
 0x513   : > { %v1455_v19 = vmul.f32 1.442695, %v1447_v50 }
 0x514   : > { %v1423_v16 = vpop.xlane.xlu1 %1422 }
 0x515   : > { %3773 = vpow2.f32 %v1455_v19  ;;  %v1441_v49 = vmax.f32 %v1409_v58, %v1423_v16 }
 0x516   : > { %3775 = vpow2.f32 %v1457_v31  ;;  %v1414_v31 = vld [vmem:[#allocation3 + $0x78] sm:$0xff] }
 0x517   : > { %1594 = vst.msk [vmem:[#allocation3 + $0x50] sm:$0xff] %vm1195_vm3, %v1441_v49  ;;  %1483 = vperm.xlu2 %3706, %v1441_v49   ;;  %v1449_v36 = vsub.f32 %v1409_v58, %v1441_v49 }
 0x519   : > { %v1459_v2 = vmul.f32 1.442695, %v1449_v36 }
 0x51b   : > { %v5295_v0 = vpop.eup %3773  ;;  %3777 = vpow2.f32 %v1459_v2 }
 0x51c   : > { %v1426_v8 = vpop.xlane.xlu0 %1425  ;;  %1659 = vperm.xlu1 %3707, %v5295_v0   ;;  %v5298_v55 = vpop.eup %3775 }
 0x51d   : > { %v1442_v17 = vmax.f32 %v1410_v30, %v1426_v8  ;;  %v5320_v8 = vld [vmem:[#allocation3 + $0xc0] sm:$0xff] }
 0x51f   : > { %1595 = vst.msk [vmem:[#allocation3 + $0x58] sm:$0xff] %vm1195_vm3, %v1442_v17  ;;  %1488 = vperm.xlu0 %3708, %v1442_v17   ;;  %1664 = vperm.xlu2 %3706, %v5298_v55   ;;  %v1450_v39 = vsub.f32 %v1410_v30, %v1442_v17 }
 0x521   : > { %v1461_v60 = vmul.f32 1.442695, %v1450_v39  ;;  %v5302_v44 = vpop.eup %3777 }
 0x523   : > { %3779 = vpow2.f32 %v1461_v60 }
 0x524   : > { %v1429_v27 = vpop.xlane.xlu2 %1428 }
 0x525   : > { %v1443_v32 = vmax.f32 %v1411_v63, %v1429_v27  ;;  %v5336_v27 = vld [vmem:[#allocation3 + $0xc8] sm:$0xff] }
 0x527   : > { %v1451_v61 = vsub.f32 %v1411_v63, %v1443_v32  ;;  %1596 = vst.msk [vmem:[#allocation3 + $0x60] sm:$0xff] %vm1195_vm3, %v1443_v32  ;;  %1493 = vperm.xlu1 %3707, %v1443_v32   ;;  %1669 = vperm.xlu0 %3708, %v5302_v44  }
 0x529   : > { %v1463_v33 = vmul.f32 1.442695, %v1451_v61  ;;  %v5306_v20 = vpop.eup %3779 }
 0x52b   : > { %3781 = vpow2.f32 %v1463_v33 }
 0x52c   : > { %v1432_v11 = vpop.xlane.xlu1 %1431 }
 0x52d   : > { %v1444_v40 = vmax.f32 %v1412_v48, %v1432_v11 }
 0x52f   : > { %v1452_v18 = vsub.f32 %v1412_v48, %v1444_v40  ;;  %1597 = vst.msk [vmem:[#allocation3 + $0x68] sm:$0xff] %vm1195_vm3, %v1444_v40  ;;  %1674 = vperm.xlu0 %3708, %v5306_v20   ;;  %1498 = vperm.xlu2 %3706, %v1444_v40   ;;  %v5348_v48 = vld [vmem:[#allocation3 + $0xd0] sm:$0xff] }
 0x531   : > { %v5310_v13 = vpop.eup %3781  ;;  %v1465_v62 = vmul.f32 1.442695, %v1452_v18 }
 0x532   : > { %1679 = vperm.xlu1 %3707, %v5310_v13  }
 0x533   : > { %3783 = vpow2.f32 %v1465_v62  ;;  %v5359_v62 = vld [vmem:[#allocation3 + $0xd8] sm:$0xff] }
 0x534   : > { %v1435_v53 = vpop.xlane.xlu0 %1434 }
 0x535   : > { %v1445_v50 = vmax.f32 %v1413_v14, %v1435_v53 }
 0x537   : > { %1598 = vst.msk [vmem:[#allocation3 + $0x70] sm:$0xff] %vm1195_vm3, %v1445_v50  ;;  %1503 = vperm.xlu0 %3708, %v1445_v50   ;;  %2424 = vrot.lane.b32.xlu2 %v4765_v6, %s4284_s24  ;;  %v1453_v19 = vsub.f32 %v1413_v14, %v1445_v50  ;;  %v5369_v50 = vld [vmem:[#allocation3 + $0xe0] sm:$0xff] }
 0x539   : > { %v5316_v58 = vpop.eup %3783  ;;  %v1467_v36 = vmul.f32 1.442695, %v1453_v19 }
 0x53a   : > { %1684 = vperm.xlu1 %3707, %v5316_v58  }
 0x53b   : > { %3785 = vpow2.f32 %v1467_v36  ;;  %v5381_v36 = vpop.f32.mrf.mxu3 }
 0x53c   : > { %v1438_v16 = vpop.xlane.xlu2 %1437 }
 0x53d   : > { %v1446_v49 = vmax.f32 %v1414_v31, %v1438_v16  ;;  %v5379_v16 = vld [vmem:[#allocation3 + $0xe8] sm:$0xff] }
 0x53f   : > { %v1454_v30 = vsub.f32 %v1414_v31, %v1446_v49  ;;  %1599 = vst.msk [vmem:[#allocation3 + $0x78] sm:$0xff] %vm1195_vm3, %v1446_v49 }
 0x541   : > { %v1469_v2 = vmul.f32 1.442695, %v1454_v30  ;;  %v5330_v63 = vpop.eup %3785 }
 0x542   : > { %1508 = vperm.xlu1 %3707, %v1446_v49  }
 0x543   : > { %3787 = vpow2.f32 %v1469_v2 }
 0x544   : > { %v2233_v17 = vpop.xlane.xlu2 %2232 }
 0x545   : > { %v5323_v6 = vmax.f32 %v5320_v8, %v2233_v17  ;;  %v2249_v17 = vsel %vm1026_vm2, %v5381_v36, -inf }
 0x547   : > { %2408 = vst.msk [vmem:[#allocation3 + $0xc0] sm:$0xff] %vm1195_vm3, %v5323_v6  ;;  %2289 = vperm.xlu0 %3708, %v5323_v6  }
 0x549   : > { %v5332_v60 = vpop.eup %3787 }
 0x54a   : > { %1694 = vperm.xlu2 %3706, %v5332_v60   ;;  %1689 = vperm.xlu1 %3707, %v5330_v63  }
 0x54c   : > { %v2236_v32 = vpop.xlane.xlu1 %2235 }
 0x54d   : > { %v5339_v61 = vmax.f32 %v5336_v27, %v2236_v32  ;;  %v5393_v32 = vpop.f32.mrf.mxu2 }
 0x54e   : > { %5988 = vst [vmem:[#allocation42_spill] sm:$0xff] %v5393_v32 }
 0x54f   : > { %2409 = vst.msk [vmem:[#allocation3 + $0xc8] sm:$0xff] %vm1195_vm3, %v5339_v61 }
 0x552   : > { %2422 = vrot.lane.b32.xlu2 %v4759_v59, %s4284_s24  ;;  %2294 = vperm.xlu1 %3707, %v5339_v61  }
 0x554   : > { %v2239_v11 = vpop.xlane.xlu0 %2238 }
 0x555   : > { %v5351_v40 = vmax.f32 %v5348_v48, %v2239_v11 }
 0x557   : > { %2410 = vst.msk [vmem:[#allocation3 + $0xd0] sm:$0xff] %vm1195_vm3, %v5351_v40 }
 0x55a   : > { %2420 = vrot.lane.b32.xlu2 %v4754_v52, %s4284_s24 }
 0x55c   : > { %v2242_v59 = vpop.xlane.xlu2 %2241 }
 0x55d   : > { %v5362_v14 = vmax.f32 %v5359_v62, %v2242_v59  ;;  %v5395_v59 = vpop.f32.mrf.mxu3 }
 0x55f   : > { %2411 = vst.msk [vmem:[#allocation3 + $0xd8] sm:$0xff] %vm1195_vm3, %v5362_v14 }
 0x562   : > { %2299 = vperm.xlu2 %3706, %v5351_v40  }
 0x564   : > { %v2245_v19 = vpop.xlane.xlu1 %2244 }
 0x565   : > { %v5372_v31 = vmax.f32 %v5369_v50, %v2245_v19  ;;  %v5398_v19 = vpop.f32.mrf.mxu2 }
 0x567   : > { %2412 = vst.msk [vmem:[#allocation3 + $0xe0] sm:$0xff] %vm1195_vm3, %v5372_v31 }
 0x56a   : > { %2304 = vperm.xlu2 %3706, %v5362_v14  }
 0x56c   : > { %v2248_v49 = vpop.xlane.xlu0 %2247 }
 0x56d   : > { %v5384_v30 = vmax.f32 %v5379_v16, %v2248_v49  ;;  %v2252_v49 = vsel %vm1026_vm2, %v5395_v59, -inf  ;;  %v5407_v53 = vpop.f32.mrf.mxu2 }
 0x56f   : > { %2413 = vst.msk [vmem:[#allocation3 + $0xe8] sm:$0xff] %vm1195_vm3, %v5384_v30 }
 0x571   : > { %2250 = vmax.xlane.f32.xlu0 %v2249_v17  ;;  %v1484_v11 = vpop.permute.xlu2 %1483 }
 0x572   : > { %2067 = vperm.xlu2 %3706, %v5207_v23  }
 0x579   : > { %v5402_v2 = vpop.permute.xlu2 %1664 }
 0x57a   : > { %2309 = vperm.xlu2 %3706, %v5372_v31  }
 0x57c   : > { %2253 = vmax.xlane.f32.xlu1 %v2252_v49 }
 0x581   : > { %v1479_v52 = vpop.permute.xlu0 %1478 }
 0x582   : > { %v1512_v17 = vsub.f32 %v5174_v10, %v1479_v52  ;;  %2077 = vperm.xlu2 %3706, %v5236_v35   ;;  %v2050_v10 = vpop.f32.mrf.mxu2 }
 0x583   : > { %v1474_v23 = vpop.permute.xlu1 %1473 }
 0x584   : > { %v1521_v18 = vmul.f32 1.442695, %v1512_v17  ;;  %v1511_v39 = vsub.f32 %v5171_v12, %v1474_v23  ;;  %v1513_v12 = vsub.f32 %v5182_v24, %v1484_v11 }
 0x585   : > { %2072 = vperm.xlu0 %3708, %v5217_v3  }
 0x586   : > { %v1519_v33 = vmul.f32 1.442695, %v1511_v39  ;;  %3789 = vpow2.f32 %v1521_v18 }
 0x588   : > { %3791 = vpow2.f32 %v1519_v33  ;;  %v1523_v33 = vmul.f32 1.442695, %v1513_v12 }
 0x589   : > { %v1499_v15 = vpop.permute.xlu2 %1498 }
 0x58a   : > { %v5423_v23 = vpop.f32.mrf.mxu2 }
 0x58c   : > { %v5410_v49 = vpop.eup %3789 }
 0x58d   : > { %2314 = vperm.xlu0 %3708, %v5384_v30  }
 0x58e   : > { %v5413_v46 = vpop.eup %3791  ;;  %v5420_v39 = vpop.permute.xlu1 %1659 }
 0x58f   : > { %v1600_v35 = vpack.c.bf16 %v5410_v49, %v5413_v46 }
 0x591   : > { %v1489_v52 = vpop.permute.xlu0 %1488  ;;  %v2425_v17 = vpop.permute.xlu2 %2424  ;;  %3346 = vmatmul.msk.bf16.vlgmr.msrb.gmra.mxu0 %vm1026_vm2, %v1600_v35 }
 0x592   : > { %v1514_v3 = vsub.f32 %v5189_v9, %v1489_v52  ;;  %2449 = vmatpush.bf16.msra.mxu0 %v2425_v17  ;;  %v5436_v52 = vpop.f32.mrf.mxu2 }
 0x594   : > { %v1525_v18 = vmul.f32 1.442695, %v1514_v3 }
 0x595   : > { %2087 = vperm.xlu0 %3708, %v5223_v47   ;;  %v1516_v47 = vsub.f32 %v5211_v54, %v1499_v15 }
 0x596   : > { %3793 = vpow2.f32 %v1525_v18 }
 0x597   : > { %3795 = vpow2.f32 %v1523_v33  ;;  %v1529_v33 = vmul.f32 1.442695, %v1516_v47 }
 0x599   : > { %v5425_v32 = vpop.permute.xlu0 %1669  ;;  %v1494_v24 = vpop.permute.xlu1 %1493 }
 0x59a   : > { %v1515_v9 = vsub.f32 %v5195_v57, %v1494_v24  ;;  %v5991_v57 = vsub.f32 %v5336_v27, %v5339_v61  ;;  %v2057_v54 = vpop.f32.mrf.mxu2  ;;  %v5992_v27 = vsub.f32 %v5359_v62, %v5362_v14 }
 0x59c   : > { %v5427_v11 = vpop.eup %3793  ;;  %v1527_v17 = vmul.f32 1.442695, %v1515_v9  ;;  %v2273_v15 = vmul.f32 1.442695, %v5991_v57  ;;  %v2277_v61 = vmul.f32 1.442695, %v5992_v27 }
 0x59d   : > { %2102 = vperm.xlu0 %3708, %v5284_v56   ;;  %v5430_v35 = vpop.eup %3795 }
 0x59e   : > { %v1601_v12 = vpack.c.bf16 %v5427_v11, %v5430_v35  ;;  %3797 = vpow2.f32 %v1527_v17 }
 0x59f   : > { %3799 = vpow2.f32 %v1529_v33 }
 0x5a0   : > { %3801 = vpow2.f32 %v2273_v15 }
 0x5a1   : > { %3347 = vmatmul.msk.bf16.gmra.mxu0 %vm1026_vm2, %v1601_v12  ;;  %v5439_v3 = vpop.permute.xlu0 %1674  ;;  %3803 = vpow2.f32 %v2277_v61 }
 0x5a2   : > { %5989 = vst [vmem:[#allocation43_spill] sm:$0xff] %v5439_v3 }
 0x5a4   : > { %v5441_v18 = vpop.permute.xlu2 %1694  ;;  %v5443_v56 = vpop.permute.xlu1 %1679 }
 0x5a5   : > { %5990 = vst [vmem:[#allocation44_spill] sm:$0xff] %v5441_v18  ;;  %2125 = vrot.lane.b32.xlu0 %v2050_v10, %s4285_s0  ;;  %v5449_v24 = vpop.eup %3797 }
 0x5a6   : > { %v5454_v47 = vpop.eup %3799 }
 0x5a7   : > { %v1602_v10 = vpack.c.bf16 %v5454_v47, %v5449_v24  ;;  %v5463_v33 = vpop.eup %3801 }
 0x5a9   : > { %v1504_v3 = vpop.permute.xlu0 %1503 }
 0x5aa   : > { %v1517_v17 = vsub.f32 %v5226_v4, %v1504_v3  ;;  %v5467_v4 = vpop.eup %3803 }
 0x5ac   : > { %v2423_v12 = vpop.permute.xlu2 %2422  ;;  %v5451_v9 = vpop.permute.xlu1 %1684  ;;  %v1531_v57 = vmul.f32 1.442695, %v1517_v17 }
 0x5ad   : > { %2131 = vrot.lane.b32.xlu0 %v2057_v54, %s4285_s0  ;;  %2450 = vmatpush.bf16.msra.mxu0 %v2423_v12 }
 0x5ae   : > { %3805 = vpow2.f32 %v1531_v57 }
 0x5b1   : > { %3348 = vmatmul.msk.bf16.gmra.mxu0 %vm1026_vm2, %v1602_v10 }
 0x5b4   : > { %v2421_v18 = vpop.permute.xlu2 %2420  ;;  %v1509_v54 = vpop.permute.xlu1 %1508 }
 0x5b5   : > { %v1518_v12 = vsub.f32 %v5238_v38, %v1509_v54  ;;  %2451 = vmatpush.bf16.msra.mxu0 %v2421_v18  ;;  %2480 = vperm.xlu0 %3708, %v5463_v33   ;;  %v5472_v62 = vpop.eup %3805 }
 0x5b7   : > { %v1533_v15 = vmul.f32 1.442695, %v1518_v12 }
 0x5b9   : > { %3807 = vpow2.f32 %v1533_v15  ;;  %v2290_v14 = vpop.permute.xlu0 %2289 }
 0x5ba   : > { %v2327_v18 = vsub.f32 %v5246_v43, %v2290_v14 }
 0x5bc   : > { %v5469_v3 = vpop.permute.xlu1 %1689  ;;  %v2300_v17 = vpop.permute.xlu2 %2299  ;;  %v2335_v61 = vmul.f32 1.442695, %v2327_v18 }
 0x5bd   : > { %5993 = vst [vmem:[#allocation45_spill] sm:$0xff] %v5469_v3  ;;  %2490 = vperm.xlu0 %3708, %v5467_v4   ;;  %v2329_v14 = vsub.f32 %v5256_v37, %v2300_v17  ;;  %v2230_v37 = vld [vmem:[#allocation3 + $0xf8] sm:$0xff] }
 0x5be   : > { %3809 = vpow2.f32 %v2335_v61 }
 0x5bf   : > { %v5474_v10 = vpop.eup %3807  ;;  %v2339_v18 = vmul.f32 1.442695, %v2329_v14 }
 0x5c0   : > { %v1603_v38 = vpack.c.bf16 %v5474_v10, %v5472_v62 }
 0x5c2   : > { %3349 = vmatmul.msk.bf16.gmra.mxu0 %vm1026_vm2, %v1603_v38 }
 0x5c4   : > { %v2295_v27 = vpop.permute.xlu1 %2294  ;;  %v2305_v12 = vpop.permute.xlu2 %2304 }
 0x5c5   : > { %v2328_v57 = vsub.f32 %v5252_v21, %v2295_v27  ;;  %v5481_v15 = vpop.eup %3809  ;;  %v2330_v45 = vsub.f32 %v5263_v41, %v2305_v12 }
 0x5c7   : > { %v2337_v54 = vmul.f32 1.442695, %v2328_v57  ;;  %v2341_v38 = vmul.f32 1.442695, %v2330_v45  ;;  %v2229_v57 = vld [vmem:[#allocation3 + $0xf0] sm:$0xff] }
 0x5c9   : > { %3811 = vpow2.f32 %v2337_v54 }
 0x5ca   : > { %3813 = vpow2.f32 %v2341_v38 }
 0x5cb   : > { %3815 = vpow2.f32 %v2339_v18 }
 0x5cc   : > { %v5498_v17 = vpop.permute.xlu2 %2067 }
 0x5cf   : > { %v5483_v3 = vpop.eup %3811 }
 0x5d0   : > { %v2416_v43 = vpack.c.bf16 %v5483_v3, %v5481_v15  ;;  %v5490_v21 = vpop.eup %3813 }
 0x5d1   : > { %v5492_v27 = vpop.eup %3815 }
 0x5d2   : > { %3362 = vmatmul.msk.bf16.vlgmr.msra.gmra.mxu0 %vm1026_vm2, %v2416_v43  ;;  %v2417_v61 = vpack.c.bf16 %v5490_v21, %v5492_v27 }
 0x5e2   : > { %3363 = vmatmul.msk.bf16.gmra.mxu0 %vm1026_vm2, %v2417_v61  ;;  %v2310_v61 = vpop.permute.xlu2 %2309 }
 0x5e4   : > { %v2251_v41 = vpop.xlane.xlu0 %2250 }
 0x5e5   : > { %v2261_v54 = vmax.f32 %v2229_v57, %v2251_v41 }
 0x5e7   : > { %v2269_v12 = vsub.f32 %v2229_v57, %v2261_v54  ;;  %2414 = vst.msk [vmem:[#allocation3 + $0xf0] sm:$0xff] %vm1195_vm3, %v2261_v54  ;;  %2319 = vperm.xlu1 %3707, %v2261_v54   ;;  %v2331_v57 = vsub.f32 %v5270_v29, %v2310_v61 }
 0x5e9   : > { %v2283_v45 = vmul.f32 1.442695, %v2269_v12  ;;  %v2343_v41 = vmul.f32 1.442695, %v2331_v57 }
 0x5eb   : > { %3817 = vpow2.f32 %v2283_v45  ;;  %v2060_v45 = vpop.f32.mrf.mxu2 }
 0x5ec   : > { %3819 = vpow2.f32 %v2343_v41 }
 0x5ef   : > { %2082 = vperm.xlu1 %3707, %v5244_v7   ;;  %v2254_v43 = vpop.xlane.xlu1 %2253 }
 0x5f0   : > { %v2262_v14 = vmax.f32 %v2230_v37, %v2254_v43 }
 0x5f1   : > { %v5501_v38 = vpop.eup %3817 }
 0x5f2   : > { %2415 = vst.msk [vmem:[#allocation3 + $0xf8] sm:$0xff] %vm1195_vm3, %v2262_v14  ;;  %2505 = vperm.xlu0 %3708, %v5501_v38   ;;  %2324 = vperm.xlu2 %3706, %v2262_v14  }
 0x5f7   : > { %v5505_v18 = vpop.permute.xlu0 %2072  ;;  %2097 = vperm.xlu1 %3707, %v5287_v5   ;;  %v5994_v5 = vsub.f32 %v5320_v8, %v5323_v6  ;;  %v5997_v8 = vsub.f32 %v5379_v16, %v5384_v30  ;;  %v1564_v30 = vsel %vm1026_vm2, %v5449_v24, 0.0 }
 0x5f9   : > { %v2281_v6 = vmul.f32 1.442695, %v5997_v8 }
 0x5fa   : > { %2092 = vperm.xlu2 %3706, %v5267_v22   ;;  %v5517_v22 = vpop.eup %3819 }
 0x5ff   : > { %v2315_v7 = vpop.permute.xlu0 %2314  ;;  %2123 = vrot.lane.b32.xlu1 %v5407_v53, %s4285_s0  ;;  %v2271_v53 = vmul.f32 1.442695, %v5994_v5 }
 0x600   : > { %v2332_v54 = vsub.f32 %v5275_v26, %v2315_v7 }
 0x602   : > { %v2345_v12 = vmul.f32 1.442695, %v2332_v54  ;;  %2121 = vrot.lane.b32.xlu2 %v5398_v19, %s4285_s0  ;;  %v2062_v19 = vpop.f32.mrf.mxu2 }
 0x604   : > { %3821 = vpow2.f32 %v2345_v12  ;;  %v2368_v12 = vsel %vm1026_vm2, %v5481_v15, 0.0 }
 0x605   : > { %3823 = vpow2.f32 %v2271_v53 }
 0x607   : > { %2129 = vrot.lane.b32.xlu1 %v5436_v52, %s4285_s0  ;;  %v5995_v52 = vsub.f32 %v5348_v48, %v5351_v40  ;;  %v2270_v48 = vsub.f32 %v2230_v37, %v2262_v14 }
 0x609   : > { %v2275_v43 = vmul.f32 1.442695, %v5995_v52 }
 0x60a   : > { %v5519_v29 = vpop.eup %3821  ;;  %2127 = vrot.lane.b32.xlu2 %v5423_v23, %s4285_s0  ;;  %v5996_v23 = vsub.f32 %v5369_v50, %v5372_v31  ;;  %v1555_v50 = vsel %vm1026_vm2, %v5410_v49, 0.0  ;;  %v2285_v31 = vmul.f32 1.442695, %v2270_v48  ;;  %v1573_v49 = vsel %vm1026_vm2, %v5474_v10, 0.0  ;;  %v5579_v10 = vpop.permute.xlu2 %2077 }
 0x60b   : > { %v2418_v26 = vpack.c.bf16 %v5519_v29, %v5517_v22  ;;  %3825 = vpow2.f32 %v2275_v43  ;;  %v5537_v57 = vpop.eup %3823 }
 0x60c   : > { %v2279_v61 = vmul.f32 1.442695, %v5996_v23  ;;  %v1558_v23 = vsel %vm1026_vm2, %v5430_v35, 0.0 }
 0x60d   : > { %3364 = vmatmul.msk.bf16.gmra.mxu0 %vm1026_vm2, %v2418_v26  ;;  %v2377_v26 = vsel %vm1026_vm2, %v5490_v21, 0.0  ;;  %v1561_v21 = vsel %vm1026_vm2, %v5427_v11, 0.0  ;;  %v1570_v11 = vsel %vm1026_vm2, %v5472_v62, 0.0 }
 0x60e   : > { %3827 = vpow2.f32 %v2279_v61  ;;  %v5546_v41 = vpop.f32.mrf.mxu0 }
 0x60f   : > { %2135 = vrot.lane.b32.xlu1 %v2062_v19, %s4285_s0  ;;  %3829 = vpow2.f32 %v2281_v6  ;;  %v1552_v19 = vsel %vm1026_vm2, %v5413_v46, 0.0 }
 0x610   : > { %3831 = vpow2.f32 %v2285_v31  ;;  %v1567_v31 = vsel %vm1026_vm2, %v5454_v47, 0.0  ;;  %v2374_v47 = vsel %vm1026_vm2, %v5492_v27, 0.0 }
 0x611   : > { %v5543_v40 = vpop.eup %3825 }
 0x612   : > { %2133 = vrot.lane.b32.xlu2 %v2060_v45, %s4285_s0  ;;  %v5569_v45 = vpop.permute.xlu0 %2087 }
 0x614   : > { %v5550_v7 = vpop.eup %3827 }
 0x615   : > { %v5553_v16 = vpop.eup %3829 }
 0x616   : > { %v5558_v37 = vpop.f32.mrf.mxu0  ;;  %v5560_v14 = vpop.eup %3831 }
 0x617   : > { %2475 = vperm.xlu1 %3707, %v5537_v57  }
 0x61a   : > { %2485 = vperm.xlu2 %3706, %v5543_v40   ;;  %v5575_v5 = vpop.permute.xlu0 %2102 }
 0x61c   : > { %1556 = vadd.xlane.f32.xlu0 %v1555_v50 }
 0x61e   : > { %v5565_v54 = vpop.f32.mrf.mxu0 }
 0x61f   : > { %2495 = vperm.xlu1 %3707, %v5550_v7  }
 0x622   : > { %2500 = vperm.xlu2 %3706, %v5553_v16   ;;  %v5583_v15 = vpop.permute.xlu0 %2125 }
 0x624   : > { %1565 = vadd.xlane.f32.xlu0 %v1564_v30 }
 0x626   : > { %v5571_v24 = vpop.f32.mrf.mxu0 }
 0x627   : > { %2510 = vperm.xlu1 %3707, %v5560_v14  }
 0x62a   : > { %v2132_v46 = vpop.permute.xlu0 %2131 }
 0x62c   : > { %1574 = vadd.xlane.f32.xlu0 %v1573_v49 }
 0x62e   : > { %v5577_v53 = vpop.f32.mrf.mxu0 }
 0x634   : > { %2369 = vadd.xlane.f32.xlu0 %v2368_v12  ;;  %v5602_v12 = vld [vmem:[#allocation5] sm:$0xff] }
 0x636   : > { %v5585_v43 = vpop.f32.mrf.mxu0 }
 0x63c   : > { %2378 = vadd.xlane.f32.xlu0 %v2377_v26 }
 0x63f   : > { %v5593_v48 = vpop.f32.mrf.mxu0 }
 0x64b   : > { %1553 = vadd.xlane.f32.xlu2 %v1552_v19 }
 0x64c   : > { %v2325_v52 = vpop.permute.xlu2 %2324 }
 0x64d   : > { %v2334_v8 = vsub.f32 %v5395_v59, %v2325_v52  ;;  %v5610_v52 = vld [vmem:[#allocation5 + $0x18] sm:$0xff] }
 0x64f   : > { %v2349_v30 = vmul.f32 1.442695, %v2334_v8 }
 0x651   : > { %1559 = vadd.xlane.f32.xlu1 %v1558_v23  ;;  %3833 = vpow2.f32 %v2349_v30 }
 0x653   : > { %1562 = vadd.xlane.f32.xlu2 %v1561_v21 }
 0x654   : > { %v2093_v61 = vpop.permute.xlu2 %2092 }
 0x655   : > { %v2110_v6 = vmul.f32 %v2093_v61, %v5150_v25  ;;  %v2105_v25 = vmul.f32 %v5602_v12, %v5498_v17  ;;  %v2371_v17 = vsel %vm1026_vm2, %v5483_v3, 0.0 }
 0x657   : > { %v5595_v50 = vadd.f32 %v2132_v46, %v2110_v6  ;;  %v3834_v21 = vpop.eup %3833 }
 0x659   : > { %1568 = vadd.xlane.f32.xlu1 %v1567_v31  ;;  %v2320_v35 = vpop.permute.xlu1 %2319  ;;  %v2383_v31 = vsel %vm1026_vm2, %v5519_v29, 0.0 }
 0x65a   : > { %v2333_v49 = vsub.f32 %v5381_v36, %v2320_v35  ;;  %v5612_v36 = vpop.f32.mrf.mxu0  ;;  %v5623_v35 = vld [vmem:[#allocation5 + $0x30] sm:$0xff] }
 0x65b   : > { %1571 = vadd.xlane.f32.xlu2 %v1570_v11 }
 0x65c   : > { %v2347_v59 = vmul.f32 1.442695, %v2333_v49  ;;  %v2122_v26 = vpop.permute.xlu2 %2121  ;;  %v2380_v49 = vsel %vm1026_vm2, %v5517_v22, 0.0  ;;  %v5639_v22 = vld [vmem:[#allocation5 + $0x20] sm:$0xff] }
 0x65d   : > { %v5606_v19 = vadd.f32 %v2122_v26, %v2105_v25  ;;  %v5630_v26 = vld [vmem:[#allocation5 + $0x38] sm:$0xff] }
 0x65e   : > { %3835 = vpow2.f32 %v2347_v59 }
 0x661   : > { %2375 = vadd.xlane.f32.xlu1 %v2374_v47  ;;  %v2083_v62 = vpop.permute.xlu1 %2082  ;;  %v2106_v47 = vmul.f32 %v5630_v26, %v5505_v18 }
 0x662   : > { %v2108_v23 = vmul.f32 %v2083_v62, %v5610_v52  ;;  %v2453_v11 = vpop.f32.mrf.mxu0 }
 0x663   : > { %2372 = vadd.xlane.f32.xlu2 %v2371_v17  ;;  %v5637_v17 = vpop.permute.xlu0 %2480 }
 0x664   : > { %v3836_v61 = vpop.eup %3835  ;;  %v2128_v8 = vpop.permute.xlu2 %2127 }
 0x665   : > { %v5617_v6 = vadd.f32 %v2128_v8, %v2108_v23  ;;  %v2386_v46 = vsel %vm1026_vm2, %v3836_v61, 0.0  ;;  %v2419_v27 = vpack.c.bf16 %v3834_v21, %v3836_v61  ;;  %v2389_v23 = vsel %vm1026_vm2, %v3834_v21, 0.0 }
 0x666   : > { %2387 = vadd.xlane.f32.xlu0 %v2386_v46  ;;  %v2109_v8 = vmul.f32 %v5639_v22, %v5569_v45 }
 0x667   : > { %3365 = vmatmul.msk.bf16.gmra.mxu0 %vm1026_vm2, %v2419_v27 }
 0x669   : > { %2384 = vadd.xlane.f32.xlu1 %v2383_v31  ;;  %v2098_v30 = vpop.permute.xlu1 %2097 }
 0x66a   : > { %v2111_v3 = vmul.f32 %v5623_v35, %v2098_v30  ;;  %v2455_v61 = vpop.f32.mrf.mxu0  ;;  %v5649_v30 = vld [vmem:[#allocation5 + $0x28] sm:$0xff] }
 0x66b   : > { %2381 = vadd.xlane.f32.xlu2 %v2380_v49  ;;  %v5647_v18 = vpop.permute.xlu0 %2490  ;;  %v2112_v21 = vmul.f32 %v5649_v30, %v5575_v5  ;;  %v1537_v5 = vld [vmem:[#allocation4 + $0x48] sm:$0xff] }
 0x66c   : > { %v2134_v25 = vpop.permute.xlu2 %2133 }
 0x66d   : > { %v5628_v59 = vadd.f32 %v2134_v25, %v2111_v3  ;;  %v1545_v25 = vmul.f32 %v5298_v55, %v1537_v5  ;;  %v1543_v55 = vld [vmem:[#allocation4 + $0x78] sm:$0xff] }
 0x671   : > { %v2124_v29 = vpop.permute.xlu1 %2123 }
 0x672   : > { %v5634_v62 = vadd.f32 %v2124_v29, %v2106_v47  ;;  %v2458_v31 = vpop.f32.mrf.mxu0 }
 0x673   : > { %2390 = vadd.xlane.f32.xlu2 %v2389_v23  ;;  %v5659_v45 = vpop.permute.xlu0 %2505 }
 0x679   : > { %v2130_v46 = vpop.permute.xlu1 %2129 }
 0x67a   : > { %v5643_v27 = vadd.f32 %v2130_v46, %v2109_v8  ;;  %1715 = vrot.lane.b32.xlu0 %v5558_v37, %s4284_s24  ;;  %v2460_v37 = vpop.f32.mrf.mxu0 }
 0x681   : > { %v2136_v3 = vpop.permute.xlu1 %2135 }
 0x682   : > { %v5653_v49 = vadd.f32 %v2136_v3, %v2112_v21  ;;  %1717 = vrot.lane.b32.xlu1 %v5565_v54, %s4284_s24  ;;  %1723 = vrot.lane.b32.xlu0 %v5585_v43, %s4284_s24 }
 0x68a   : > { %1719 = vrot.lane.b32.xlu1 %v5571_v24, %s4284_s24  ;;  %2531 = vrot.lane.b32.xlu0 %v2455_v61, %s4283_s16  ;;  %v2463_v54 = vpop.f32.mrf.mxu0  ;;  %v1540_v24 = vld [vmem:[#allocation4 + $0x60] sm:$0xff] }
 0x68b   : > { %1713 = vrot.lane.b32.xlu2 %v5546_v41, %s4284_s24  ;;  %v1548_v43 = vmul.f32 %v5310_v13, %v1540_v24  ;;  %v2352_v13 = vld [vmem:[#allocation4 + $0xc0] sm:$0xff] }
 0x68f   : > { %v1557_v47 = vpop.xlane.xlu0 %1556 }
 0x690   : > { %v1577_v29 = vadd.f32 %v1557_v47, %v1545_v25 }
 0x692   : > { %1585 = vst.msk [vmem:[#allocation4 + $0x48] sm:$0xff] %vm1195_vm3, %v1577_v29  ;;  %1725 = vrot.lane.b32.xlu1 %v5593_v48, %s4284_s24  ;;  %2537 = vrot.lane.b32.xlu0 %v2463_v54, %s4283_s16  ;;  %v1551_v48 = vmul.f32 %v5332_v60, %v1543_v55  ;;  %v2465_v46 = vpop.f32.mrf.mxu0  ;;  %v2355_v60 = vld [vmem:[#allocation4 + $0xd8] sm:$0xff] }
 0x693   : > { %1721 = vrot.lane.b32.xlu2 %v5577_v53, %s4284_s24  ;;  %v2360_v53 = vmul.f32 %v5537_v57, %v2352_v13  ;;  %v2363_v5 = vmul.f32 %v5467_v4, %v2355_v60  ;;  %v1541_v13 = vld [vmem:[#allocation4 + $0x68] sm:$0xff] }
 0x697   : > { %v1566_v41 = vpop.xlane.xlu0 %1565 }
 0x698   : > { %v1580_v23 = vadd.f32 %v1566_v41, %v1548_v43  ;;  %v1538_v41 = vld [vmem:[#allocation4 + $0x50] sm:$0xff] }
 0x699   : > { %v1546_v4 = vmul.f32 %v5302_v44, %v1538_v41 }
 0x69a   : > { %1588 = vst.msk [vmem:[#allocation4 + $0x60] sm:$0xff] %vm1195_vm3, %v1580_v23  ;;  %2533 = vrot.lane.b32.xlu1 %v2458_v31, %s4283_s16  ;;  %v5683_v31 = vpop.permute.xlu1 %2475  ;;  %v1539_v23 = vld [vmem:[#allocation4 + $0x58] sm:$0xff] }
 0x69b   : > { %1727 = vrot.lane.b32.xlu2 %v5612_v36, %s4284_s24  ;;  %v5687_v36 = vpop.permute.xlu2 %2485 }
 0x69f   : > { %v1575_v61 = vpop.xlane.xlu0 %1574 }
 0x6a0   : > { %v1583_v8 = vadd.f32 %v1575_v61, %v1551_v48  ;;  %v1547_v61 = vmul.f32 %v5306_v20, %v1539_v23  ;;  %v2353_v20 = vld [vmem:[#allocation4 + $0xc8] sm:$0xff] }
 0x6a1   : > { %v2357_v23 = vld [vmem:[#allocation4 + $0xe8] sm:$0xff] }
 0x6a2   : > { %1591 = vst.msk [vmem:[#allocation4 + $0x78] sm:$0xff] %vm1195_vm3, %v1583_v8  ;;  %2539 = vrot.lane.b32.xlu1 %v2465_v46, %s4283_s16  ;;  %v5690_v29 = vpop.permute.xlu1 %2495 }
 0x6a3   : > { %2529 = vrot.lane.b32.xlu2 %v2453_v11, %s4283_s16  ;;  %v5693_v57 = vpop.permute.xlu2 %2500  ;;  %v1536_v11 = vld [vmem:[#allocation4 + $0x40] sm:$0xff] }
 0x6a4   : > { %v1544_v24 = vmul.f32 %v5295_v0, %v1536_v11  ;;  %v1542_v0 = vld [vmem:[#allocation4 + $0x70] sm:$0xff] }
 0x6a5   : > { %v1550_v60 = vmul.f32 %v5330_v63, %v1542_v0 }
 0x6a7   : > { %v2370_v21 = vpop.xlane.xlu0 %2369 }
 0x6a8   : > { %v2392_v3 = vadd.f32 %v2370_v21, %v2360_v53  ;;  %v1549_v53 = vmul.f32 %v5316_v58, %v1541_v13 }
 0x6aa   : > { %2400 = vst.msk [vmem:[#allocation4 + $0xc0] sm:$0xff] %vm1195_vm3, %v2392_v3  ;;  %v5695_v54 = vpop.permute.xlu1 %2510 }
 0x6ab   : > { %2535 = vrot.lane.b32.xlu2 %v2460_v37, %s4283_s16 }
 0x6af   : > { %v2379_v25 = vpop.xlane.xlu0 %2378 }
 0x6b0   : > { %v2395_v47 = vadd.f32 %v2379_v25, %v2363_v5  ;;  %v2354_v25 = vld [vmem:[#allocation4 + $0xd0] sm:$0xff] }
 0x6b2   : > { %2403 = vst.msk [vmem:[#allocation4 + $0xd8] sm:$0xff] %vm1195_vm3, %v2395_v47  ;;  %v2362_v47 = vmul.f32 %v5543_v40, %v2354_v25 }
 0x6be   : > { %v1554_v43 = vpop.xlane.xlu2 %1553 }
 0x6bf   : > { %v1576_v37 = vadd.f32 %v1554_v43, %v1544_v24  ;;  %v2361_v43 = vmul.f32 %v5463_v33, %v2353_v20 }
 0x6c1   : > { %1584 = vst.msk [vmem:[#allocation4 + $0x40] sm:$0xff] %vm1195_vm3, %v1576_v37  ;;  %v2358_v37 = vld [vmem:[#allocation4 + $0xf0] sm:$0xff] }
 0x6c2   : > { %v2366_v63 = vmul.f32 %v5501_v38, %v2358_v37  ;;  %v2359_v38 = vld [vmem:[#allocation4 + $0xf8] sm:$0xff] }
 0x6c4   : > { %v1560_v55 = vpop.xlane.xlu1 %1559 }
 0x6c5   : > { %v1578_v48 = vadd.f32 %v1560_v55, %v1546_v4 }
 0x6c6   : > { %v1563_v8 = vpop.xlane.xlu2 %1562 }
 0x6c7   : > { %1586 = vst.msk [vmem:[#allocation4 + $0x50] sm:$0xff] %vm1195_vm3, %v1578_v48  ;;  %v1579_v46 = vadd.f32 %v1563_v8, %v1547_v61  ;;  %v2356_v48 = vld [vmem:[#allocation4 + $0xe0] sm:$0xff]  ;;  %v2365_v61 = vmul.f32 %v5553_v16, %v2357_v23 }
 0x6c8   : > { %v2364_v33 = vmul.f32 %v5550_v7, %v2356_v48 }
 0x6c9   : > { %1587 = vst.msk [vmem:[#allocation4 + $0x58] sm:$0xff] %vm1195_vm3, %v1579_v46 }
 0x6cc   : > { %v1569_v21 = vpop.xlane.xlu1 %1568 }
 0x6cd   : > { %v1581_v3 = vadd.f32 %v1569_v21, %v1549_v53  ;;  %v2367_v53 = vmul.f32 %v5560_v14, %v2359_v38 }
 0x6ce   : > { %v1572_v5 = vpop.xlane.xlu2 %1571 }
 0x6cf   : > { %1589 = vst.msk [vmem:[#allocation4 + $0x68] sm:$0xff] %vm1195_vm3, %v1581_v3  ;;  %v1582_v44 = vadd.f32 %v1572_v5, %v1550_v60  ;;  %v1698_v3 = vmul.f32 %v5630_v26, %v5402_v2  ;;  %v1697_v5 = vmul.f32 %v5602_v12, %v5420_v39 }
 0x6d1   : > { %1590 = vst.msk [vmem:[#allocation4 + $0x70] sm:$0xff] %vm1195_vm3, %v1582_v44 }
 0x6d4   : > { %v2376_v11 = vpop.xlane.xlu1 %2375 }
 0x6d5   : > { %v2394_v24 = vadd.f32 %v2376_v11, %v2362_v47 }
 0x6d6   : > { %v2373_v58 = vpop.xlane.xlu2 %2372 }
 0x6d7   : > { %2402 = vst.msk [vmem:[#allocation4 + $0xd0] sm:$0xff] %vm1195_vm3, %v2394_v24  ;;  %v2393_v41 = vadd.f32 %v2373_v58, %v2361_v43  ;;  %v3842_v24 = vld [vmem:[#allocation5 + $0x8] sm:$0xff]  ;;  %v3843_v43 = vld [vmem:[#allocation5 + $0x10] sm:$0xff] }
 0x6d8   : > { %v1699_v39 = vmul.f32 %v3842_v24, %v5425_v32  ;;  %v1702_v37 = vmul.f32 %v3843_v43, %v5451_v9  ;;  %v2107_v58 = vmul.f32 %v3842_v24, %v5579_v10 }
 0x6d9   : > { %2401 = vst.msk [vmem:[#allocation4 + $0xc8] sm:$0xff] %vm1195_vm3, %v2393_v41  ;;  %v2388_v4 = vpop.xlane.xlu0 %2387 }
 0x6da   : > { %v2398_v55 = vadd.f32 %v2388_v4, %v2366_v63  ;;  %v1701_v63 = vmul.f32 %v5639_v22, %v5443_v56 }
 0x6dc   : > { %2406 = vst.msk [vmem:[#allocation4 + $0xf0] sm:$0xff] %vm1195_vm3, %v2398_v55  ;;  %v2385_v40 = vpop.xlane.xlu1 %2384 }
 0x6dd   : > { %v2397_v8 = vadd.f32 %v2385_v40, %v2365_v61 }
 0x6de   : > { %v2382_v46 = vpop.xlane.xlu2 %2381 }
 0x6df   : > { %2405 = vst.msk [vmem:[#allocation4 + $0xe8] sm:$0xff] %vm1195_vm3, %v2397_v8  ;;  %v2396_v13 = vadd.f32 %v2382_v46, %v2364_v33  ;;  %v6000_v46 = vld [vmem:[#allocation42_spill] sm:$0xff] }
 0x6e1   : > { %2404 = vst.msk [vmem:[#allocation4 + $0xe0] sm:$0xff] %vm1195_vm3, %v2396_v13  ;;  %v6001_v13 = vld [vmem:[#allocation44_spill] sm:$0xff] }
 0x6e4   : > { %v2468_v0 = vpop.f32.mrf.mxu0 }
 0x6e5   : > { %2541 = vrot.lane.b32.xlu2 %v2468_v0, %s4283_s16 }
 0x6e6   : > { %v2391_v21 = vpop.xlane.xlu2 %2390 }
 0x6e7   : > { %v2399_v16 = vadd.f32 %v2391_v21, %v2367_v53 }
 0x6e9   : > { %2407 = vst.msk [vmem:[#allocation4 + $0xf8] sm:$0xff] %vm1195_vm3, %v2399_v16 }
 0x6ec   : > { %v2470_v7 = vpop.f32.mrf.mxu0  ;;  %v1716_v60 = vpop.permute.xlu0 %1715 }
 0x6ed   : > { %v1738_v44 = vadd.f32 %v1716_v60, %v1698_v3  ;;  %2543 = vrot.lane.b32.xlu0 %v2470_v7, %s4283_s16  ;;  %v6003_v60 = vld [vmem:[#allocation45_spill] sm:$0xff] }
 0x6ee   : > { %v1714_v25 = vpop.permute.xlu2 %1713 }
 0x6ef   : > { %v2562_v20 = vsel %vm964_vm1, %v5131_v1, %v1738_v44  ;;  %v1737_v14 = vadd.f32 %v1714_v25, %v1697_v5  ;;  %v1703_v5 = vmul.f32 %v5623_v35, %v6003_v60  ;;  %v2517_v44 = vmul.f32 %v5639_v22, %v5690_v29 }
 0x6f0   : > { %v2570_v47 = vsel %vm1026_vm2, %v2562_v20, %v5634_v62  ;;  %v2515_v29 = vmul.f32 %v3842_v24, %v5687_v36  ;;  %v2519_v36 = vmul.f32 %v5623_v35, %v5659_v45 }
 0x6f1   : > { %v2561_v11 = vsel %vm964_vm1, %v5127_v28, %v1737_v14  ;;  %v2147_v28 = vadd.f32 %v5583_v15, %v2107_v58  ;;  %v5998_v15 = vld [vmem:[#allocation39_spill] sm:$0xff]  ;;  %v2513_v14 = vmul.f32 %v5602_v12, %v5683_v31  ;;  %v2516_v12 = vmul.f32 %v5647_v18, %v5610_v52 }
 0x6f2   : > { %v2569_v2 = vsel %vm1026_vm2, %v2561_v11, %v5606_v19  ;;  %v1324_v61 = vmul.f32 %v5998_v15, %v5610_v52 }
 0x6f4   : > { %v1724_v41 = vpop.permute.xlu0 %1723  ;;  %v1718_v1 = vpop.permute.xlu1 %1717 }
 0x6f5   : > { %v1742_v62 = vadd.f32 %v1724_v41, %v1702_v37  ;;  %v1739_v23 = vadd.f32 %v1718_v1, %v1699_v39  ;;  %v6004_v37 = vld [vmem:[#allocation40_spill] sm:$0xff] }
 0x6f6   : > { %v1722_v4 = vpop.permute.xlu2 %1721 }
 0x6f7   : > { %v2566_v19 = vsel %vm964_vm1, %v5156_v51, %v1742_v62  ;;  %v2563_v32 = vsel %vm964_vm1, %v5138_v42, %v1739_v23  ;;  %v1741_v55 = vadd.f32 %v1722_v4, %v1701_v63  ;;  %v5999_v51 = vld [vmem:[#allocation43_spill] sm:$0xff]  ;;  %v2514_v42 = vmul.f32 %v5630_v26, %v5637_v17  ;;  %v6002_v17 = vld [vmem:[#allocation41_spill] sm:$0xff] }
 0x6f8   : > { %v2571_v9 = vsel %vm1026_vm2, %v2563_v32, %v2147_v28  ;;  %v2574_v10 = vsel %vm1026_vm2, %v2566_v19, %v5595_v50  ;;  %v1700_v40 = vmul.f32 %v5999_v51, %v5610_v52  ;;  %v1332_v50 = vadd.f32 %v1324_v61, %v6000_v46 }
 0x6f9   : > { %v2565_v56 = vsel %vm964_vm1, %v5148_v34, %v1741_v55  ;;  %v1704_v34 = vmul.f32 %v5649_v30, %v6001_v13  ;;  %v2520_v32 = vmul.f32 %v5649_v30, %v5695_v54 }
 0x6fa   : > { %v2573_v48 = vsel %vm1026_vm2, %v2565_v56, %v5643_v27 }
 0x6fc   : > { %v2532_v8 = vpop.permute.xlu0 %2531  ;;  %v1720_v33 = vpop.permute.xlu1 %1719 }
 0x6fd   : > { %v2554_v38 = vadd.f32 %v2532_v8, %v2514_v42  ;;  %v1740_v0 = vadd.f32 %v1720_v33, %v1700_v40 }
 0x6fe   : > { %v1728_v27 = vpop.permute.xlu2 %1727 }
 0x6ff   : > { %v2579_v53 = vsel %vm2577_vm4, %v2570_v47, %v2554_v38  ;;  %v2564_v21 = vsel %vm964_vm1, %v1332_v50, %v1740_v0  ;;  %v1744_v16 = vadd.f32 %v1728_v27, %v1704_v34 }
 0x700   : > { %2587 = vst [vmem:[#allocation5 + $0x38] sm:$0xff] %v2579_v53  ;;  %v2572_v26 = vsel %vm1026_vm2, %v2564_v21, %v5617_v6 }
 0x701   : > { %v2568_v3 = vsel %vm964_vm1, %v6002_v17, %v1744_v16 }
 0x702   : > { %v2576_v7 = vsel %vm1026_vm2, %v2568_v3, %v5653_v49 }
 0x704   : > { %v2538_v25 = vpop.permute.xlu0 %2537  ;;  %v1726_v20 = vpop.permute.xlu1 %1725 }
 0x705   : > { %v2557_v47 = vadd.f32 %v2538_v25, %v2517_v44  ;;  %v1743_v11 = vadd.f32 %v1726_v20, %v1703_v5 }
 0x706   : > { %v2530_v6 = vpop.permute.xlu2 %2529 }
 0x707   : > { %v2582_v39 = vsel %vm2577_vm4, %v2573_v48, %v2557_v47  ;;  %v2567_v58 = vsel %vm964_vm1, %v6004_v37, %v1743_v11  ;;  %v2553_v49 = vadd.f32 %v2530_v6, %v2513_v14 }
 0x708   : > { %2590 = vst [vmem:[#allocation5 + $0x20] sm:$0xff] %v2582_v39  ;;  %v2575_v41 = vsel %vm1026_vm2, %v2567_v58, %v5628_v59  ;;  %v2518_v59 = vmul.f32 %v3843_v43, %v5693_v57 }
 0x709   : > { %v2578_v22 = vsel %vm2577_vm4, %v2569_v2, %v2553_v49 }
 0x70a   : > { %2586 = vst [vmem:[#allocation5] sm:$0xff] %v2578_v22 }
 0x70c   : > { %v2534_v1 = vpop.permute.xlu1 %2533 }
 0x70d   : > { %v2555_v31 = vadd.f32 %v2534_v1, %v2515_v29 }
 0x70e   : > { %v2536_v63 = vpop.permute.xlu2 %2535 }
 0x70f   : > { %v2580_v62 = vsel %vm2577_vm4, %v2571_v9, %v2555_v31  ;;  %v2556_v23 = vadd.f32 %v2536_v63, %v2516_v12 }
 0x710   : > { %2588 = vst [vmem:[#allocation5 + $0x8] sm:$0xff] %v2580_v62 }
 0x711   : > { %v2581_v28 = vsel %vm2577_vm4, %v2572_v26, %v2556_v23 }
 0x712   : > { %2589 = vst [vmem:[#allocation5 + $0x18] sm:$0xff] %v2581_v28 }
 0x714   : > { %v2540_v4 = vpop.permute.xlu1 %2539 }
 0x715   : > { %v2558_v2 = vadd.f32 %v2540_v4, %v2518_v59 }
 0x717   : > { %v2583_v19 = vsel %vm2577_vm4, %v2574_v10, %v2558_v2 }
 0x718   : > { %2591 = vst [vmem:[#allocation5 + $0x10] sm:$0xff] %v2583_v19 }
 0x73f   : > { %v2542_v52 = vpop.permute.xlu2 %2541 }
 0x740   : > { %v2559_v18 = vadd.f32 %v2542_v52, %v2519_v36 }
 0x742   : > { %v2584_v24 = vsel %vm2577_vm4, %v2575_v41, %v2559_v18 }
 0x743   : > { %2592 = vst [vmem:[#allocation5 + $0x30] sm:$0xff] %v2584_v24 }
 0x75f   : > { %v2544_v55 = vpop.permute.xlu0 %2543  ;;  %2597 = sbr.rel (%p3366_p1) target bundleno = 2237 (0x8bd), region = 84 }
 0x760   : > { %v2560_v9 = vadd.f32 %v2544_v55, %v2520_v32 }
 0x762   : > { %v2585_v57 = vsel %vm2577_vm4, %v2576_v7, %v2560_v9 }
 0x763   : > { %2593 = vst [vmem:[#allocation5 + $0x28] sm:$0xff] %v2585_v57 }
 0x764   : > { %v2674_v43 = vld [vmem:[#allocation4 + $0x60] sm:$0xff]  ;;  %v2612_v10 = vld [vmem:[#allocation4 + $0x30] sm:$0xff]  ;;  %v4287_v35 = vmov 0   ;;  %v2675_v45 = vld [vmem:[#allocation4 + $0x68] sm:$0xff] }
 0x765   : > { %v2610_v56 = vld [vmem:[#allocation4 + $0x20] sm:$0xff]  ;;  %3846 = vset.pattern.permute.xlu2 %v4287_v35  ;;  %3845 = vset.pattern.permute.xlu1 %v4287_v35  ;;  %3847 = vrcp.f32 %v2674_v43  ;;  %v2613_v30 = vld [vmem:[#allocation4 + $0x38] sm:$0xff]  ;;  %v2611_v54 = vld [vmem:[#allocation4 + $0x28] sm:$0xff] }
 0x766   : > { %3844 = vset.pattern.permute.xlu0 %v4287_v35  ;;  %3849 = vrcp.f32 %v2612_v10  ;;  %v2738_v51 = vld [vmem:[#allocation4 + $0xa0] sm:$0xff]  ;;  %v2677_v42 = vld [vmem:[#allocation4 + $0x78] sm:$0xff]  ;;  %v2676_v33 = vld [vmem:[#allocation4 + $0x70] sm:$0xff] }
 0x767   : > { %3851 = vrcp.f32 %v2610_v56  ;;  %v2741_v50 = vld [vmem:[#allocation4 + $0xb8] sm:$0xff]  ;;  %v2740_v34 = vld [vmem:[#allocation4 + $0xb0] sm:$0xff]  ;;  %v2739_v0 = vld [vmem:[#allocation4 + $0xa8] sm:$0xff] }
 0x768   : > { %3853 = vrcp.f32 %v2675_v45  ;;  %v2804_v53 = vld [vmem:[#allocation4 + $0xf0] sm:$0xff]  ;;  %v2803_v16 = vld [vmem:[#allocation4 + $0xe8] sm:$0xff]  ;;  %v2802_v17 = vld [vmem:[#allocation4 + $0xe0] sm:$0xff] }
 0x769   : > { %3855 = vrcp.f32 %v2613_v30  ;;  %v2607_v7 = vld [vmem:[#allocation4 + $0x8] sm:$0xff]  ;;  %v2606_v5 = vld [vmem:[#allocation4] sm:$0xff]  ;;  %v2805_v25 = vld [vmem:[#allocation4 + $0xf8] sm:$0xff] }
 0x76a   : > { %3857 = vrcp.f32 %v2611_v54  ;;  %v2670_v14 = vld [vmem:[#allocation4 + $0x40] sm:$0xff]  ;;  %v2609_v11 = vld [vmem:[#allocation4 + $0x18] sm:$0xff]  ;;  %v2608_v39 = vld [vmem:[#allocation4 + $0x10] sm:$0xff] }
 0x76b   : > { %v3848_v48 = vpop.eup %3847  ;;  %3859 = vrcp.f32 %v2738_v51  ;;  %v2673_v58 = vld [vmem:[#allocation4 + $0x58] sm:$0xff]  ;;  %v2672_v41 = vld [vmem:[#allocation4 + $0x50] sm:$0xff]  ;;  %v2671_v29 = vld [vmem:[#allocation4 + $0x48] sm:$0xff] }
 0x76c   : > { %v3850_v15 = vpop.eup %3849  ;;  %2708 = vperm.xlu2 %3846, %v3848_v48   ;;  %3861 = vrcp.f32 %v2677_v42  ;;  %v2736_v12 = vld [vmem:[#allocation4 + $0x90] sm:$0xff]  ;;  %v2735_v63 = vld [vmem:[#allocation4 + $0x88] sm:$0xff]  ;;  %v2734_v23 = vld [vmem:[#allocation4 + $0x80] sm:$0xff] }
 0x76d   : > { %v3852_v61 = vpop.eup %3851  ;;  %2654 = vperm.xlu1 %3845, %v3850_v15   ;;  %3863 = vrcp.f32 %v2676_v33  ;;  %v2799_v59 = vld [vmem:[#allocation4 + $0xc8] sm:$0xff]  ;;  %v2798_v2 = vld [vmem:[#allocation4 + $0xc0] sm:$0xff]  ;;  %v2737_v36 = vld [vmem:[#allocation4 + $0x98] sm:$0xff] }
 0x76e   : > { %2644 = vperm.xlu0 %3844, %v3852_v61   ;;  %v3854_v40 = vpop.eup %3853  ;;  %3865 = vrcp.f32 %v2741_v50  ;;  %v2801_v24 = vld [vmem:[#allocation4 + $0xd8] sm:$0xff]  ;;  %v2800_v55 = vld [vmem:[#allocation4 + $0xd0] sm:$0xff]  ;;  %v3438_v45 = vld [vmem:[#allocation17 + $0x28] sm:$0xff] }
 0x76f   : > { %v3856_v8 = vpop.eup %3855  ;;  %3867 = vrcp.f32 %v2740_v34  ;;  %v3440_v10 = vld [vmem:[#allocation17 + $0x38] sm:$0xff]  ;;  %v3439_v56 = vld [vmem:[#allocation17 + $0x30] sm:$0xff]  ;;  %v3437_v30 = vld [vmem:[#allocation17 + $0x20] sm:$0xff] }
 0x770   : > { %v3858_v46 = vpop.eup %3857  ;;  %3869 = vrcp.f32 %v2739_v0  ;;  %3501 = vmatpush.bf16.msra.mxu2 %v3440_v10  ;;  %3502 = vmatpush.bf16.msra.mxu3 %v3440_v10  ;;  %v3436_v54 = vld [vmem:[#allocation17 + $0x18] sm:$0xff]  ;;  %v3435_v15 = vld [vmem:[#allocation17 + $0x10] sm:$0xff]  ;;  %v3434_v61 = vld [vmem:[#allocation17 + $0x8] sm:$0xff] }
 0x771   : > { %v3860_v13 = vpop.eup %3859  ;;  %3871 = vrcp.f32 %v2804_v53  ;;  %2954 = vmatpush.bf16.msra.mxu0 %v3440_v10  ;;  %3500 = vmatpush.bf16.msra.mxu1 %v3440_v10 }
 0x772   : > { %v3862_v38 = vpop.eup %3861  ;;  %3873 = vrcp.f32 %v2803_v16 }
 0x773   : > { %v3864_v27 = vpop.eup %3863  ;;  %3875 = vrcp.f32 %v2802_v17 }
 0x774   : > { %2713 = vperm.xlu2 %3846, %v3854_v40   ;;  %v3866_v21 = vpop.eup %3865  ;;  %3877 = vrcp.f32 %v2607_v7  ;;  %3504 = vmatpush.bf16.msra.mxu2 %v3439_v56 }
 0x775   : > { %2659 = vperm.xlu1 %3845, %v3856_v8   ;;  %v3868_v26 = vpop.eup %3867  ;;  %3879 = vrcp.f32 %v2606_v5  ;;  %3505 = vmatpush.bf16.msra.mxu3 %v3439_v56  ;;  %v3433_v8 = vld [vmem:[#allocation17] sm:$0xff] }
 0x776   : > { %2649 = vperm.xlu0 %3844, %v3858_v46   ;;  %v3870_v3 = vpop.eup %3869  ;;  %3881 = vrcp.f32 %v2805_v25  ;;  %2955 = vmatpush.bf16.msra.mxu0 %v3439_v56 }
 0x777   : > { %v3872_v60 = vpop.eup %3871  ;;  %3883 = vrcp.f32 %v2670_v14  ;;  %3503 = vmatpush.bf16.msra.mxu1 %v3439_v56 }
 0x778   : > { %v3874_v44 = vpop.eup %3873  ;;  %3885 = vrcp.f32 %v2609_v11  ;;  %3507 = vmatpush.bf16.msra.mxu2 %v3438_v45 }
 0x779   : > { %v3876_v20 = vpop.eup %3875  ;;  %3887 = vrcp.f32 %v2608_v39  ;;  %3508 = vmatpush.bf16.msra.mxu3 %v3438_v45  ;;  %v2605_v39 = vld [vmem:[#allocation5 + $0x28] sm:$0xff] }
 0x77a   : > { %v3878_v47 = vpop.eup %3877  ;;  %3889 = vrcp.f32 %v2673_v58  ;;  %2956 = vmatpush.bf16.msra.mxu0 %v3438_v45 }
 0x77b   : > { %v3880_v6 = vpop.eup %3879  ;;  %3891 = vrcp.f32 %v2672_v41  ;;  %3506 = vmatpush.bf16.msra.mxu1 %v3438_v45 }
 0x77c   : > { %2772 = vperm.xlu2 %3846, %v3860_v13   ;;  %v3882_v37 = vpop.eup %3881  ;;  %3893 = vrcp.f32 %v2671_v29  ;;  %3510 = vmatpush.bf16.msra.mxu2 %v3437_v30 }
 0x77d   : > { %2723 = vperm.xlu1 %3845, %v3862_v38   ;;  %v3884_v49 = vpop.eup %3883  ;;  %3895 = vrcp.f32 %v2736_v12  ;;  %3511 = vmatpush.bf16.msra.mxu3 %v3437_v30 }
 0x77e   : > { %2718 = vperm.xlu0 %3844, %v3864_v27   ;;  %v3886_v22 = vpop.eup %3885  ;;  %3897 = vrcp.f32 %v2735_v63  ;;  %2957 = vmatpush.bf16.msra.mxu0 %v3437_v30  ;;  %v2602_v27 = vld [vmem:[#allocation5 + $0x20] sm:$0xff] }
 0x77f   : > { %v3888_v1 = vpop.eup %3887  ;;  %3899 = vrcp.f32 %v2734_v23  ;;  %3509 = vmatpush.bf16.msra.mxu1 %v3437_v30 }
 0x780   : > { %v3890_v31 = vpop.eup %3889  ;;  %3901 = vrcp.f32 %v2799_v59  ;;  %3513 = vmatpush.bf16.msra.mxu2 %v3436_v54 }
 0x781   : > { %v3892_v62 = vpop.eup %3891  ;;  %3903 = vrcp.f32 %v2798_v2  ;;  %3514 = vmatpush.bf16.msra.mxu3 %v3436_v54 }
 0x782   : > { %v3894_v28 = vpop.eup %3893  ;;  %3905 = vrcp.f32 %v2737_v36  ;;  %2958 = vmatpush.bf16.msra.mxu0 %v3436_v54 }
 0x783   : > { %v3896_v4 = vpop.eup %3895  ;;  %3907 = vrcp.f32 %v2801_v24  ;;  %3512 = vmatpush.bf16.msra.mxu1 %v3436_v54  ;;  %v2599_v54 = vld [vmem:[#allocation5 + $0x38] sm:$0xff] }
 0x784   : > { %2787 = vperm.xlu2 %3846, %v3866_v21   ;;  %v3898_v19 = vpop.eup %3897  ;;  %3909 = vrcp.f32 %v2800_v55  ;;  %3516 = vmatpush.bf16.msra.mxu2 %v3435_v15  ;;  %v2603_v21 = vld [vmem:[#allocation5 + $0x10] sm:$0xff] }
 0x785   : > { %2782 = vperm.xlu1 %3845, %v3868_v26   ;;  %v3900_v52 = vpop.eup %3899  ;;  %3517 = vmatpush.bf16.msra.mxu3 %v3435_v15 }
 0x786   : > { %2777 = vperm.xlu0 %3844, %v3870_v3   ;;  %v3902_v18 = vpop.eup %3901  ;;  %2959 = vmatpush.bf16.msra.mxu0 %v3435_v15 }
 0x787   : > { %v3904_v32 = vpop.eup %3903  ;;  %3515 = vmatpush.bf16.msra.mxu1 %v3435_v15  ;;  %v2598_v15 = vld [vmem:[#allocation5] sm:$0xff] }
 0x788   : > { %v3906_v9 = vpop.eup %3905  ;;  %3519 = vmatpush.bf16.msra.mxu2 %v3434_v61 }
 0x789   : > { %v3908_v57 = vpop.eup %3907  ;;  %3520 = vmatpush.bf16.msra.mxu3 %v3434_v61 }
 0x78a   : > { %v3910_v43 = vpop.eup %3909  ;;  %2960 = vmatpush.bf16.msra.mxu0 %v3434_v61 }
 0x78b   : > { %3518 = vmatpush.bf16.msra.mxu1 %v3434_v61 }
 0x78c   : > { %2846 = vperm.xlu2 %3846, %v3872_v60   ;;  %3522 = vmatpush.bf16.msra.mxu2 %v3433_v8 }
 0x78d   : > { %2841 = vperm.xlu1 %3845, %v3874_v44   ;;  %3523 = vmatpush.bf16.msra.mxu3 %v3433_v8 }
 0x78e   : > { %2836 = vperm.xlu0 %3844, %v3876_v20   ;;  %2961 = vmatpush.bf16.msra.mxu0 %v3433_v8 }
 0x78f   : > { %3521 = vmatpush.bf16.msra.mxu1 %v3433_v8 }
 0x794   : > { %2629 = vperm.xlu2 %3846, %v3878_v47  }
 0x795   : > { %2624 = vperm.xlu1 %3845, %v3880_v6  }
 0x796   : > { %2851 = vperm.xlu0 %3844, %v3882_v37   ;;  %v2604_v37 = vld [vmem:[#allocation5 + $0x30] sm:$0xff] }
 0x79c   : > { %2688 = vperm.xlu2 %3846, %v3884_v49  }
 0x79d   : > { %2639 = vperm.xlu1 %3845, %v3886_v22  }
 0x79e   : > { %2634 = vperm.xlu0 %3844, %v3888_v1  }
 0x7a4   : > { %2703 = vperm.xlu2 %3846, %v3890_v31  }
 0x7a5   : > { %2698 = vperm.xlu1 %3845, %v3892_v62  }
 0x7a6   : > { %2693 = vperm.xlu0 %3844, %v3894_v28  }
 0x7ac   : > { %2762 = vperm.xlu2 %3846, %v3896_v4  }
 0x7ad   : > { %2757 = vperm.xlu1 %3845, %v3898_v19  }
 0x7ae   : > { %2752 = vperm.xlu0 %3844, %v3900_v52  }
 0x7b4   : > { %2821 = vperm.xlu2 %3846, %v3902_v18  }
 0x7b5   : > { %2816 = vperm.xlu1 %3845, %v3904_v32  }
 0x7b6   : > { %2767 = vperm.xlu0 %3844, %v3906_v9  }
 0x7bd   : > { %2831 = vperm.xlu1 %3845, %v3908_v57  }
 0x7be   : > { %2826 = vperm.xlu0 %3844, %v3910_v43  }
 0x7c6   : > { %v2709_v35 = vpop.permute.xlu2 %2708 }
 0x7c7   : > { %v2730_v16 = vmul.f32 %v2709_v35, %v2602_v27 }
 0x7ce   : > { %v2714_v48 = vpop.permute.xlu2 %2713 }
 0x7cf   : > { %v2731_v17 = vmul.f32 %v2714_v48, %v2603_v21 }
 0x7d6   : > { %v2773_v51 = vpop.permute.xlu2 %2772 }
 0x7d7   : > { %v2794_v5 = vmul.f32 %v2773_v51, %v2602_v27 }
 0x7de   : > { %v2788_v50 = vpop.permute.xlu2 %2787 }
 0x7df   : > { %v2655_v40 = vpop.permute.xlu1 %2654  ;;  %v2797_v4 = vmul.f32 %v2788_v50, %v2605_v39 }
 0x7e0   : > { %v2645_v42 = vpop.permute.xlu0 %2644  ;;  %v2668_v31 = vmul.f32 %v2655_v40, %v2604_v37 }
 0x7e1   : > { %v2666_v26 = vmul.f32 %v2645_v42, %v2602_v27 }
 0x7e3   : > { %v2866_v44 = vsel %vm964_vm1, %v2666_v26, %v2730_v16 }
 0x7e4   : > { %v2874_v58 = vsel %vm1026_vm2, %v2866_v44, %v2794_v5 }
 0x7e6   : > { %v2847_v38 = vpop.permute.xlu2 %2846 }
 0x7e7   : > { %v2660_v33 = vpop.permute.xlu1 %2659  ;;  %v2860_v36 = vmul.f32 %v2847_v38, %v2604_v37 }
 0x7e8   : > { %v2650_v46 = vpop.permute.xlu0 %2649  ;;  %v2669_v63 = vmul.f32 %v2660_v33, %v2605_v39 }
 0x7e9   : > { %v2667_v3 = vmul.f32 %v2650_v46, %v2603_v21 }
 0x7eb   : > { %v2867_v20 = vsel %vm964_vm1, %v2667_v3, %v2731_v17  ;;  %v2601_v17 = vld [vmem:[#allocation5 + $0x18] sm:$0xff] }
 0x7ee   : > { %v2630_v7 = vpop.permute.xlu2 %2629 }
 0x7ef   : > { %v2724_v13 = vpop.permute.xlu1 %2723  ;;  %v2663_v51 = vmul.f32 %v2630_v7, %v2599_v54 }
 0x7f0   : > { %v2719_v34 = vpop.permute.xlu0 %2718  ;;  %v2733_v41 = vmul.f32 %v2724_v13, %v2605_v39 }
 0x7f1   : > { %v2732_v22 = vmul.f32 %v2719_v34, %v2604_v37 }
 0x7f2   : > { %v2869_v62 = vsel %vm964_vm1, %v2669_v63, %v2733_v41 }
 0x7f3   : > { %v2868_v23 = vsel %vm964_vm1, %v2668_v31, %v2732_v22  ;;  %v2877_v18 = vsel %vm1026_vm2, %v2869_v62, %v2797_v4 }
 0x7f6   : > { %v2689_v28 = vpop.permute.xlu2 %2688 }
 0x7f7   : > { %v2783_v0 = vpop.permute.xlu1 %2782  ;;  %v2726_v33 = vmul.f32 %v2689_v28, %v2598_v15 }
 0x7f8   : > { %v2778_v53 = vpop.permute.xlu0 %2777  ;;  %v2796_v1 = vmul.f32 %v2783_v0, %v2604_v37 }
 0x7f9   : > { %v2795_v60 = vmul.f32 %v2778_v53, %v2603_v21 }
 0x7fa   : > { %v2876_v2 = vsel %vm1026_vm2, %v2868_v23, %v2796_v1 }
 0x7fb   : > { %v2875_v11 = vsel %vm1026_vm2, %v2867_v20, %v2795_v60  ;;  %v2884_v24 = vsel %vm2577_vm4, %v2876_v2, %v2860_v36 }
 0x7fe   : > { %v2704_v43 = vpop.permute.xlu2 %2703 }
 0x7ff   : > { %v2842_v25 = vpop.permute.xlu1 %2841 }
 0x800   : > { %v2859_v14 = vmul.f32 %v2842_v25, %v2603_v21  ;;  %v2837_v47 = vpop.permute.xlu0 %2836  ;;  %v2600_v21 = vld [vmem:[#allocation5 + $0x8] sm:$0xff]  ;;  %v2729_v25 = vmul.f32 %v2704_v43, %v2601_v17 }
 0x801   : > { %v2858_v6 = vmul.f32 %v2837_v47, %v2602_v27 }
 0x802   : > { %v2883_v49 = vsel %vm2577_vm4, %v2875_v11, %v2859_v14 }
 0x803   : > { %v2882_v29 = vsel %vm2577_vm4, %v2874_v58, %v2858_v6 }
 0x804   : > { %v2888_v12 = vpack.c.bf16 %v2883_v49, %v2882_v29 }
 0x806   : > { %2972 = vmatmul.bf16.vlgmr.msra.gmra.mxu2 %v2888_v12  ;;  %v2763_v35 = vpop.permute.xlu2 %2762 }
 0x807   : > { %v2625_v59 = vpop.permute.xlu1 %2624  ;;  %v2792_v47 = vmul.f32 %v2763_v35, %v2600_v21 }
 0x808   : > { %v2852_v19 = vpop.permute.xlu0 %2851  ;;  %v2662_v40 = vmul.f32 %v2625_v59, %v2598_v15 }
 0x809   : > { %v2861_v52 = vmul.f32 %v2852_v19, %v2605_v39 }
 0x80a   : > { %v2862_v34 = vsel %vm964_vm1, %v2662_v40, %v2726_v33 }
 0x80b   : > { %v2885_v32 = vsel %vm2577_vm4, %v2877_v18, %v2861_v52 }
 0x80c   : > { %v2889_v55 = vpack.c.bf16 %v2885_v32, %v2884_v24 }
 0x80e   : > { %2977 = vmatmul.bf16.vlgmr.msra.gmra.mxu3 %v2889_v55  ;;  %v2822_v42 = vpop.permute.xlu2 %2821 }
 0x80f   : > { %v2640_v9 = vpop.permute.xlu1 %2639  ;;  %v2855_v38 = vmul.f32 %v2822_v42, %v2599_v54 }
 0x810   : > { %v2635_v57 = vpop.permute.xlu0 %2634  ;;  %v2665_v60 = vmul.f32 %v2640_v9, %v2601_v17 }
 0x811   : > { %v2664_v5 = vmul.f32 %v2635_v57, %v2600_v21 }
 0x812   : > { %v2865_v11 = vsel %vm964_vm1, %v2665_v60, %v2729_v25 }
 0x817   : > { %v2699_v10 = vpop.permute.xlu1 %2698 }
 0x818   : > { %v2694_v56 = vpop.permute.xlu0 %2693  ;;  %v2728_v3 = vmul.f32 %v2699_v10, %v2600_v21 }
 0x819   : > { %v2727_v48 = vmul.f32 %v2694_v56, %v2599_v54 }
 0x81a   : > { %v2864_v20 = vsel %vm964_vm1, %v2664_v5, %v2728_v3 }
 0x81b   : > { %v2863_v46 = vsel %vm964_vm1, %v2663_v51, %v2727_v48  ;;  %v2872_v49 = vsel %vm1026_vm2, %v2864_v20, %v2792_v47 }
 0x81f   : > { %v2758_v45 = vpop.permute.xlu1 %2757 }
 0x820   : > { %v2753_v30 = vpop.permute.xlu0 %2752  ;;  %v2791_v61 = vmul.f32 %v2758_v45, %v2599_v54 }
 0x821   : > { %v2790_v8 = vmul.f32 %v2753_v30, %v2598_v15 }
 0x822   : > { %v2871_v50 = vsel %vm1026_vm2, %v2863_v46, %v2791_v61 }
 0x823   : > { %v2870_v53 = vsel %vm1026_vm2, %v2862_v34, %v2790_v8  ;;  %v2879_v26 = vsel %vm2577_vm4, %v2871_v50, %v2855_v38 }
 0x827   : > { %v2817_v13 = vpop.permute.xlu1 %2816 }
 0x828   : > { %v2768_v0 = vpop.permute.xlu0 %2767  ;;  %v2854_v27 = vmul.f32 %v2817_v13, %v2598_v15 }
 0x829   : > { %v2793_v44 = vmul.f32 %v2768_v0, %v2601_v17 }
 0x82a   : > { %v2878_v16 = vsel %vm2577_vm4, %v2870_v53, %v2854_v27 }
 0x82b   : > { %v2886_v7 = vpack.c.bf16 %v2879_v26, %v2878_v16  ;;  %v2873_v37 = vsel %vm1026_vm2, %v2865_v11, %v2793_v44 }
 0x82d   : > { %2962 = vmatmul.bf16.vlgmr.msra.gmra.mxu0 %v2886_v7 }
 0x82f   : > { %v2832_v14 = vpop.permute.xlu1 %2831 }
 0x830   : > { %v2827_v6 = vpop.permute.xlu0 %2826  ;;  %v2857_v39 = vmul.f32 %v2832_v14, %v2601_v17 }
 0x831   : > { %v2856_v58 = vmul.f32 %v2827_v6, %v2600_v21 }
 0x832   : > { %v2881_v41 = vsel %vm2577_vm4, %v2873_v37, %v2857_v39 }
 0x833   : > { %v2880_v22 = vsel %vm2577_vm4, %v2872_v49, %v2856_v58 }
 0x834   : > { %v2887_v29 = vpack.c.bf16 %v2881_v41, %v2880_v22 }
 0x836   : > { %2967 = vmatmul.bf16.vlgmr.msra.gmra.mxu1 %v2887_v29 }
 0x889   : > { %v2973_v1 = vpop.f32.mrf.mxu2 }
 0x88a   : > { %2987 = vst [vmem:[%s4616_s7 + $0x20] sm:$0xff] %v2973_v1 }
 0x891   : > { %v2975_v12 = vpop.f32.mrf.mxu2  ;;  %v2978_v31 = vpop.f32.mrf.mxu3 }
 0x892   : > { %2988 = vst [vmem:[%s4616_s7 + $0x28] sm:$0xff] %v2975_v12 }
 0x893   : > { %2989 = vst [vmem:[%s4616_s7 + $0x30] sm:$0xff] %v2978_v31 }
 0x899   : > { %v2980_v63 = vpop.f32.mrf.mxu3 }
 0x89a   : > { %2990 = vst [vmem:[%s4616_s7 + $0x38] sm:$0xff] %v2980_v63 }
 0x8aa   : > { %v2963_v62 = vpop.f32.mrf.mxu0 }
 0x8ab   : > { %2983 = vst [vmem:[%s4616_s7] sm:$0xff] %v2963_v62 }
 0x8b2   : > { %v2965_v23 = vpop.f32.mrf.mxu0 }
 0x8b3   : > { %2984 = vst [vmem:[%s4616_s7 + $0x8] sm:$0xff] %v2965_v23  ;;  %v2968_v28 = vpop.f32.mrf.mxu1 }
 0x8b4   : > { %2985 = vst [vmem:[%s4616_s7 + $0x10] sm:$0xff] %v2968_v28 }
 0x8bb   : > { %v2970_v59 = vpop.f32.mrf.mxu1 }
 0x8bc   : > { %2986 = vst [vmem:[%s4616_s7 + $0x18] sm:$0xff] %v2970_v59 }
 0x8bd PF: > { %s6006_s1 = sld [smem:[#allocation28_spill]]  ;;  %s3006_s11 = sshll.u32 %s4616_s7, 4  ;;  %s3007_s11 = int_to_ptr.vmem [resolvable:$true] %s3006_s11 }
 0x8be   : > { %s6007_s2 = sld [smem:[#allocation29_spill]]  ;;  %s2992_s3 = scalar_lea.sflag [#allocation8], %s4588_s27 }
 0x8bf   : > { %s6009_s18 = sld [smem:[#allocation53_spill]] }
 0x8c3   : > { %s3400_s19 = sshll.u32 %s6006_s1, 3 }
 0x8c4   : > { %s3401_s6 = sshll.u32 %s6007_s2, 4 }
 0x8c5   : > { %s3003_s14 = sadd.s32 %s3401_s6, %s3400_s19  ;;  %s4141_s7 = scalar_lea.hbm %s6009_s18, 256 }
 0x8c6   : > { %s3402_s22 = sshll.u32 %s3003_s14, 3 }
 0x8c7   : > { %s3005_s20 = scalar_lea.hbm %s6009_s18, %s3402_s22 }
 0x8c8   : > { %s3008_s5 = sshll.u32 %s3005_s20, 4  ;;  %s3009_s5 = int_to_ptr.hbm [resolvable:$true] %s3008_s5 }
 0x8c9   : > { %s4135_s21 = sshra.s32 %s3009_s5, 4  ;;  %s4136_s21 = int_to_ptr.hbm [resolvable:$true] %s4135_s21 }
 0x8ca   : > { %s4137_s25 = scalar_lea.hbm %s4136_s21, 64  ;;  %p4142_p10 = scmp.lt.s32.totalorder %s4136_s21, %s6009_s18 }
 0x8cb   : > { %p4138_p11 = scmp.ne.s32.totalorder %s4136_s21, %s4137_s25  ;;  %p4143_p7 = scmp.lt.s32.totalorder %s4141_s7, %s4137_s25 }
 0x8cd   : > { %p4139_p13 = pnand %p4138_p11, %p4527_p5  ;;  %p4144_p8 = por %p4143_p7, %p4142_p10 }
 0x8cf   : > { %p4140_p0 = pneg %p4139_p13 }
 0x8d1   : > { %p4145_p6 = pnand %p4144_p8, %p4140_p0 }
 0x8d3   : > { %4148 = shalt.err (!%p4145_p6)
}
 0x8d4   : > { %s4288_s27 = smov 128   ;;  %s4289_s0 = smov 8  }
 0x8d5   : > { %3546 = dma.vmem_to_hbm [thread:$0]  (%p4527_p5), %s3007_s11, 1024, %s3009_s5, %s2992_s3, %s4288_s27, %s4288_s27, %s4289_s0  }
 0x8d6 PF: > { %s6010_s30 = sld [smem:[#allocation26_spill]]  ;;  %p3584_p2 = scmp.ge.s32.totalorder %s4271_s13, 2 }
 0x8d8   : > { %p3572_p4 = pnand %p3584_p2, %p4548_p12 }
 0x8da   : > { %p3573_p9 = pneg %p3572_p4 }
 0x8dc   : > { %s3023_s2 = sand.u32 1, %s6010_s30  }
 0x8dd   : > { %s3024_s19 = scalar_lea.sflag [#allocation8], %s3023_s2 }
 0x8de   : > { %4218 = dma.done.wait (%p3573_p9), %s3024_s19, 1024  }
 0x8df   : > { %4220 = vsyncadd (%p3573_p9), %s3024_s19, 4294966272  ;;  %s28_s13 = sadd.s32 1, %s4271_s13   ;;  %s6013_s24 = sld [smem:[#allocation24_spill]] }
 0x8e0   : > { %p5847_p3 = scmp.ge.s32.totalorder %s28_s13, 10   ;;  %s6014_s25 = sld [smem:[#allocation25_spill]] }
 0x8e1   : > { %s6015_s4 = sld [smem:[#allocation30_spill]]  ;;  %s6019_s26 = smov %s6040_s8 }
 0x8e2   : > { %s6016_s11 = sld [smem:[#allocation33_spill]]  ;;  %s6020_s27 = smov %s4239_s28 }
 0x8e3   : > { %s6017_s14 = sld [smem:[#allocation36_spill]]  ;;  %s6021_s28 = smov %s4243_s29 }
 0x8e4   : > { %s6018_s22 = sld [smem:[#allocation37_spill]]  ;;  %s6022_s29 = smov %s4560_s17 }
 0x8e5   : > { %s6023_s30 = smov %s4259_s10  ;;  %s6025_s9 = smov %s4267_s12 }
 0x8e6   :  { %27 = sbr.rel (!%p5847_p3) target bundleno = 23 (0x17), region = 147 }
 0x8e7   : > { %s6024_s8 = smov %s6015_s4 }
 0x8e8   : > { %s6026_s10 = smov %s6016_s11 }
 0x8e9   : > { %s6027_s11 = smov %s6017_s14 }
 0x8ea   : > { %s6028_s12 = smov %s6018_s22 }
 0x8eb   :  { %3030 = vsyncpa [#allocation7], 1 }
 0x8ec   :  { %3032 = vsyncpa [#allocation7 + $0x1], 1 }
 0x8ed   :  { %3033 = vsyncpa [#allocation10], 1 }
 0x8ee   :  { %3035 = vsyncpa [#allocation10 + $0x1], 1 }
 0x8ef   :  { %3036 = vsyncpa [#allocation13], 1 }
 0x8f0   :  { %3037 = vsyncpa [#allocation16], 1 }
 0x8f1   :  { %3038 = vsyncpa [#allocation8], 1 }
 0x8f2   :  { %3040 = vsyncpa [#allocation8 + $0x1], 1 }

</bundles_post_ra>
